<compile_context>
chip_gen: v6e
topology: v6e:2x2x1
jax: 0.10.0
libtpu: 0.0.40
codegen_flags: <defaults>
</compile_context>

<pallas_src>
import functools

import jax
import jax.numpy as jnp
from jax.experimental import pallas as pl
from jax.experimental.pallas import tpu as pltpu

EPS = 1e-5   # PyTorch InstanceNorm2d default (affine=False, biased variance)
LANE = 128   # TPU lane width


def _round_up(x, m):
    return (x + m - 1) // m * m


def _conv3x3_instance_norm(pad_ref, w_flat, mask, *, Q, Wp, n_valid, relu):
    """3x3 conv (zero pad 1) + InstanceNorm2d (+ optional ReLU) for one image held in VMEM.

    pad_ref: (scratch_rows, C) f32 scratch holding the zero-padded image, row-major
             (padded pixel (hp, wp) lives at flat row hp*Wp + wp).
    w_flat : (9*C, C) bf16 weight; row index = tap*C + c_in with tap = dh*3 + dw.
    mask   : (Q, 1) f32, 1.0 on real pixels, 0.0 on the 2 pad-gap rows per image row.
    Returns (Q, C) f32 with pad-gap rows zeroed.
    """
    # Build the (Q, 9C) patch slab: each tap is a contiguous row-slice of the padded image.
    taps = []
    for dh in range(3):
        for dw in range(3):
            start = dh * Wp + dw
            taps.append(pad_ref[start:start + Q, :].astype(jnp.bfloat16))
    patches = jnp.concatenate(taps, axis=-1)                           # (Q, 9C) bf16

    # Single big MXU matmul, fp32 accumulation.
    acc = jnp.dot(patches, w_flat, preferred_element_type=jnp.float32)  # (Q, C) f32

    # InstanceNorm2d: per-channel mean / biased variance over real pixels only.
    inv_n = 1.0 / float(n_valid)
    mean = jnp.sum(acc * mask, axis=0, keepdims=True) * inv_n            # (1, C)
    centered = acc - mean                                                # reused for var & out
    var = jnp.sum(centered * centered * mask, axis=0, keepdims=True) * inv_n
    out = centered * jax.lax.rsqrt(var + EPS)
    if relu:
        out = jnp.maximum(out, 0.0)
    return out * mask                                                    # zero the pad-gap rows


def _res_block_kernel(mask_ref, x_ref, w1_ref, w2_ref, o_ref, pad_ref, *, H, W):
    """One full ResBlock for one batch element, entirely in VMEM."""
    Wp = W + 2
    Q = H * Wp
    mask = mask_ref[...]                        # (Q, 1) f32
    x = x_ref[0]                                # (Q, C) f32, pad-gap rows are zero

    # Zero the padded-image scratch (borders + gap rows), then place the image interior:
    # image pixel (h, w) -> padded position (h+1, w+1) -> flat row (h*Wp + w) + Wp + 1.
    pad_ref[...] = jnp.zeros(pad_ref.shape, pad_ref.dtype)
    pad_ref[Wp + 1:Wp + 1 + Q, :] = x

    # conv1 + InstanceNorm + ReLU
    y = _conv3x3_instance_norm(pad_ref, w1_ref[...], mask,
                               Q=Q, Wp=Wp, n_valid=H * W, relu=True)

    # conv2 + InstanceNorm (intermediate y never leaves VMEM; gap rows of y are already zero,
    # so they land exactly on the zero border positions of the padded scratch).
    pad_ref[Wp + 1:Wp + 1 + Q, :] = y
    z = _conv3x3_instance_norm(pad_ref, w2_ref[...], mask,
                               Q=Q, Wp=Wp, n_valid=H * W, relu=False)

    # Residual add straight from the input block already resident in VMEM.
    o_ref[0] = (z + x).astype(o_ref.dtype)


def res_block_pallas(x_flat, mask, w1_flat, w2_flat, *, H, W):
    """x_flat: (B, H*(W+2), Cp) f32; w*_flat: (9*Cp, Cp) bf16; Cp is a multiple of 128."""
    B, Q, Cp = x_flat.shape
    Wp = W + 2
    assert Q == H * Wp
    # +2: the taps of the last pad-gap rows read two rows past padded position (H+1, W+1).
    scratch_rows = _round_up((H + 2) * Wp + 2, 8)

    # Per-grid-step VMEM working set: double-buffered I/O + weights + scratch + transients.
    est = (2 * Q * Cp * 4) * 2 \
        + 2 * 2 * (9 * Cp * Cp) * 2 \
        + scratch_rows * Cp * 4 \
        + Q * 9 * Cp * 2 \
        + 6 * Q * Cp * 4
    vmem_limit = int(min(max(2 * est, 8 * 1024 * 1024), 64 * 1024 * 1024))

    # TODO(synk): for very large images/channels (working set near v7x's 64 MiB VMEM), tile H
    #             into a second 'arbitrary' grid axis with a two-pass (sum/sumsq) InstanceNorm.
    # TODO(synk): when B == 1 on v7x, add a parallel row-block grid axis so both TCs stay busy.
    kernel = functools.partial(_res_block_kernel, H=H, W=W)
    return pl.pallas_call(
        kernel,
        out_shape=jax.ShapeDtypeStruct((B, Q, Cp), x_flat.dtype),
        grid=(B,),
        in_specs=[
            pl.BlockSpec((Q, 1), lambda i: (0, 0)),           # pad-gap mask (tiny)
            pl.BlockSpec((1, Q, Cp), lambda i: (i, 0, 0)),    # activations
            pl.BlockSpec((9 * Cp, Cp), lambda i: (0, 0)),     # conv1 weight (bf16)
            pl.BlockSpec((9 * Cp, Cp), lambda i: (0, 0)),     # conv2 weight (bf16)
        ],
        out_specs=pl.BlockSpec((1, Q, Cp), lambda i: (i, 0, 0)),
        scratch_shapes=[pltpu.VMEM((scratch_rows, Cp), jnp.float32)],
        compiler_params=pltpu.CompilerParams(
            dimension_semantics=("parallel",),   # one batch element per step; v7x shards B over 2 TCs
            vmem_limit_bytes=vmem_limit,
        ),
    )(mask, x_flat, w1_flat, w2_flat)


def _prep_weight(w, C, Cp):
    """(9, C_in, C_out) [tap = dh*3 + dw] -> channel-padded, flattened (9*Cp, Cp) bf16."""
    w = jnp.pad(w, ((0, 0), (0, Cp - C), (0, Cp - C)))
    return w.reshape(9 * Cp, Cp).astype(jnp.bfloat16)


def res_blocks(x_nchw, params_list):
    """ResBlocks.forward (norm='in', activation='relu', pad_type='zero'), NCHW in/out."""
    B, C, H, W = x_nchw.shape
    Cp = _round_up(C, LANE)
    Wp = W + 2
    Q = H * Wp

    # NCHW -> NHWC, pad channels to a lane-dense multiple of 128, right-pad every image row
    # with 2 zero columns and flatten the rows: (B, H*(W+2), Cp).
    x = jnp.transpose(x_nchw, (0, 2, 3, 1))
    x = jnp.pad(x, ((0, 0), (0, 0), (0, 2), (0, Cp - C)))
    x = x.reshape(B, Q, Cp)

    # Mask of real pixels vs. the 2 pad-gap rows per image row.
    mask = (jnp.arange(Q, dtype=jnp.int32) % Wp < W).astype(jnp.float32).reshape(Q, 1)

    for (w1, w2) in params_list:
        x = res_block_pallas(x, mask, _prep_weight(w1, C, Cp), _prep_weight(w2, C, Cp),
                             H=H, W=W)

    x = x.reshape(B, H, Wp, Cp)[:, :, :W, :C]
    return jnp.transpose(x, (0, 3, 1, 2))   # NHWC -> NCHW


def init_params(key, num_blocks, dim):
    """Synthetic conv weights stored as (9, c_in, c_out) with tap k = dh*3 + dw
    (equivalent to PyTorch (c_out, c_in, kh, kw)).  Conv biases are omitted on purpose:
    the affine-free InstanceNorm2d subtracts the per-channel mean, so any per-channel
    conv bias is cancelled exactly (bit-identical output) -- it would be dead compute."""
    params = []
    bound = 1.0 / (dim * 9) ** 0.5   # kaiming-uniform-like fan-in bound
    for i in range(num_blocks):
        kb = jax.random.fold_in(key, i)
        k1, k2 = jax.random.split(kb)
        w1 = jax.random.uniform(k1, (9, dim, dim), jnp.float32, -bound, bound)
        w2 = jax.random.uniform(k2, (9, dim, dim), jnp.float32, -bound, bound)
        params.append((w1, w2))
    return params


if __name__ == "__main__":
    num_blocks, dim = 2, 4
    B, H, W = 2, 16, 16

    key = jax.random.PRNGKey(0)
    kx, kp = jax.random.split(key)
    x = jax.random.normal(kx, (B, dim, H, W), jnp.float32)   # NCHW like PyTorch
    params = init_params(kp, num_blocks, dim)

    fwd = jax.jit(res_blocks)
    out = jax.block_until_ready(fwd(x, params))
    assert out.shape == (B, dim, H, W), out.shape
    assert bool(jnp.all(jnp.isfinite(out)))
    print("KERNEL_OK")
</pallas_src>

<mosaic_0001>
module attributes {stable_mosaic.version = 11 : i64} {
  func.func @_res_block_kernel(%arg0: i32, %arg1: memref<288x1xf32, #tpu.memory_space<vmem>>, %arg2: memref<1x288x128xf32, #tpu.memory_space<vmem>>, %arg3: memref<1152x128xbf16, #tpu.memory_space<vmem>>, %arg4: memref<1152x128xbf16, #tpu.memory_space<vmem>>, %arg5: memref<1x288x128xf32, #tpu.memory_space<vmem>>, %arg6: memref<328x128xf32, #tpu.memory_space<vmem>>) attributes {dimension_semantics = [#tpu.dimension_semantics<parallel>], iteration_bounds = array<i64: 2>, scalar_prefetch = 0 : i64, scratch_operands = 1 : i64, tpu.core_type = #tpu.core_type<tc>, window_params = [{pipeline_mode = #tpu.pipeline_mode<synchronous>, transform_indices = @transform_0, window_bounds = array<i64: 288, 1>}, {transform_indices = @transform_1, window_bounds = array<i64: 1, 288, 128>}, {pipeline_mode = #tpu.pipeline_mode<synchronous>, transform_indices = @transform_2, window_bounds = array<i64: 1152, 128>}, {pipeline_mode = #tpu.pipeline_mode<synchronous>, transform_indices = @transform_3, window_bounds = array<i64: 1152, 128>}, {transform_indices = @transform_4, window_bounds = array<i64: 1, 288, 128>}]} {
    %c0 = arith.constant 0 : index
    %c0_0 = arith.constant 0 : index
    %0 = vector.load %arg1[%c0, %c0_0] : memref<288x1xf32, #tpu.memory_space<vmem>>, vector<288x1xf32>
    %c0_1 = arith.constant 0 : index
    %c0_2 = arith.constant 0 : index
    %c0_3 = arith.constant 0 : index
    %1 = vector.load %arg2[%c0_1, %c0_2, %c0_3] : memref<1x288x128xf32, #tpu.memory_space<vmem>>, vector<1x288x128xf32>
    %2 = vector.shape_cast %1 : vector<1x288x128xf32> to vector<288x128xf32>
    %cst = arith.constant 0.000000e+00 : f32
    %3 = vector.broadcast %cst : f32 to vector<328x128xf32>
    %c0_4 = arith.constant 0 : index
    %c0_5 = arith.constant 0 : index
    %4 = vector.load %arg6[%c0_4, %c0_5] : memref<328x128xf32, #tpu.memory_space<vmem>>, vector<328x128xf32>
    tpu.vector_store %arg6[%c0_4, %c0_5], %3 {strides = array<i32>} : memref<328x128xf32, #tpu.memory_space<vmem>>, vector<328x128xf32>,
    %c19 = arith.constant 19 : index
    %c0_6 = arith.constant 0 : index
    %5 = vector.load %arg6[%c19, %c0_6] : memref<328x128xf32, #tpu.memory_space<vmem>>, vector<288x128xf32>
    tpu.vector_store %arg6[%c19, %c0_6], %2 {strides = array<i32>} : memref<328x128xf32, #tpu.memory_space<vmem>>, vector<288x128xf32>,
    %c0_7 = arith.constant 0 : index
    %c0_8 = arith.constant 0 : index
    %6 = vector.load %arg3[%c0_7, %c0_8] : memref<1152x128xbf16, #tpu.memory_space<vmem>>, vector<1152x128xbf16>
    %c0_9 = arith.constant 0 : index
    %c0_10 = arith.constant 0 : index
    %7 = vector.load %arg6[%c0_9, %c0_10] : memref<328x128xf32, #tpu.memory_space<vmem>>, vector<288x128xf32>
    %8 = arith.truncf %7 : vector<288x128xf32> to vector<288x128xbf16>
    %c1 = arith.constant 1 : index
    %c0_11 = arith.constant 0 : index
    %9 = vector.load %arg6[%c1, %c0_11] : memref<328x128xf32, #tpu.memory_space<vmem>>, vector<288x128xf32>
    %10 = arith.truncf %9 : vector<288x128xf32> to vector<288x128xbf16>
    %c2 = arith.constant 2 : index
    %c0_12 = arith.constant 0 : index
    %11 = vector.load %arg6[%c2, %c0_12] : memref<328x128xf32, #tpu.memory_space<vmem>>, vector<288x128xf32>
    %12 = arith.truncf %11 : vector<288x128xf32> to vector<288x128xbf16>
    %c18 = arith.constant 18 : index
    %c0_13 = arith.constant 0 : index
    %13 = vector.load %arg6[%c18, %c0_13] : memref<328x128xf32, #tpu.memory_space<vmem>>, vector<288x128xf32>
    %14 = arith.truncf %13 : vector<288x128xf32> to vector<288x128xbf16>
    %c19_14 = arith.constant 19 : index
    %c0_15 = arith.constant 0 : index
    %15 = vector.load %arg6[%c19_14, %c0_15] : memref<328x128xf32, #tpu.memory_space<vmem>>, vector<288x128xf32>
    %16 = arith.truncf %15 : vector<288x128xf32> to vector<288x128xbf16>
    %c20 = arith.constant 20 : index
    %c0_16 = arith.constant 0 : index
    %17 = vector.load %arg6[%c20, %c0_16] : memref<328x128xf32, #tpu.memory_space<vmem>>, vector<288x128xf32>
    %18 = arith.truncf %17 : vector<288x128xf32> to vector<288x128xbf16>
    %c36 = arith.constant 36 : index
    %c0_17 = arith.constant 0 : index
    %19 = vector.load %arg6[%c36, %c0_17] : memref<328x128xf32, #tpu.memory_space<vmem>>, vector<288x128xf32>
    %20 = arith.truncf %19 : vector<288x128xf32> to vector<288x128xbf16>
    %c37 = arith.constant 37 : index
    %c0_18 = arith.constant 0 : index
    %21 = vector.load %arg6[%c37, %c0_18] : memref<328x128xf32, #tpu.memory_space<vmem>>, vector<288x128xf32>
    %22 = arith.truncf %21 : vector<288x128xf32> to vector<288x128xbf16>
    %c38 = arith.constant 38 : index
    %c0_19 = arith.constant 0 : index
    %23 = vector.load %arg6[%c38, %c0_19] : memref<328x128xf32, #tpu.memory_space<vmem>>, vector<288x128xf32>
    %24 = arith.truncf %23 : vector<288x128xf32> to vector<288x128xbf16>
    %25 = tpu.concatenate %8, %10, %12, %14, %16, %18, %20, %22, %24 in 1 : vector<288x128xbf16>, vector<288x128xbf16>, vector<288x128xbf16>, vector<288x128xbf16>, vector<288x128xbf16>, vector<288x128xbf16>, vector<288x128xbf16>, vector<288x128xbf16>, vector<288x128xbf16> -> vector<288x1152xbf16>
    %cst_20 = arith.constant dense<0.000000e+00> : vector<288x128xf32>
    %26 = tpu.matmul %25, %6, %cst_20 {dimension_numbers = #tpu.dot_dimension_numbers<[1], [0], [0], [1], [0, 0, 1, 1], [], []>} : vector<288x1152xbf16>, vector<1152x128xbf16>, vector<288x128xf32> -> vector<288x128xf32>
    %27 = vector.broadcast %0 : vector<288x1xf32> to vector<288x128xf32>
    %28 = arith.mulf %26, %27 : vector<288x128xf32>
    %cst_21 = arith.constant dense<0.000000e+00> : vector<128xf32>
    %29 = vector.multi_reduction <add>, %28, %cst_21 [0] : vector<288x128xf32> to vector<128xf32>
    %30 = vector.shape_cast %29 : vector<128xf32> to vector<1x128xf32>
    %cst_22 = arith.constant 3.906250e-03 : f32
    %31 = vector.broadcast %cst_22 : f32 to vector<1x128xf32>
    %32 = arith.mulf %30, %31 : vector<1x128xf32>
    %33 = vector.broadcast %32 : vector<1x128xf32> to vector<288x128xf32>
    %34 = arith.subf %26, %33 : vector<288x128xf32>
    %35 = arith.mulf %34, %34 : vector<288x128xf32>
    %36 = vector.broadcast %0 : vector<288x1xf32> to vector<288x128xf32>
    %37 = arith.mulf %35, %36 : vector<288x128xf32>
    %cst_23 = arith.constant dense<0.000000e+00> : vector<128xf32>
    %38 = vector.multi_reduction <add>, %37, %cst_23 [0] : vector<288x128xf32> to vector<128xf32>
    %39 = vector.shape_cast %38 : vector<128xf32> to vector<1x128xf32>
    %cst_24 = arith.constant 3.906250e-03 : f32
    %40 = vector.broadcast %cst_24 : f32 to vector<1x128xf32>
    %41 = arith.mulf %39, %40 : vector<1x128xf32>
    %cst_25 = arith.constant 9.99999974E-6 : f32
    %42 = vector.broadcast %cst_25 : f32 to vector<1x128xf32>
    %43 = arith.addf %41, %42 : vector<1x128xf32>
    %44 = math.rsqrt %43 : vector<1x128xf32>
    %45 = vector.broadcast %44 : vector<1x128xf32> to vector<288x128xf32>
    %46 = arith.mulf %34, %45 : vector<288x128xf32>
    %cst_26 = arith.constant 0.000000e+00 : f32
    %47 = vector.broadcast %cst_26 : f32 to vector<288x128xf32>
    %48 = arith.maximumf %46, %47 : vector<288x128xf32>
    %49 = vector.broadcast %0 : vector<288x1xf32> to vector<288x128xf32>
    %50 = arith.mulf %48, %49 : vector<288x128xf32>
    %c19_27 = arith.constant 19 : index
    %c0_28 = arith.constant 0 : index
    %51 = vector.load %arg6[%c19_27, %c0_28] : memref<328x128xf32, #tpu.memory_space<vmem>>, vector<288x128xf32>
    tpu.vector_store %arg6[%c19_27, %c0_28], %50 {strides = array<i32>} : memref<328x128xf32, #tpu.memory_space<vmem>>, vector<288x128xf32>,
    %c0_29 = arith.constant 0 : index
    %c0_30 = arith.constant 0 : index
    %52 = vector.load %arg4[%c0_29, %c0_30] : memref<1152x128xbf16, #tpu.memory_space<vmem>>, vector<1152x128xbf16>
    %c0_31 = arith.constant 0 : index
    %c0_32 = arith.constant 0 : index
    %53 = vector.load %arg6[%c0_31, %c0_32] : memref<328x128xf32, #tpu.memory_space<vmem>>, vector<288x128xf32>
    %54 = arith.truncf %53 : vector<288x128xf32> to vector<288x128xbf16>
    %c1_33 = arith.constant 1 : index
    %c0_34 = arith.constant 0 : index
    %55 = vector.load %arg6[%c1_33, %c0_34] : memref<328x128xf32, #tpu.memory_space<vmem>>, vector<288x128xf32>
    %56 = arith.truncf %55 : vector<288x128xf32> to vector<288x128xbf16>
    %c2_35 = arith.constant 2 : index
    %c0_36 = arith.constant 0 : index
    %57 = vector.load %arg6[%c2_35, %c0_36] : memref<328x128xf32, #tpu.memory_space<vmem>>, vector<288x128xf32>
    %58 = arith.truncf %57 : vector<288x128xf32> to vector<288x128xbf16>
    %c18_37 = arith.constant 18 : index
    %c0_38 = arith.constant 0 : index
    %59 = vector.load %arg6[%c18_37, %c0_38] : memref<328x128xf32, #tpu.memory_space<vmem>>, vector<288x128xf32>
    %60 = arith.truncf %59 : vector<288x128xf32> to vector<288x128xbf16>
    %c19_39 = arith.constant 19 : index
    %c0_40 = arith.constant 0 : index
    %61 = vector.load %arg6[%c19_39, %c0_40] : memref<328x128xf32, #tpu.memory_space<vmem>>, vector<288x128xf32>
    %62 = arith.truncf %61 : vector<288x128xf32> to vector<288x128xbf16>
    %c20_41 = arith.constant 20 : index
    %c0_42 = arith.constant 0 : index
    %63 = vector.load %arg6[%c20_41, %c0_42] : memref<328x128xf32, #tpu.memory_space<vmem>>, vector<288x128xf32>
    %64 = arith.truncf %63 : vector<288x128xf32> to vector<288x128xbf16>
    %c36_43 = arith.constant 36 : index
    %c0_44 = arith.constant 0 : index
    %65 = vector.load %arg6[%c36_43, %c0_44] : memref<328x128xf32, #tpu.memory_space<vmem>>, vector<288x128xf32>
    %66 = arith.truncf %65 : vector<288x128xf32> to vector<288x128xbf16>
    %c37_45 = arith.constant 37 : index
    %c0_46 = arith.constant 0 : index
    %67 = vector.load %arg6[%c37_45, %c0_46] : memref<328x128xf32, #tpu.memory_space<vmem>>, vector<288x128xf32>
    %68 = arith.truncf %67 : vector<288x128xf32> to vector<288x128xbf16>
    %c38_47 = arith.constant 38 : index
    %c0_48 = arith.constant 0 : index
    %69 = vector.load %arg6[%c38_47, %c0_48] : memref<328x128xf32, #tpu.memory_space<vmem>>, vector<288x128xf32>
    %70 = arith.truncf %69 : vector<288x128xf32> to vector<288x128xbf16>
    %71 = tpu.concatenate %54, %56, %58, %60, %62, %64, %66, %68, %70 in 1 : vector<288x128xbf16>, vector<288x128xbf16>, vector<288x128xbf16>, vector<288x128xbf16>, vector<288x128xbf16>, vector<288x128xbf16>, vector<288x128xbf16>, vector<288x128xbf16>, vector<288x128xbf16> -> vector<288x1152xbf16>
    %cst_49 = arith.constant dense<0.000000e+00> : vector<288x128xf32>
    %72 = tpu.matmul %71, %52, %cst_49 {dimension_numbers = #tpu.dot_dimension_numbers<[1], [0], [0], [1], [0, 0, 1, 1], [], []>} : vector<288x1152xbf16>, vector<1152x128xbf16>, vector<288x128xf32> -> vector<288x128xf32>
    %73 = vector.broadcast %0 : vector<288x1xf32> to vector<288x128xf32>
    %74 = arith.mulf %72, %73 : vector<288x128xf32>
    %cst_50 = arith.constant dense<0.000000e+00> : vector<128xf32>
    %75 = vector.multi_reduction <add>, %74, %cst_50 [0] : vector<288x128xf32> to vector<128xf32>
    %76 = vector.shape_cast %75 : vector<128xf32> to vector<1x128xf32>
    %cst_51 = arith.constant 3.906250e-03 : f32
    %77 = vector.broadcast %cst_51 : f32 to vector<1x128xf32>
    %78 = arith.mulf %76, %77 : vector<1x128xf32>
    %79 = vector.broadcast %78 : vector<1x128xf32> to vector<288x128xf32>
    %80 = arith.subf %72, %79 : vector<288x128xf32>
    %81 = arith.mulf %80, %80 : vector<288x128xf32>
    %82 = vector.broadcast %0 : vector<288x1xf32> to vector<288x128xf32>
    %83 = arith.mulf %81, %82 : vector<288x128xf32>
    %cst_52 = arith.constant dense<0.000000e+00> : vector<128xf32>
    %84 = vector.multi_reduction <add>, %83, %cst_52 [0] : vector<288x128xf32> to vector<128xf32>
    %85 = vector.shape_cast %84 : vector<128xf32> to vector<1x128xf32>
    %cst_53 = arith.constant 3.906250e-03 : f32
    %86 = vector.broadcast %cst_53 : f32 to vector<1x128xf32>
    %87 = arith.mulf %85, %86 : vector<1x128xf32>
    %cst_54 = arith.constant 9.99999974E-6 : f32
    %88 = vector.broadcast %cst_54 : f32 to vector<1x128xf32>
    %89 = arith.addf %87, %88 : vector<1x128xf32>
    %90 = math.rsqrt %89 : vector<1x128xf32>
    %91 = vector.broadcast %90 : vector<1x128xf32> to vector<288x128xf32>
    %92 = arith.mulf %80, %91 : vector<288x128xf32>
    %93 = vector.broadcast %0 : vector<288x1xf32> to vector<288x128xf32>
    %94 = arith.mulf %92, %93 : vector<288x128xf32>
    %95 = arith.addf %94, %2 : vector<288x128xf32>
    %c0_55 = arith.constant 0 : index
    %c0_56 = arith.constant 0 : index
    %c0_57 = arith.constant 0 : index
    %96 = vector.load %arg5[%c0_55, %c0_56, %c0_57] : memref<1x288x128xf32, #tpu.memory_space<vmem>>, vector<1x288x128xf32>
    %97 = vector.shape_cast %96 : vector<1x288x128xf32> to vector<288x128xf32>
    %98 = vector.shape_cast %95 : vector<288x128xf32> to vector<1x288x128xf32>
    tpu.vector_store %arg5[%c0_55, %c0_56, %c0_57], %98 {strides = array<i32>} : memref<1x288x128xf32, #tpu.memory_space<vmem>>, vector<1x288x128xf32>,
    return
  }
  func.func @transform_0(%arg0: i32) -> (i32, i32) {
    %c0_i32 = arith.constant 0 : i32
    %c0_i32_0 = arith.constant 0 : i32
    %c0_i32_1 = arith.constant 0 : i32
    return %c0_i32, %c0_i32_0 : i32, i32
  }
  func.func @transform_1(%arg0: i32) -> (i32, i32, i32) {
    %c0_i32 = arith.constant 0 : i32
    %c0_i32_0 = arith.constant 0 : i32
    %c0_i32_1 = arith.constant 0 : i32
    return %arg0, %c0_i32, %c0_i32_0 : i32, i32, i32
  }
  func.func @transform_2(%arg0: i32) -> (i32, i32) {
    %c0_i32 = arith.constant 0 : i32
    %c0_i32_0 = arith.constant 0 : i32
    %c0_i32_1 = arith.constant 0 : i32
    return %c0_i32, %c0_i32_0 : i32, i32
  }
  func.func @transform_3(%arg0: i32) -> (i32, i32) {
    %c0_i32 = arith.constant 0 : i32
    %c0_i32_0 = arith.constant 0 : i32
    %c0_i32_1 = arith.constant 0 : i32
    return %c0_i32, %c0_i32_0 : i32, i32
  }
  func.func @transform_4(%arg0: i32) -> (i32, i32, i32) {
    %c0_i32 = arith.constant 0 : i32
    %c0_i32_0 = arith.constant 0 : i32
    %c0_i32_1 = arith.constant 0 : i32
    return %arg0, %c0_i32, %c0_i32_0 : i32, i32, i32
  }
}

</mosaic_0001>

<bundles_post_ra>
// kernel: res_blocks.2
= control target key start
LH: loop header
LB: loop body
LE: loop exit
PB: predicated region body
PF: predicated region fallthrough
CT: control target
= control target key end

     0   :  { %s5564_s15 = smov 0   ;;  %s8037_s0 = inlined_call_operand.vmem [shape: f32[288,1], index: 0, kind: input, shape index: {}]   ;;  %s8038_s1 = inlined_call_operand.vmem [shape: f32[2,288,128], index: 1, kind: input, shape index: {}]   ;;  %s8039_s2 = inlined_call_operand.vmem [shape: bf16[1152,128], index: 2, kind: input, shape index: {}]   ;;  %s8040_s3 = inlined_call_operand.vmem [shape: bf16[1152,128], index: 3, kind: input, shape index: {}]   ;;  %s8041_s4 = inlined_call_operand.vmem [shape: f32[2,288,128], index: 4, kind: output, shape index: {}]  }
   0x1 LB: > { %s5021_s16 = sadd.s32 4294967295, %s5534_s15   ;;  %p5025_p0 = scmp.ge.s32.totalorder %s5534_s15, 1  ;;  %s5534_s15 = sphi %s5564_s15, %s14_s15  }
   0x2   : > { %p162_p1 = scmp.lt.s32.totalorder %s5534_s15, 3 }
   0x4   : > { %p163_p2 = pnand %p5025_p0, %p162_p1 }
   0x6   : > { %166 = sbr.rel (%p163_p2) target bundleno = 1522 (0x5f2), region = 36 }
   0xb   : > { %v5343_v0 = vld [vmem:[%s8039_s2 + $0x38] sm:$0xff]   ;;  %v8042_v1 = vmov 0   ;;  %v5345_v3 = vld [vmem:[%s8039_s2 + $0x30] sm:$0xff]   ;;  %v5537_v4 = vmov 0.0   ;;  %v5347_v6 = vld [vmem:[%s8039_s2 + $0x28] sm:$0xff]   ;;  %p188_p3 = scmp.lt.s32.totalorder %s5021_s16, 1 }
   0xc   : > { %1308 = vmatprep.subr.bf16.mxu0 %v8042_v1  ;;  %1485 = vmatprep.subr.bf16.mxu1 %v8042_v1  ;;  %v5344_v2 = vld [vmem:[%s8039_s2 + $0xb8] sm:$0xff]   ;;  %271 = vst [vmem:[#allocation2] sm:$0xff] %v5537_v4  ;;  %272 = vst [vmem:[#allocation2 + $0x8] sm:$0xff] %v5537_v4  ;;  %v5346_v5 = vld [vmem:[%s8039_s2 + $0xb0] sm:$0xff]  }
   0xd   : > { %1309 = vmatpush1.bf16.msra.mxu0 %v5343_v0  ;;  %273 = vst [vmem:[#allocation2 + $0x10] sm:$0xff] %v5537_v4  ;;  %274 = vst [vmem:[#allocation2 + $0x18] sm:$0xff] %v5537_v4  ;;  %5341 = vset.pattern.permute.xlu0 %v8042_v1  ;;  %v5348_v7 = vld [vmem:[%s8039_s2 + $0xa8] sm:$0xff]   ;;  %v5349_v8 = vld [vmem:[%s8039_s2 + $0x20] sm:$0xff]   ;;  %s8430_s16 = smov (!%p188_p3, %s5021_s16), 1 }
   0xe   : > { %275 = vst [vmem:[#allocation2 + $0x20] sm:$0xff] %v5537_v4  ;;  %276 = vst [vmem:[#allocation2 + $0x28] sm:$0xff] %v5537_v4  ;;  %1486 = vmatpush1.bf16.msra.mxu1 %v5344_v2  ;;  %1310 = vmatprep.subr.bf16.mxu0 %v8042_v1  ;;  %v5350_v9 = vld [vmem:[%s8039_s2 + $0xa0] sm:$0xff]   ;;  %v5351_v10 = vld [vmem:[%s8039_s2 + $0x18] sm:$0xff]   ;;  %s5330_s21 = smul.u32 288, %s8430_s16 }
   0xf   : > { %277 = vst [vmem:[#allocation2 + $0x30] sm:$0xff] %v5537_v4  ;;  %278 = vst [vmem:[#allocation2 + $0x38] sm:$0xff] %v5537_v4  ;;  %1487 = vmatprep.subr.bf16.mxu1 %v8042_v1  ;;  %5342 = vset.pattern.permute.xlu1 %v8042_v1  ;;  %v5352_v11 = vld [vmem:[%s8039_s2 + $0x98] sm:$0xff]   ;;  %v5353_v12 = vld [vmem:[%s8039_s2 + $0x10] sm:$0xff]  }
  0x10   : > { %279 = vst [vmem:[#allocation2 + $0x40] sm:$0xff] %v5537_v4  ;;  %280 = vst [vmem:[#allocation2 + $0x48] sm:$0xff] %v5537_v4  ;;  %v5354_v13 = vld [vmem:[%s8039_s2 + $0x90] sm:$0xff]   ;;  %v5355_v14 = vld [vmem:[%s8039_s2 + $0x8] sm:$0xff]   ;;  %s5650_s28 = scalar_lea.vmem %s8038_s1, %s5330_s21  ;;  %s7956_s13 = scalar_lea.vmem %s8041_s4, %s5330_s21 }
  0x11   : > { %281 = vst [vmem:[#allocation2 + $0x50] sm:$0xff] %v5537_v4  ;;  %282 = vst [vmem:[#allocation2 + $0x58] sm:$0xff] %v5537_v4  ;;  %1311 = vmatpush1.bf16.msra.mxu0 %v5345_v3  ;;  %v5356_v15 = vld [vmem:[%s8039_s2 + $0x88] sm:$0xff]   ;;  %v5357_v16 = vld [vmem:[%s8039_s2] sm:$0xff]  }
  0x12   : > { %283 = vst [vmem:[#allocation2 + $0x60] sm:$0xff] %v5537_v4  ;;  %284 = vst [vmem:[#allocation2 + $0x68] sm:$0xff] %v5537_v4  ;;  %1488 = vmatpush1.bf16.msra.mxu1 %v5346_v5  ;;  %1312 = vmatprep.subr.bf16.mxu0 %v8042_v1  ;;  %v5358_v17 = vld [vmem:[%s8039_s2 + $0x80] sm:$0xff]   ;;  %v5359_v18 = vld [vmem:[%s8039_s2 + $0x78] sm:$0xff]  }
  0x13   : > { %285 = vst [vmem:[#allocation2 + $0x70] sm:$0xff] %v5537_v4  ;;  %286 = vst [vmem:[#allocation2 + $0x78] sm:$0xff] %v5537_v4  ;;  %1489 = vmatprep.subr.bf16.mxu1 %v8042_v1  ;;  %v5360_v19 = vld [vmem:[%s8039_s2 + $0xf8] sm:$0xff]   ;;  %v546_v20 = vld [vmem:[#allocation2 + $0x1] sm:$0xff] }
  0x14   : > { %287 = vst [vmem:[#allocation2 + $0x80] sm:$0xff] %v5537_v4  ;;  %288 = vst [vmem:[#allocation2 + $0x88] sm:$0xff] %v5537_v4  ;;  %v547_v21 = vld [vmem:[#allocation2 + $0x9] sm:$0xff]  ;;  %v235_v22 = vld [vmem:[%s5650_s28] sm:$0xff] }
  0x15   : > { %289 = vst [vmem:[#allocation2 + $0x90] sm:$0xff] %v5537_v4  ;;  %290 = vst [vmem:[#allocation2 + $0x98] sm:$0xff] %v5537_v4  ;;  %1313 = vmatpush1.bf16.msra.mxu0 %v5347_v6  ;;  %v5361_v23 = vld [vmem:[%s8039_s2 + $0x70] sm:$0xff]   ;;  %v582_v24 = vpack.c.bf16 %v547_v21, %v546_v20  ;;  %v236_v25 = vld [vmem:[%s5650_s28 + $0x8] sm:$0xff] }
  0x16   : > { %291 = vst [vmem:[#allocation2 + $0xa0] sm:$0xff] %v5537_v4  ;;  %292 = vst [vmem:[#allocation2 + $0xa8] sm:$0xff] %v5537_v4  ;;  %1490 = vmatpush1.bf16.msra.mxu1 %v5348_v7  ;;  %1314 = vmatprep.subr.bf16.mxu0 %v8042_v1  ;;  %v5362_v26 = vld [vmem:[%s8039_s2 + $0xf0] sm:$0xff]   ;;  %v238_v28 = vld [vmem:[%s5650_s28 + $0x18] sm:$0xff]  ;;  %v5538_v7 = vmov 0.0|0.0  }
  0x17   : > { %293 = vst [vmem:[#allocation2 + $0xb0] sm:$0xff] %v5537_v4  ;;  %294 = vst [vmem:[#allocation2 + $0xb8] sm:$0xff] %v5537_v4  ;;  %1491 = vmatprep.subr.bf16.mxu1 %v8042_v1  ;;  %v237_v27 = vld [vmem:[%s5650_s28 + $0x10] sm:$0xff]  ;;  %1340 = vmatprep.mubr.bf16.mxu0 %v582_v24  ;;  %v239_v29 = vld [vmem:[%s5650_s28 + $0x20] sm:$0xff] }
  0x18   : > { %295 = vst [vmem:[#allocation2 + $0xc0] sm:$0xff] %v5537_v4  ;;  %296 = vst [vmem:[#allocation2 + $0xc8] sm:$0xff] %v5537_v4  ;;  %v240_v30 = vld [vmem:[%s5650_s28 + $0x28] sm:$0xff]  ;;  %v241_v32 = vld [vmem:[%s5650_s28 + $0x30] sm:$0xff] }
  0x19   : > { %297 = vst [vmem:[#allocation2 + $0xd0] sm:$0xff] %v5537_v4  ;;  %298 = vst [vmem:[#allocation2 + $0xd8] sm:$0xff] %v5537_v4  ;;  %1315 = vmatpush1.bf16.msra.mxu0 %v5349_v8  ;;  %v5363_v31 = vld [vmem:[%s8039_s2 + $0x68] sm:$0xff]   ;;  %v242_v33 = vld [vmem:[%s5650_s28 + $0x38] sm:$0xff] }
  0x1a   : > { %299 = vst [vmem:[#allocation2 + $0xe0] sm:$0xff] %v5537_v4  ;;  %300 = vst [vmem:[#allocation2 + $0xe8] sm:$0xff] %v5537_v4  ;;  %1492 = vmatpush1.bf16.msra.mxu1 %v5350_v9  ;;  %1316 = vmatprep.subr.bf16.mxu0 %v8042_v1  ;;  %v5364_v34 = vld [vmem:[%s8039_s2 + $0xe8] sm:$0xff]   ;;  %v5365_v36 = vld [vmem:[%s8039_s2 + $0x60] sm:$0xff]  }
  0x1b   : > { %301 = vst [vmem:[#allocation2 + $0xf0] sm:$0xff] %v5537_v4  ;;  %302 = vst [vmem:[#allocation2 + $0xf8] sm:$0xff] %v5537_v4  ;;  %1493 = vmatprep.subr.bf16.mxu1 %v8042_v1  ;;  %v243_v39 = vld [vmem:[%s5650_s28 + $0x40] sm:$0xff]  ;;  %v244_v40 = vld [vmem:[%s5650_s28 + $0x48] sm:$0xff] }
  0x1c   : > { %303 = vst [vmem:[#allocation2 + $0x100] sm:$0xff] %v5537_v4  ;;  %304 = vst [vmem:[#allocation2 + $0x108] sm:$0xff] %v5537_v4  ;;  %v5366_v41 = vld [vmem:[%s8039_s2 + $0xe0] sm:$0xff]   ;;  %v5367_v42 = vld [vmem:[%s8039_s2 + $0x58] sm:$0xff]  }
  0x1d   : > { %305 = vst [vmem:[#allocation2 + $0x110] sm:$0xff] %v5537_v4  ;;  %306 = vst [vmem:[#allocation2 + $0x118] sm:$0xff] %v5537_v4  ;;  %1317 = vmatpush1.bf16.msra.mxu0 %v5351_v10  ;;  %v5368_v43 = vld [vmem:[%s8039_s2 + $0xd8] sm:$0xff]   ;;  %v245_v44 = vld [vmem:[%s5650_s28 + $0x50] sm:$0xff] }
  0x1e   : > { %307 = vst [vmem:[#allocation2 + $0x120] sm:$0xff] %v5537_v4  ;;  %308 = vst [vmem:[#allocation2 + $0x128] sm:$0xff] %v5537_v4  ;;  %1494 = vmatpush1.bf16.msra.mxu1 %v5352_v11  ;;  %1318 = vmatprep.subr.bf16.mxu0 %v8042_v1  ;;  %v5369_v45 = vld [vmem:[%s8039_s2 + $0x50] sm:$0xff]   ;;  %v246_v47 = vld [vmem:[%s5650_s28 + $0x58] sm:$0xff] }
  0x1f   : > { %309 = vst [vmem:[#allocation2 + $0x130] sm:$0xff] %v5537_v4  ;;  %310 = vst [vmem:[#allocation2 + $0x138] sm:$0xff] %v5537_v4  ;;  %1495 = vmatprep.subr.bf16.mxu1 %v8042_v1  ;;  %v5370_v46 = vld [vmem:[%s8039_s2 + $0xd0] sm:$0xff]   ;;  %v5371_v48 = vld [vmem:[%s8039_s2 + $0x48] sm:$0xff]  }
  0x20   : > { %311 = vst [vmem:[#allocation2 + $0x140] sm:$0xff] %v5537_v4  ;;  %312 = vst [vmem:[#allocation2 + $0x13] sm:$0xff] %v235_v22  ;;  %v247_v49 = vld [vmem:[%s5650_s28 + $0x60] sm:$0xff]  ;;  %v248_v50 = vld [vmem:[%s5650_s28 + $0x68] sm:$0xff] }
  0x21   : > { %1319 = vmatpush1.bf16.msra.mxu0 %v5353_v12  ;;  %313 = vst [vmem:[#allocation2 + $0x1b] sm:$0xff] %v236_v25  ;;  %314 = vst [vmem:[#allocation2 + $0x23] sm:$0xff] %v237_v27  ;;  %v249_v51 = vld [vmem:[%s5650_s28 + $0x70] sm:$0xff]  ;;  %v250_v52 = vld [vmem:[%s5650_s28 + $0x78] sm:$0xff] }
  0x22   : > { %1496 = vmatpush1.bf16.msra.mxu1 %v5354_v13  ;;  %1320 = vmatprep.subr.bf16.mxu0 %v8042_v1  ;;  %315 = vst [vmem:[#allocation2 + $0x2b] sm:$0xff] %v238_v28  ;;  %316 = vst [vmem:[#allocation2 + $0x33] sm:$0xff] %v239_v29  ;;  %v5372_v53 = vld [vmem:[%s8039_s2 + $0xc8] sm:$0xff]   ;;  %v251_v54 = vld [vmem:[%s5650_s28 + $0x80] sm:$0xff] }
  0x23   : > { %1497 = vmatprep.subr.bf16.mxu1 %v8042_v1  ;;  %317 = vst [vmem:[#allocation2 + $0x3b] sm:$0xff] %v240_v30  ;;  %318 = vst [vmem:[#allocation2 + $0x43] sm:$0xff] %v241_v32  ;;  %v252_v55 = vld [vmem:[%s5650_s28 + $0x88] sm:$0xff]  ;;  %v5373_v56 = vld [vmem:[%s8039_s2 + $0x40] sm:$0xff]  }
  0x24   : > { %319 = vst [vmem:[#allocation2 + $0x4b] sm:$0xff] %v242_v33  ;;  %320 = vst [vmem:[#allocation2 + $0x53] sm:$0xff] %v243_v39  ;;  %v5374_v57 = vld [vmem:[%s8039_s2 + $0xc0] sm:$0xff]   ;;  %v601_v59 = vld [vmem:[#allocation2 + $0xa] sm:$0xff] }
  0x25   : > { %1321 = vmatpush1.bf16.msra.mxu0 %v5355_v14  ;;  %321 = vst [vmem:[#allocation2 + $0x5b] sm:$0xff] %v244_v40  ;;  %322 = vst [vmem:[#allocation2 + $0x63] sm:$0xff] %v245_v44  ;;  %v600_v58 = vld [vmem:[#allocation2 + $0x2] sm:$0xff]  ;;  %v253_v60 = vld [vmem:[%s5650_s28 + $0x90] sm:$0xff] }
  0x26   : > { %1498 = vmatpush1.bf16.msra.mxu1 %v5356_v15  ;;  %1322 = vmatprep.subr.bf16.mxu0 %v8042_v1  ;;  %323 = vst [vmem:[#allocation2 + $0x6b] sm:$0xff] %v246_v47  ;;  %324 = vst [vmem:[#allocation2 + $0x73] sm:$0xff] %v247_v49  ;;  %v254_v61 = vld [vmem:[%s5650_s28 + $0x98] sm:$0xff]  ;;  %v636_v3 = vpack.c.bf16 %v601_v59, %v600_v58  ;;  %v5376_v8 = vld [vmem:[%s8039_s2 + $0x130] sm:$0xff]  }
  0x27   : > { %1499 = vmatprep.subr.bf16.mxu1 %v8042_v1  ;;  %v602_v35 = vld [vmem:[#allocation2 + $0x12] sm:$0xff]  ;;  %325 = vst [vmem:[#allocation2 + $0x7b] sm:$0xff] %v248_v50  ;;  %326 = vst [vmem:[#allocation2 + $0x83] sm:$0xff] %v249_v51  ;;  %v5377_v21 = vld [vmem:[%s8039_s2 + $0x128] sm:$0xff]  }
  0x28   : > { %v603_v37 = vld [vmem:[#allocation2 + $0x1a] sm:$0xff]  ;;  %327 = vst [vmem:[#allocation2 + $0x8b] sm:$0xff] %v250_v52  ;;  %328 = vst [vmem:[#allocation2 + $0x93] sm:$0xff] %v251_v54  ;;  %v548_v62 = vld [vmem:[#allocation2 + $0x11] sm:$0xff] }
  0x29   : > { %1323 = vmatpush1.bf16.msra.mxu0 %v5357_v16  ;;  %v5687_v38 = vpack.c.bf16 %v603_v37, %v602_v35  ;;  %329 = vst [vmem:[#allocation2 + $0x9b] sm:$0xff] %v252_v55  ;;  %v549_v63 = vld [vmem:[#allocation2 + $0x19] sm:$0xff]  ;;  %v604_v0 = vld [vmem:[#allocation2 + $0x22] sm:$0xff]  ;;  %330 = vst [vmem:[#allocation2 + $0xa3] sm:$0xff] %v253_v60 }
  0x2a   : > { %1500 = vmatpush1.bf16.msra.mxu1 %v5358_v17  ;;  %1324 = vmatprep.subr.bf16.mxu0 %v8042_v1  ;;  %331 = vst [vmem:[#allocation2 + $0xab] sm:$0xff] %v254_v61  ;;  %v605_v2 = vld [vmem:[#allocation2 + $0x2a] sm:$0xff]  ;;  %v5375_v4 = vld [vmem:[%s8039_s2 + $0x138] sm:$0xff]   ;;  %v583_v5 = vpack.c.bf16 %v549_v63, %v548_v62  ;;  %v550_v11 = vld [vmem:[#allocation2 + $0x21] sm:$0xff] }
  0x2b   : > { %1501 = vmatprep.subr.bf16.mxu1 %v8042_v1  ;;  %1517 = vmatprep.mubr.bf16.mxu1 %v5687_v38  ;;  %v5743_v6 = vpack.c.bf16 %v605_v2, %v604_v0  ;;  %v494_v9 = vld [vmem:[#allocation2 + $0x10] sm:$0xff]  ;;  %v495_v10 = vld [vmem:[#allocation2 + $0x18] sm:$0xff]  ;;  %v255_v17 = vld [vmem:[%s5650_s28 + $0xa0] sm:$0xff] }
  0x2c   : > { %v551_v12 = vld [vmem:[#allocation2 + $0x29] sm:$0xff]  ;;  %v606_v13 = vld [vmem:[#allocation2 + $0x32] sm:$0xff]  ;;  %v607_v14 = vld [vmem:[#allocation2 + $0x3a] sm:$0xff]  ;;  %v529_v16 = vpack.c.bf16 %v495_v10, %v494_v9  ;;  %332 = vst [vmem:[#allocation2 + $0xb3] sm:$0xff] %v255_v17 }
  0x2d   : > { %1325 = vmatpush2.bf16.msra.mxu0 %v5359_v18  ;;  %v5384_v15 = vld [vmem:[%s8039_s2 + $0x1b8] sm:$0xff]   ;;  %v256_v18 = vld [vmem:[%s5650_s28 + $0xa8] sm:$0xff]  ;;  %v5756_v20 = vpack.c.bf16 %v607_v14, %v606_v13  ;;  %v496_v22 = vld [vmem:[#allocation2 + $0x20] sm:$0xff] }
  0x2e   : > { %1502 = vmatpush2.bf16.msra.mxu1 %v5360_v19  ;;  %1326 = vmatprep.subr.bf16.mxu0 %v8042_v1  ;;  %v584_v19 = vpack.c.bf16 %v551_v12, %v550_v11  ;;  %333 = vst [vmem:[#allocation2 + $0xbb] sm:$0xff] %v256_v18  ;;  %v5386_v24 = vld [vmem:[%s8039_s2 + $0x1b0] sm:$0xff]   ;;  %v553_v27 = vld [vmem:[#allocation2 + $0x39] sm:$0xff]  ;;  %v608_v30 = vld [vmem:[#allocation2 + $0x42] sm:$0xff] }
  0x2f   : > { %1503 = vmatprep.subr.bf16.mxu1 %v8042_v1  ;;  %v257_v25 = vld [vmem:[%s5650_s28 + $0xb0] sm:$0xff]  ;;  %v5378_v28 = vld [vmem:[%s8039_s2 + $0x120] sm:$0xff]   ;;  %v258_v29 = vld [vmem:[%s5650_s28 + $0xb8] sm:$0xff] }
  0x30   : > { %334 = vst [vmem:[#allocation2 + $0xc3] sm:$0xff] %v257_v25  ;;  %335 = vst [vmem:[#allocation2 + $0xcb] sm:$0xff] %v258_v29  ;;  %v259_v32 = vld [vmem:[%s5650_s28 + $0xc0] sm:$0xff]  ;;  %v260_v33 = vld [vmem:[%s5650_s28 + $0xc8] sm:$0xff] }
  0x31   : > { %1327 = vmatpush2.bf16.msra.mxu0 %v5361_v23  ;;  %v497_v23 = vld [vmem:[#allocation2 + $0x28] sm:$0xff]  ;;  %336 = vst [vmem:[#allocation2 + $0xd3] sm:$0xff] %v259_v32  ;;  %337 = vst [vmem:[#allocation2 + $0xdb] sm:$0xff] %v260_v33  ;;  %v5389_v39 = vld [vmem:[%s8039_s2 + $0x1a0] sm:$0xff]  }
  0x32   : > { %1504 = vmatpush2.bf16.msra.mxu1 %v5362_v26  ;;  %1328 = vmatprep.subr.bf16.mxu0 %v8042_v1  ;;  %v552_v26 = vld [vmem:[#allocation2 + $0x31] sm:$0xff]  ;;  %v530_v35 = vpack.c.bf16 %v497_v23, %v496_v22  ;;  %v500_v54 = vld [vmem:[#allocation2 + $0x40] sm:$0xff]  ;;  %v501_v55 = vld [vmem:[#allocation2 + $0x48] sm:$0xff] }
  0x33   : > { %1505 = vmatprep.subr.bf16.mxu1 %v8042_v1  ;;  %v498_v40 = vld [vmem:[#allocation2 + $0x30] sm:$0xff]  ;;  %v5390_v47 = vld [vmem:[%s8039_s2 + $0x198] sm:$0xff]   ;;  %v264_v59 = vld [vmem:[%s5650_s28 + $0xe8] sm:$0xff]  ;;  %v532_v2 = vpack.c.bf16 %v501_v55, %v500_v54 }
  0x34   : > { %v610_v44 = vld [vmem:[#allocation2 + $0x52] sm:$0xff]  ;;  %341 = vst [vmem:[#allocation2 + $0xfb] sm:$0xff] %v264_v59  ;;  %v5382_v61 = vld [vmem:[%s8039_s2 + $0x100] sm:$0xff]   ;;  %v613_v63 = vld [vmem:[#allocation2 + $0x6a] sm:$0xff] }
  0x35   : > { %1329 = vmatpush2.bf16.msra.mxu0 %v5363_v31  ;;  %v609_v31 = vld [vmem:[#allocation2 + $0x4a] sm:$0xff]  ;;  %v262_v49 = vld [vmem:[%s5650_s28 + $0xd8] sm:$0xff]  ;;  %v612_v62 = vld [vmem:[#allocation2 + $0x62] sm:$0xff] }
  0x36   : > { %1506 = vmatpush2.bf16.msra.mxu1 %v5364_v34  ;;  %1330 = vmatprep.subr.bf16.mxu0 %v8042_v1  ;;  %v5388_v34 = vld [vmem:[%s8039_s2 + $0x1a8] sm:$0xff]   ;;  %v5780_v37 = vpack.c.bf16 %v609_v31, %v608_v30  ;;  %339 = vst [vmem:[#allocation2 + $0xeb] sm:$0xff] %v262_v49  ;;  %v556_v58 = vld [vmem:[#allocation2 + $0x51] sm:$0xff]  ;;  %v557_v60 = vld [vmem:[#allocation2 + $0x59] sm:$0xff] }
  0x37   : > { %1507 = vmatprep.subr.bf16.mxu1 %v8042_v1  ;;  %v5393_v0 = vld [vmem:[%s8039_s2 + $0x188] sm:$0xff]   ;;  %v5395_v9 = vld [vmem:[%s8039_s2 + $0x180] sm:$0xff]   ;;  %v503_v10 = vld [vmem:[#allocation2 + $0x58] sm:$0xff] }
  0x38   : > { %v558_v11 = vld [vmem:[#allocation2 + $0x61] sm:$0xff]  ;;  %v559_v12 = vld [vmem:[#allocation2 + $0x69] sm:$0xff]  ;;  %v614_v13 = vld [vmem:[#allocation2 + $0x72] sm:$0xff] }
  0x39   : > { %1331 = vmatpush2.bf16.msra.mxu0 %v5365_v36  ;;  %v585_v36 = vpack.c.bf16 %v553_v27, %v552_v26  ;;  %v615_v14 = vld [vmem:[#allocation2 + $0x7a] sm:$0xff]  ;;  %v268_v17 = vld [vmem:[%s5650_s28 + $0x108] sm:$0xff]  ;;  %v269_v25 = vld [vmem:[%s5650_s28 + $0x110] sm:$0xff] }
  0x3a   : > { %1508 = vmatpush2.bf16.msra.mxu1 %v5366_v41  ;;  %1332 = vmatprep.subr.bf16.mxu0 %v8042_v1  ;;  %v499_v41 = vld [vmem:[#allocation2 + $0x38] sm:$0xff]  ;;  %345 = vst [vmem:[#allocation2 + $0x11b] sm:$0xff] %v268_v17  ;;  %v5387_v22 = vld [vmem:[%s8039_s2 + $0x168] sm:$0xff]   ;;  %v504_v23 = vld [vmem:[#allocation2 + $0x60] sm:$0xff] }
  0x3b   : > { %1509 = vmatprep.subr.bf16.mxu1 %v8042_v1  ;;  %v531_v50 = vpack.c.bf16 %v499_v41, %v498_v40  ;;  %v5396_v18 = vld [vmem:[%s8039_s2 + $0x1f8] sm:$0xff]   ;;  %346 = vst [vmem:[#allocation2 + $0x123] sm:$0xff] %v269_v25  ;;  %v505_v27 = vld [vmem:[#allocation2 + $0x68] sm:$0xff]  ;;  %v5391_v30 = vld [vmem:[%s8039_s2 + $0x160] sm:$0xff]  }
  0x3c   : > { %v270_v26 = vld [vmem:[%s5650_s28 + $0x118] sm:$0xff]  ;;  %v616_v31 = vld [vmem:[#allocation2 + $0x82] sm:$0xff]  ;;  %v617_v32 = vld [vmem:[#allocation2 + $0x8a] sm:$0xff] }
  0x3d   : > { %1333 = vmatpush2.bf16.msra.mxu0 %v5367_v42  ;;  %v554_v42 = vld [vmem:[#allocation2 + $0x41] sm:$0xff]  ;;  %347 = vst [vmem:[#allocation2 + $0x12b] sm:$0xff] %v270_v26  ;;  %v561_v29 = vld [vmem:[#allocation2 + $0x79] sm:$0xff]  ;;  %v564_v54 = vld [vmem:[#allocation2 + $0x91] sm:$0xff] }
  0x3e   : > { %1510 = vmatpush2.bf16.msra.mxu1 %v5368_v43  ;;  %1334 = vmatprep.subr.bf16.mxu0 %v8042_v1  ;;  %v555_v43 = vld [vmem:[#allocation2 + $0x49] sm:$0xff]  ;;  %v507_v40 = vld [vmem:[#allocation2 + $0x78] sm:$0xff]  ;;  %v562_v41 = vld [vmem:[#allocation2 + $0x81] sm:$0xff] }
  0x3f   : > { %1511 = vmatprep.subr.bf16.mxu1 %v8042_v1  ;;  %v586_v51 = vpack.c.bf16 %v555_v43, %v554_v42  ;;  %v5399_v33 = vld [vmem:[%s8039_s2 + $0x1e8] sm:$0xff]   ;;  %v5397_v43 = vld [vmem:[%s8039_s2 + $0x150] sm:$0xff]   ;;  %v565_v55 = vld [vmem:[#allocation2 + $0x99] sm:$0xff] }
  0x40   : > { %v563_v42 = vld [vmem:[#allocation2 + $0x89] sm:$0xff]  ;;  %v627_v25 = vld [vmem:[#allocation2 + $0xda] sm:$0xff] }
  0x41   : > { %1335 = vmatpush2.bf16.msra.mxu0 %v5369_v45  ;;  %v611_v45 = vld [vmem:[#allocation2 + $0x5a] sm:$0xff]  ;;  %v5405_v59 = vld [vmem:[%s8039_s2 + $0x1c8] sm:$0xff]  }
  0x42   : > { %1512 = vmatpush2.bf16.msra.mxu1 %v5370_v46  ;;  %1336 = vmatprep.subr.bf16.mxu0 %v8042_v1  ;;  %v5380_v46 = vld [vmem:[%s8039_s2 + $0x110] sm:$0xff]   ;;  %v5802_v52 = vpack.c.bf16 %v611_v45, %v610_v44  ;;  %v619_v45 = vld [vmem:[#allocation2 + $0x9a] sm:$0xff] }
  0x43   : > { %1513 = vmatprep.subr.bf16.mxu1 %v8042_v1  ;;  %v618_v44 = vld [vmem:[#allocation2 + $0x92] sm:$0xff] }
  0x44   : > { %v645_v49 = vpack.c.bf16 %v619_v45, %v618_v44 }
  0x45   : > { %1337 = vmatpush2.bf16.msra.mxu0 %v5371_v48  ;;  %v261_v48 = vld [vmem:[%s5650_s28 + $0xd0] sm:$0xff] }
  0x46   : > { %1514 = vmatpush2.bf16.msra.mxu1 %v5372_v53  ;;  %1338 = vmatprep.subr.bf16.mxu0 %v8042_v1  ;;  %338 = vst [vmem:[#allocation2 + $0xe3] sm:$0xff] %v261_v48  ;;  %v5381_v53 = vld [vmem:[%s8039_s2 + $0x108] sm:$0xff]   ;;  %v590_v48 = vpack.c.bf16 %v563_v42, %v562_v41 }
  0x47   : > { %1515 = vmatprep.subr.bf16.mxu1 %v8042_v1 }
  0x49   : > { %1339 = vmatpush2.bf16.msra.mxu0 %v5373_v56  ;;  %v5392_v56 = vld [vmem:[%s8039_s2 + $0x190] sm:$0xff]  }
  0x4a   : > { %1516 = vmatpush2.bf16.msra.mxu1 %v5374_v57  ;;  %1662 = vmatprep.subr.bf16.mxu0 %v8042_v1  ;;  %v263_v57 = vld [vmem:[%s5650_s28 + $0xe0] sm:$0xff] }
  0x4b   : > { %1839 = vmatprep.subr.bf16.mxu1 %v8042_v1  ;;  %340 = vst [vmem:[#allocation2 + $0xf3] sm:$0xff] %v263_v57  ;;  %v621_v57 = vld [vmem:[#allocation2 + $0xaa] sm:$0xff] }
  0x4c   : > { %1341 = vmatmul.mubr.bf16.vlgmr.msra.gmra.mxu0 %v5538_v7  ;;  %v5383_v7 = vld [vmem:[%s8039_s2 + $0x178] sm:$0xff]  }
  0x4d   : > { %1518 = vmatmul.mubr.bf16.vlgmr.msra.gmra.mxu1 %v636_v3  ;;  %1663 = vmatpush1.bf16.msra.mxu0 %v5375_v4  ;;  %v587_v3 = vpack.c.bf16 %v557_v60, %v556_v58  ;;  %v265_v4 = vld [vmem:[%s5650_s28 + $0xf0] sm:$0xff]  ;;  %v5404_v58 = vld [vmem:[%s8039_s2 + $0x140] sm:$0xff]   ;;  %v5905_v60 = vld [vmem:[%s8039_s2 + $0x238] sm:$0xff]  }
  0x4e   : > { %1348 = vmatprep.mubr.bf16.mxu0 %v583_v5  ;;  %1525 = vmatprep.mubr.bf16.mxu1 %v5743_v6  ;;  %v266_v5 = vld [vmem:[%s5650_s28 + $0xf8] sm:$0xff]  ;;  %342 = vst [vmem:[#allocation2 + $0x103] sm:$0xff] %v265_v4  ;;  %v566_v4 = vld [vmem:[#allocation2 + $0xa1] sm:$0xff]  ;;  %v575_v41 = vld [vmem:[#allocation2 + $0xe9] sm:$0xff] }
  0x4f   : > { %1664 = vmatprep.subr.bf16.mxu0 %v8042_v1  ;;  %1840 = vmatpush1.bf16.msra.mxu1 %v5384_v15  ;;  %343 = vst [vmem:[#allocation2 + $0x10b] sm:$0xff] %v266_v5  ;;  %v5385_v15 = vld [vmem:[%s8039_s2 + $0x170] sm:$0xff]  }
  0x50   : > { %1841 = vmatprep.subr.bf16.mxu1 %v8042_v1  ;;  %v567_v5 = vld [vmem:[#allocation2 + $0xa9] sm:$0xff] }
  0x51   : > { %1665 = vmatpush1.bf16.msra.mxu0 %v5376_v8  ;;  %v502_v8 = vld [vmem:[#allocation2 + $0x50] sm:$0xff] }
  0x52   : > { %1666 = vmatprep.subr.bf16.mxu0 %v8042_v1  ;;  %v630_v42 = vld [vmem:[#allocation2 + $0xf2] sm:$0xff] }
  0x53   : > { %1842 = vmatpush1.bf16.msra.mxu1 %v5386_v24  ;;  %v5398_v24 = vld [vmem:[%s8039_s2 + $0x1f0] sm:$0xff]  }
  0x54   : > { %1349 = vmatmul.mubr.bf16.gmra.mxu0 %v529_v16  ;;  %1843 = vmatprep.subr.bf16.mxu1 %v8042_v1  ;;  %v267_v16 = vld [vmem:[%s5650_s28 + $0x100] sm:$0xff] }
  0x55   : > { %1526 = vmatmul.mubr.bf16.gmra.mxu1 %v5687_v38  ;;  %1356 = vmatprep.mubr.bf16.mxu0 %v584_v19  ;;  %v5379_v38 = vld [vmem:[%s8039_s2 + $0x118] sm:$0xff]   ;;  %344 = vst [vmem:[#allocation2 + $0x113] sm:$0xff] %v267_v16  ;;  %v533_v19 = vpack.c.bf16 %v503_v10, %v502_v8  ;;  %v625_v16 = vld [vmem:[#allocation2 + $0xca] sm:$0xff] }
  0x56   : > { %1533 = vmatprep.mubr.bf16.mxu1 %v5756_v20  ;;  %1667 = vmatpush1.bf16.msra.mxu0 %v5377_v21  ;;  %v5848_v21 = vpack.c.bf16 %v615_v14, %v614_v13  ;;  %v568_v13 = vld [vmem:[#allocation2 + $0xb1] sm:$0xff]  ;;  %v569_v14 = vld [vmem:[#allocation2 + $0xb9] sm:$0xff] }
  0x57   : > { %1668 = vmatprep.subr.bf16.mxu0 %v8042_v1  ;;  %1844 = vmatpush1.bf16.msra.mxu1 %v5388_v34  ;;  %v534_v34 = vpack.c.bf16 %v505_v27, %v504_v23  ;;  %v571_v23 = vld [vmem:[#allocation2 + $0xc9] sm:$0xff] }
  0x58   : > { %1845 = vmatprep.subr.bf16.mxu1 %v8042_v1 }
  0x5a   : > { %1669 = vmatpush1.bf16.msra.mxu0 %v5378_v28  ;;  %v560_v28 = vld [vmem:[#allocation2 + $0x71] sm:$0xff] }
  0x5b   : > { %1670 = vmatprep.subr.bf16.mxu0 %v8042_v1  ;;  %1846 = vmatpush1.bf16.msra.mxu1 %v5389_v39  ;;  %v506_v39 = vld [vmem:[#allocation2 + $0x70] sm:$0xff] }
  0x5c   : > { %1357 = vmatmul.mubr.bf16.gmra.mxu0 %v530_v35  ;;  %1847 = vmatprep.subr.bf16.mxu1 %v8042_v1  ;;  %v589_v35 = vpack.c.bf16 %v561_v29, %v560_v28  ;;  %v516_v29 = vld [vmem:[#allocation2 + $0xc0] sm:$0xff] }
  0x5d   : > { %1534 = vmatmul.mubr.bf16.gmra.mxu1 %v5743_v6  ;;  %1364 = vmatprep.mubr.bf16.mxu0 %v585_v36  ;;  %v5826_v6 = vpack.c.bf16 %v613_v63, %v612_v62  ;;  %v644_v36 = vpack.c.bf16 %v617_v32, %v616_v31  ;;  %v591_v62 = vpack.c.bf16 %v565_v55, %v564_v54  ;;  %v572_v31 = vld [vmem:[#allocation2 + $0xd1] sm:$0xff]  ;;  %v573_v32 = vld [vmem:[#allocation2 + $0xd9] sm:$0xff] }
  0x5e   : > { %1541 = vmatprep.mubr.bf16.mxu1 %v5780_v37  ;;  %1671 = vmatpush1.bf16.msra.mxu0 %v5379_v38  ;;  %v5401_v38 = vld [vmem:[%s8039_s2 + $0x1e0] sm:$0xff]  }
  0x5f   : > { %1672 = vmatprep.subr.bf16.mxu0 %v8042_v1  ;;  %1848 = vmatpush1.bf16.msra.mxu1 %v5390_v47  ;;  %v535_v47 = vpack.c.bf16 %v507_v40, %v506_v39  ;;  %v519_v39 = vld [vmem:[#allocation2 + $0xd8] sm:$0xff]  ;;  %v574_v40 = vld [vmem:[#allocation2 + $0xe1] sm:$0xff] }
  0x60   : > { %1849 = vmatprep.subr.bf16.mxu1 %v8042_v1  ;;  %v596_v45 = vpack.c.bf16 %v575_v41, %v574_v40  ;;  %v5410_v40 = vld [vmem:[%s8039_s2 + $0x220] sm:$0xff]  }
  0x61   : > { %v717_v41 = vld [vmem:[#allocation2 + $0x44] sm:$0xff] }
  0x62   : > { %1673 = vmatpush1.bf16.msra.mxu0 %v5380_v46  ;;  %v5402_v46 = vld [vmem:[%s8039_s2 + $0x1d8] sm:$0xff]  }
  0x63   : > { %1674 = vmatprep.subr.bf16.mxu0 %v8042_v1  ;;  %1850 = vmatpush1.bf16.msra.mxu1 %v5392_v56  ;;  %v620_v56 = vld [vmem:[#allocation2 + $0xa2] sm:$0xff] }
  0x64   : > { %1365 = vmatmul.mubr.bf16.gmra.mxu0 %v531_v50  ;;  %1851 = vmatprep.subr.bf16.mxu1 %v8042_v1  ;;  %v5400_v50 = vld [vmem:[%s8039_s2 + $0x148] sm:$0xff]   ;;  %v646_v63 = vpack.c.bf16 %v621_v57, %v620_v56  ;;  %v522_v56 = vld [vmem:[#allocation2 + $0xf0] sm:$0xff]  ;;  %v523_v57 = vld [vmem:[#allocation2 + $0xf8] sm:$0xff] }
  0x65   : > { %1542 = vmatmul.mubr.bf16.gmra.mxu1 %v5756_v20  ;;  %1372 = vmatprep.mubr.bf16.mxu0 %v586_v51  ;;  %v588_v20 = vpack.c.bf16 %v559_v12, %v558_v11  ;;  %v508_v51 = vld [vmem:[#allocation2 + $0x80] sm:$0xff]  ;;  %v513_v12 = vld [vmem:[#allocation2 + $0xa8] sm:$0xff] }
  0x66   : > { %1549 = vmatprep.mubr.bf16.mxu1 %v5802_v52  ;;  %1675 = vmatpush1.bf16.msra.mxu0 %v5381_v53  ;;  %v5403_v53 = vld [vmem:[%s8039_s2 + $0x1d0] sm:$0xff]   ;;  %v512_v11 = vld [vmem:[#allocation2 + $0xa0] sm:$0xff] }
  0x67   : > { %1676 = vmatprep.subr.bf16.mxu0 %v8042_v1  ;;  %1852 = vmatpush1.bf16.msra.mxu1 %v5393_v0  ;;  %v510_v0 = vld [vmem:[#allocation2 + $0x90] sm:$0xff]  ;;  %v538_v17 = vpack.c.bf16 %v513_v12, %v512_v11 }
  0x68   : > { %1853 = vmatprep.subr.bf16.mxu1 %v8042_v1  ;;  %v526_v12 = vld [vmem:[#allocation2 + $0x110] sm:$0xff] }
  0x6a   : > { %1677 = vmatpush1.bf16.msra.mxu0 %v5382_v61 }
  0x6b   : > { %1678 = vmatprep.subr.bf16.mxu0 %v8042_v1  ;;  %1854 = vmatpush1.bf16.msra.mxu1 %v5395_v9  ;;  %v592_v9 = vpack.c.bf16 %v567_v5, %v566_v4  ;;  %v525_v4 = vld [vmem:[#allocation2 + $0x108] sm:$0xff]  ;;  %v580_v5 = vld [vmem:[#allocation2 + $0x111] sm:$0xff] }
  0x6c   : > { %1373 = vmatmul.mubr.bf16.gmra.mxu0 %v532_v2  ;;  %1855 = vmatprep.subr.bf16.mxu1 %v8042_v1  ;;  %v511_v2 = vld [vmem:[#allocation2 + $0x98] sm:$0xff] }
  0x6d   : > { %1550 = vmatmul.mubr.bf16.gmra.mxu1 %v5780_v37  ;;  %1380 = vmatprep.mubr.bf16.mxu0 %v587_v3  ;;  %v5394_v37 = vld [vmem:[%s8039_s2 + $0x158] sm:$0xff]   ;;  %v5406_v3 = vld [vmem:[%s8039_s2 + $0x1c0] sm:$0xff]   ;;  %v537_v8 = vpack.c.bf16 %v511_v2, %v510_v0 }
  0x6e   : > { %1557 = vmatprep.mubr.bf16.mxu1 %v5826_v6  ;;  %1679 = vmatpush2.bf16.msra.mxu0 %v5383_v7  ;;  %v623_v7 = vld [vmem:[#allocation2 + $0xba] sm:$0xff] }
  0x6f   : > { %1680 = vmatprep.subr.bf16.mxu0 %v8042_v1  ;;  %1856 = vmatpush2.bf16.msra.mxu1 %v5396_v18  ;;  %v593_v18 = vpack.c.bf16 %v569_v14, %v568_v13  ;;  %v527_v13 = vld [vmem:[#allocation2 + $0x118] sm:$0xff] }
  0x70   : > { %1857 = vmatprep.subr.bf16.mxu1 %v8042_v1  ;;  %v711_v14 = vld [vmem:[#allocation2 + $0x14] sm:$0xff] }
  0x72   : > { %1681 = vmatpush2.bf16.msra.mxu0 %v5385_v15  ;;  %v624_v15 = vld [vmem:[#allocation2 + $0xc2] sm:$0xff] }
  0x73   : > { %1682 = vmatprep.subr.bf16.mxu0 %v8042_v1  ;;  %1858 = vmatpush2.bf16.msra.mxu1 %v5398_v24  ;;  %v626_v24 = vld [vmem:[#allocation2 + $0xd2] sm:$0xff] }
  0x74   : > { %1381 = vmatmul.mubr.bf16.gmra.mxu0 %v533_v19  ;;  %1859 = vmatprep.subr.bf16.mxu1 %v8042_v1  ;;  %v648_v19 = vpack.c.bf16 %v625_v16, %v624_v15  ;;  %v649_v28 = vpack.c.bf16 %v627_v25, %v626_v24  ;;  %v712_v15 = vld [vmem:[#allocation2 + $0x1c] sm:$0xff]  ;;  %v768_v16 = vld [vmem:[#allocation2 + $0x25] sm:$0xff]  ;;  %v5915_v25 = vld [vmem:[#allocation2 + $0x13] sm:$0xff] }
  0x75   : > { %1558 = vmatmul.mubr.bf16.gmra.mxu1 %v5802_v52  ;;  %1388 = vmatprep.mubr.bf16.mxu0 %v588_v20  ;;  %v509_v52 = vld [vmem:[#allocation2 + $0x88] sm:$0xff]  ;;  %v514_v20 = vld [vmem:[#allocation2 + $0xb0] sm:$0xff]  ;;  %v771_v24 = vld [vmem:[#allocation2 + $0x3d] sm:$0xff]  ;;  %8174 = vst [vmem:[#allocation3_spill] sm:$0xff] %v5915_v25 }
  0x76   : > { %1565 = vmatprep.mubr.bf16.mxu1 %v5848_v21  ;;  %1683 = vmatpush2.bf16.msra.mxu0 %v5387_v22  ;;  %v536_v61 = vpack.c.bf16 %v509_v52, %v508_v51  ;;  %v570_v22 = vld [vmem:[#allocation2 + $0xc1] sm:$0xff]  ;;  %v633_v52 = vld [vmem:[#allocation2 + $0x10a] sm:$0xff] }
  0x77   : > { %1684 = vmatprep.subr.bf16.mxu0 %v8042_v1  ;;  %1860 = vmatpush2.bf16.msra.mxu1 %v5399_v33  ;;  %v594_v27 = vpack.c.bf16 %v571_v23, %v570_v22  ;;  %v628_v33 = vld [vmem:[#allocation2 + $0xe2] sm:$0xff]  ;;  %v714_v22 = vld [vmem:[#allocation2 + $0x2c] sm:$0xff]  ;;  %v770_v23 = vld [vmem:[#allocation2 + $0x35] sm:$0xff] }
  0x78   : > { %1861 = vmatprep.subr.bf16.mxu1 %v8042_v1  ;;  %v632_v51 = vld [vmem:[#allocation2 + $0x102] sm:$0xff] }
  0x79   : > { %v652_v55 = vpack.c.bf16 %v633_v52, %v632_v51  ;;  %v5412_v51 = vld [vmem:[%s8039_s2 + $0x210] sm:$0xff]  }
  0x7a   : > { %1685 = vmatpush2.bf16.msra.mxu0 %v5391_v30  ;;  %v517_v30 = vld [vmem:[#allocation2 + $0xc8] sm:$0xff]  ;;  %v719_v52 = vld [vmem:[#allocation2 + $0x54] sm:$0xff] }
  0x7b   : > { %1686 = vmatprep.subr.bf16.mxu0 %v8042_v1  ;;  %1862 = vmatpush2.bf16.msra.mxu1 %v5401_v38  ;;  %v518_v38 = vld [vmem:[#allocation2 + $0xd0] sm:$0xff] }
  0x7c   : > { %1389 = vmatmul.mubr.bf16.gmra.mxu0 %v534_v34  ;;  %1863 = vmatprep.subr.bf16.mxu1 %v8042_v1  ;;  %v629_v34 = vld [vmem:[#allocation2 + $0xea] sm:$0xff]  ;;  %v541_v44 = vpack.c.bf16 %v519_v39, %v518_v38 }
  0x7d   : > { %1566 = vmatmul.mubr.bf16.gmra.mxu1 %v5826_v6  ;;  %1396 = vmatprep.mubr.bf16.mxu0 %v589_v35  ;;  %v622_v6 = vld [vmem:[#allocation2 + $0xb2] sm:$0xff]  ;;  %v540_v35 = vpack.c.bf16 %v517_v30, %v516_v29  ;;  %v805_v29 = vpack.c.bf16 %v771_v24, %v770_v23 }
  0x7e   : > { %1573 = vmatprep.mubr.bf16.mxu1 %v644_v36  ;;  %1687 = vmatpush2.bf16.msra.mxu0 %v5394_v37  ;;  %v647_v10 = vpack.c.bf16 %v623_v7, %v622_v6  ;;  %v650_v37 = vpack.c.bf16 %v629_v34, %v628_v33  ;;  %v581_v6 = vld [vmem:[#allocation2 + $0x119] sm:$0xff]  ;;  %v654_v7 = vld [vmem:[#allocation2 + $0x122] sm:$0xff]  ;;  %v5408_v30 = vld [vmem:[%s8039_s2 + $0x230] sm:$0xff]  }
  0x7f   : > { %1688 = vmatprep.subr.bf16.mxu0 %v8042_v1  ;;  %1864 = vmatpush2.bf16.msra.mxu1 %v5402_v46  ;;  %v5409_v33 = vld [vmem:[%s8039_s2 + $0x228] sm:$0xff]  }
  0x80   : > { %1865 = vmatprep.subr.bf16.mxu1 %v8042_v1  ;;  %v772_v34 = vld [vmem:[#allocation2 + $0x45] sm:$0xff] }
  0x82   : > { %1689 = vmatpush2.bf16.msra.mxu0 %v5397_v43  ;;  %v631_v43 = vld [vmem:[#allocation2 + $0xfa] sm:$0xff] }
  0x83   : > { %1690 = vmatprep.subr.bf16.mxu0 %v8042_v1  ;;  %1866 = vmatpush2.bf16.msra.mxu1 %v5403_v53  ;;  %v651_v46 = vpack.c.bf16 %v631_v43, %v630_v42  ;;  %v718_v42 = vld [vmem:[#allocation2 + $0x4c] sm:$0xff]  ;;  %v774_v43 = vld [vmem:[#allocation2 + $0x55] sm:$0xff] }
  0x84   : > { %1397 = vmatmul.mubr.bf16.gmra.mxu0 %v535_v47  ;;  %1867 = vmatprep.subr.bf16.mxu1 %v8042_v1  ;;  %v520_v47 = vld [vmem:[#allocation2 + $0xe0] sm:$0xff] }
  0x85   : > { %1574 = vmatmul.mubr.bf16.gmra.mxu1 %v5848_v21  ;;  %1404 = vmatprep.mubr.bf16.mxu0 %v590_v48  ;;  %v515_v21 = vld [vmem:[#allocation2 + $0xb8] sm:$0xff]  ;;  %v521_v48 = vld [vmem:[#allocation2 + $0xe8] sm:$0xff] }
  0x86   : > { %1581 = vmatprep.mubr.bf16.mxu1 %v645_v49  ;;  %1691 = vmatpush2.bf16.msra.mxu0 %v5400_v50  ;;  %v539_v26 = vpack.c.bf16 %v515_v21, %v514_v20  ;;  %v577_v50 = vld [vmem:[#allocation2 + $0xf9] sm:$0xff]  ;;  %v542_v53 = vpack.c.bf16 %v521_v48, %v520_v47  ;;  %v713_v21 = vld [vmem:[#allocation2 + $0x24] sm:$0xff] }
  0x87   : > { %1692 = vmatprep.subr.bf16.mxu0 %v8042_v1  ;;  %1868 = vmatpush2.bf16.msra.mxu1 %v5405_v59  ;;  %v579_v59 = vld [vmem:[#allocation2 + $0x109] sm:$0xff]  ;;  %v5942_v47 = vld [vmem:[#allocation2 + $0x3b] sm:$0xff] }
  0x88   : > { %1869 = vmatprep.subr.bf16.mxu1 %v8042_v1  ;;  %8179 = vst [vmem:[#allocation8_spill] sm:$0xff] %v5942_v47 }
  0x8a   : > { %1693 = vmatpush2.bf16.msra.mxu0 %v5404_v58  ;;  %v578_v58 = vld [vmem:[#allocation2 + $0x101] sm:$0xff] }
  0x8b   : > { %5226 = vmatprep.subr.bf16.mxu0 %v5905_v60  ;;  %1870 = vmatpush2.bf16.msra.mxu1 %v5406_v3  ;;  %v598_v0 = vpack.c.bf16 %v579_v59, %v578_v58  ;;  %v524_v3 = vld [vmem:[#allocation2 + $0x100] sm:$0xff]  ;;  %v5954_v58 = vld [vmem:[#allocation2 + $0x4b] sm:$0xff] }
  0x8c   : > { %1405 = vmatmul.mubr.bf16.gmra.mxu0 %v536_v61  ;;  %3707 = vmatprep.subr.bf16.mxu1 %v8042_v1  ;;  %v634_v61 = vld [vmem:[#allocation2 + $0x112] sm:$0xff]  ;;  %8181 = vst [vmem:[#allocation10_spill] sm:$0xff] %v5954_v58 }
  0x8d   : > { %1582 = vmatmul.mubr.bf16.gmra.mxu1 %v644_v36  ;;  %1412 = vmatprep.mubr.bf16.mxu0 %v591_v62  ;;  %v595_v36 = vpack.c.bf16 %v573_v32, %v572_v31  ;;  %v635_v62 = vld [vmem:[#allocation2 + $0x11a] sm:$0xff] }
  0x8e   : > { %1589 = vmatprep.mubr.bf16.mxu1 %v646_v63  ;;  %v653_v2 = vpack.c.bf16 %v635_v62, %v634_v61  ;;  %v715_v31 = vld [vmem:[#allocation2 + $0x34] sm:$0xff]  ;;  %v716_v32 = vld [vmem:[#allocation2 + $0x3c] sm:$0xff] }
  0x8f   : > { %v199_v62 = vld [vmem:[%s8037_s0] sm:$0xff] }
  0x90   : > { %2195 = vperm.xlu0 %5341, %v199_v62   ;;  %v6029_v62 = vld [vmem:[#allocation2 + $0x8b] sm:$0xff] }
  0x91   : > { %8189 = vst [vmem:[#allocation18_spill] sm:$0xff] %v6029_v62 }
  0x94   : > { %1413 = vmatmul.mubr.bf16.gmra.mxu0 %v537_v8  ;;  %v655_v8 = vld [vmem:[#allocation2 + $0x12a] sm:$0xff] }
  0x95   : > { %1590 = vmatmul.mubr.bf16.gmra.mxu1 %v645_v49  ;;  %1420 = vmatprep.mubr.bf16.mxu0 %v592_v9  ;;  %v576_v49 = vld [vmem:[#allocation2 + $0xf1] sm:$0xff]  ;;  %v544_v9 = vpack.c.bf16 %v525_v4, %v524_v3  ;;  %v656_v11 = vpack.c.bf16 %v655_v8, %v654_v7  ;;  %v200_v3 = vld [vmem:[%s8037_s0 + $0x8] sm:$0xff]  ;;  %v779_v7 = vld [vmem:[#allocation2 + $0x7d] sm:$0xff] }
  0x96   : > { %1597 = vmatprep.mubr.bf16.mxu1 %v647_v10  ;;  %v597_v54 = vpack.c.bf16 %v577_v50, %v576_v49  ;;  %v750_v49 = vpack.c.bf16 %v718_v42, %v717_v41  ;;  %v721_v4 = vld [vmem:[#allocation2 + $0x64] sm:$0xff]  ;;  %v5970_v8 = vld [vmem:[#allocation2 + $0x53] sm:$0xff]  ;;  %2200 = vperm.xlu0 %5341, %v200_v3  }
  0x97   : > { %8182 = vst [vmem:[#allocation11_spill] sm:$0xff] %v5970_v8  ;;  %v210_v41 = vld [vmem:[%s8037_s0 + $0x58] sm:$0xff]  ;;  %v211_v42 = vld [vmem:[%s8037_s0 + $0x60] sm:$0xff] }
  0x98   : > { %v214_v3 = vld [vmem:[%s8037_s0 + $0x78] sm:$0xff] }
  0x9c   : > { %1421 = vmatmul.mubr.bf16.gmra.mxu0 %v538_v17  ;;  %v769_v17 = vld [vmem:[#allocation2 + $0x2d] sm:$0xff] }
  0x9d   : > { %1598 = vmatmul.mubr.bf16.gmra.mxu1 %v646_v63  ;;  %1428 = vmatprep.mubr.bf16.mxu0 %v593_v18  ;;  %v543_v63 = vpack.c.bf16 %v523_v57, %v522_v56  ;;  %v545_v18 = vpack.c.bf16 %v527_v13, %v526_v12  ;;  %v804_v20 = vpack.c.bf16 %v769_v17, %v768_v16  ;;  %v5413_v56 = vld [vmem:[%s8039_s2 + $0x208] sm:$0xff]   ;;  %v202_v12 = vld [vmem:[%s8037_s0 + $0x18] sm:$0xff]  ;;  %v203_v13 = vld [vmem:[%s8037_s0 + $0x20] sm:$0xff] }
  0x9e   : > { %1605 = vmatprep.mubr.bf16.mxu1 %v648_v19  ;;  %v5952_v57 = vld [vmem:[#allocation2 + $0x43] sm:$0xff]  ;;  %2215 = vperm.xlu0 %5341, %v203_v13   ;;  %v205_v16 = vld [vmem:[%s8037_s0 + $0x30] sm:$0xff] }
  0x9f   : > { %8180 = vst [vmem:[#allocation9_spill] sm:$0xff] %v5952_v57  ;;  %v696_v59 = vpack.c.bf16 %v5954_v58, %v5952_v57  ;;  %v723_v17 = vld [vmem:[#allocation2 + $0x74] sm:$0xff]  ;;  %v216_v13 = vld [vmem:[%s8037_s0 + $0x88] sm:$0xff] }
  0xa2   : > { %2225 = vperm.xlu0 %5341, %v205_v16  }
  0xa4   : > { %1429 = vmatmul.mubr.bf16.gmra.mxu0 %v539_v26  ;;  %v5917_v26 = vld [vmem:[#allocation2 + $0x1b] sm:$0xff] }
  0xa5   : > { %1606 = vmatmul.mubr.bf16.gmra.mxu1 %v647_v10  ;;  %1436 = vmatprep.mubr.bf16.mxu0 %v594_v27  ;;  %v599_v10 = vpack.c.bf16 %v581_v6, %v580_v5  ;;  %8175 = vst [vmem:[#allocation4_spill] sm:$0xff] %v5917_v26  ;;  %v693_v27 = vpack.c.bf16 %v5917_v26, %v5915_v25  ;;  %v722_v5 = vld [vmem:[#allocation2 + $0x6c] sm:$0xff]  ;;  %v778_v6 = vld [vmem:[#allocation2 + $0x75] sm:$0xff] }
  0xa6   : > { %1613 = vmatprep.mubr.bf16.mxu1 %v649_v28 }
  0xac   : > { %1437 = vmatmul.mubr.bf16.gmra.mxu0 %v540_v35  ;;  %v773_v35 = vld [vmem:[#allocation2 + $0x4d] sm:$0xff] }
  0xad   : > { %1614 = vmatmul.mubr.bf16.gmra.mxu1 %v648_v19  ;;  %1444 = vmatprep.mubr.bf16.mxu0 %v595_v36  ;;  %v747_v19 = vpack.c.bf16 %v712_v15, %v711_v14  ;;  %v5928_v36 = vld [vmem:[#allocation2 + $0x23] sm:$0xff]  ;;  %v806_v39 = vpack.c.bf16 %v773_v35, %v772_v34  ;;  %v809_v14 = vpack.c.bf16 %v779_v7, %v778_v6  ;;  %v782_v34 = vld [vmem:[#allocation2 + $0x95] sm:$0xff] }
  0xae   : > { %1621 = vmatprep.mubr.bf16.mxu1 %v650_v37  ;;  %8176 = vst [vmem:[#allocation5_spill] sm:$0xff] %v5928_v36  ;;  %v204_v15 = vld [vmem:[%s8037_s0 + $0x28] sm:$0xff]  ;;  %v783_v35 = vld [vmem:[#allocation2 + $0x9d] sm:$0xff] }
  0xb4   : > { %1445 = vmatmul.mubr.bf16.gmra.mxu0 %v541_v44  ;;  %v775_v44 = vld [vmem:[#allocation2 + $0x5d] sm:$0xff] }
  0xb5   : > { %1622 = vmatmul.mubr.bf16.gmra.mxu1 %v649_v28  ;;  %1452 = vmatprep.mubr.bf16.mxu0 %v596_v45  ;;  %v748_v28 = vpack.c.bf16 %v714_v22, %v713_v21  ;;  %v5411_v45 = vld [vmem:[%s8039_s2 + $0x218] sm:$0xff]   ;;  %v807_v50 = vpack.c.bf16 %v775_v44, %v774_v43  ;;  %v5989_v21 = vld [vmem:[#allocation2 + $0x63] sm:$0xff]  ;;  %v5991_v22 = vld [vmem:[#allocation2 + $0x6b] sm:$0xff]  ;;  %v811_v43 = vpack.c.bf16 %v783_v35, %v782_v34 }
  0xb6   : > { %1629 = vmatprep.mubr.bf16.mxu1 %v651_v46  ;;  %8184 = vst [vmem:[#allocation13_spill] sm:$0xff] %v5989_v21  ;;  %8185 = vst [vmem:[#allocation14_spill] sm:$0xff] %v5991_v22  ;;  %v698_v23 = vpack.c.bf16 %v5991_v22, %v5989_v21  ;;  %v851_v22 = vld [vmem:[#allocation2 + $0x10e] sm:$0xff] }
  0xbc   : > { %1453 = vmatmul.mubr.bf16.gmra.mxu0 %v542_v53  ;;  %v720_v53 = vld [vmem:[#allocation2 + $0x5c] sm:$0xff] }
  0xbd   : > { %1630 = vmatmul.mubr.bf16.gmra.mxu1 %v650_v37  ;;  %1460 = vmatprep.mubr.bf16.mxu0 %v597_v54  ;;  %v5930_v37 = vld [vmem:[#allocation2 + $0x2b] sm:$0xff]  ;;  %v751_v61 = vpack.c.bf16 %v720_v53, %v719_v52  ;;  %v727_v52 = vld [vmem:[#allocation2 + $0x94] sm:$0xff]  ;;  %v728_v53 = vld [vmem:[#allocation2 + $0x9c] sm:$0xff] }
  0xbe   : > { %1637 = vmatprep.mubr.bf16.mxu1 %v652_v55  ;;  %8177 = vst [vmem:[#allocation6_spill] sm:$0xff] %v5930_v37  ;;  %v694_v38 = vpack.c.bf16 %v5930_v37, %v5928_v36  ;;  %v776_v54 = vld [vmem:[#allocation2 + $0x65] sm:$0xff] }
  0xc4   : > { %1461 = vmatmul.mubr.bf16.gmra.mxu0 %v543_v63 }
  0xc5   : > { %1638 = vmatmul.mubr.bf16.gmra.mxu1 %v651_v46  ;;  %1468 = vmatprep.mubr.bf16.mxu0 %v598_v0  ;;  %v5940_v46 = vld [vmem:[#allocation2 + $0x33] sm:$0xff]  ;;  %v5414_v0 = vld [vmem:[%s8039_s2 + $0x200] sm:$0xff]  }
  0xc6   : > { %1645 = vmatprep.mubr.bf16.mxu1 %v653_v2  ;;  %8178 = vst [vmem:[#allocation7_spill] sm:$0xff] %v5940_v46  ;;  %v695_v48 = vpack.c.bf16 %v5942_v47, %v5940_v46 }
  0xcc   : > { %1469 = vmatmul.mubr.bf16.gmra.mxu0 %v544_v9  ;;  %v5972_v9 = vld [vmem:[#allocation2 + $0x5b] sm:$0xff] }
  0xcd   : > { %1646 = vmatmul.mubr.bf16.gmra.mxu1 %v652_v55  ;;  %1476 = vmatprep.mubr.bf16.mxu0 %v599_v10  ;;  %v777_v55 = vld [vmem:[#allocation2 + $0x6d] sm:$0xff]  ;;  %8183 = vst [vmem:[#allocation12_spill] sm:$0xff] %v5972_v9  ;;  %v697_v10 = vpack.c.bf16 %v5972_v9, %v5970_v8 }
  0xce   : > { %1653 = vmatprep.mubr.bf16.mxu1 %v656_v11  ;;  %v808_v63 = vpack.c.bf16 %v777_v55, %v776_v54  ;;  %v752_v11 = vpack.c.bf16 %v722_v5, %v721_v4  ;;  %v784_v55 = vld [vmem:[#allocation2 + $0xa5] sm:$0xff]  ;;  %v855_v9 = vld [vmem:[#allocation2 + $0x12e] sm:$0xff] }
  0xcf   : > { %v215_v4 = vld [vmem:[%s8037_s0 + $0x80] sm:$0xff] }
  0xd4   : > { %1477 = vmatmul.mubr.bf16.gmra.mxu0 %v545_v18  ;;  %v724_v18 = vld [vmem:[#allocation2 + $0x7c] sm:$0xff] }
  0xd5   : > { %1654 = vmatmul.mubr.bf16.gmra.mxu1 %v653_v2  ;;  %1694 = vmatprep.mubr.bf16.mxu0 %v747_v19  ;;  %v201_v2 = vld [vmem:[%s8037_s0 + $0x10] sm:$0xff]  ;;  %v780_v19 = vld [vmem:[#allocation2 + $0x85] sm:$0xff]  ;;  %v753_v24 = vpack.c.bf16 %v724_v18, %v723_v17 }
  0xd6   : > { %1871 = vmatprep.mubr.bf16.mxu1 %v804_v20  ;;  %2205 = vperm.xlu1 %5342, %v201_v2   ;;  %v781_v20 = vld [vmem:[#allocation2 + $0x8d] sm:$0xff]  ;;  %v755_v2 = vpack.c.bf16 %v728_v53, %v727_v52  ;;  %v729_v17 = vld [vmem:[#allocation2 + $0xa4] sm:$0xff] }
  0xd7   : > { %v730_v18 = vld [vmem:[#allocation2 + $0xac] sm:$0xff] }
  0xd8   : > { %v788_v53 = vld [vmem:[#allocation2 + $0xc5] sm:$0xff] }
  0xda   : > { %2210 = vperm.xlu1 %5342, %v202_v12  }
  0xdc   : > { %1695 = vmatmul.mubr.bf16.vlgmr.msra.gmra.mxu0 %v693_v27  ;;  %v206_v27 = vld [vmem:[%s8037_s0 + $0x38] sm:$0xff] }
  0xdd   : > { %5227 = vmatpush3.bf16.msra.mxu0 %v5905_v60  ;;  %1872 = vmatmul.mubr.bf16.vlgmr.msra.gmra.mxu1 %v748_v28  ;;  %v749_v60 = vpack.c.bf16 %v716_v32, %v715_v31  ;;  %v209_v31 = vld [vmem:[%s8037_s0 + $0x50] sm:$0xff]  ;;  %v725_v32 = vld [vmem:[#allocation2 + $0x84] sm:$0xff] }
  0xde   : > { %1702 = vmatprep.mubr.bf16.mxu0 %v748_v28  ;;  %1879 = vmatprep.mubr.bf16.mxu1 %v805_v29  ;;  %v207_v28 = vld [vmem:[%s8037_s0 + $0x40] sm:$0xff]  ;;  %v810_v29 = vpack.c.bf16 %v781_v20, %v780_v19  ;;  %v786_v20 = vld [vmem:[#allocation2 + $0xb5] sm:$0xff] }
  0xdf   : > { %5228 = vmatprep.subr.bf16.mxu0 %v5408_v30  ;;  %2220 = vperm.xlu1 %5342, %v204_v15  }
  0xe0   : > { %2235 = vperm.xlu0 %5341, %v207_v28   ;;  %v6051_v28 = vld [vmem:[#allocation2 + $0x9b] sm:$0xff] }
  0xe1   : > { %5229 = vmatpush3.bf16.msra.mxu0 %v5408_v30  ;;  %v208_v30 = vld [vmem:[%s8037_s0 + $0x48] sm:$0xff]  ;;  %8191 = vst [vmem:[#allocation20_spill] sm:$0xff] %v6051_v28 }
  0xe2   : > { %5230 = vmatprep.subr.bf16.mxu0 %v5409_v33 }
  0xe3   : > { %2230 = vperm.xlu1 %5342, %v206_v27   ;;  %v6049_v27 = vld [vmem:[#allocation2 + $0x93] sm:$0xff] }
  0xe4   : > { %1703 = vmatmul.mubr.bf16.gmra.mxu0 %v694_v38  ;;  %v6007_v38 = vld [vmem:[#allocation2 + $0x73] sm:$0xff]  ;;  %2245 = vperm.xlu0 %5341, %v209_v31   ;;  %8190 = vst [vmem:[#allocation19_spill] sm:$0xff] %v6049_v27  ;;  %v756_v31 = vpack.c.bf16 %v730_v18, %v729_v17 }
  0xe5   : > { %1880 = vmatmul.mubr.bf16.gmra.mxu1 %v749_v60  ;;  %1710 = vmatprep.mubr.bf16.mxu0 %v749_v60  ;;  %8186 = vst [vmem:[#allocation15_spill] sm:$0xff] %v6007_v38  ;;  %v6009_v60 = vld [vmem:[#allocation2 + $0x7b] sm:$0xff] }
  0xe6   : > { %1887 = vmatprep.mubr.bf16.mxu1 %v806_v39  ;;  %5231 = vmatpush3.bf16.msra.mxu0 %v5409_v33  ;;  %v726_v33 = vld [vmem:[#allocation2 + $0x8c] sm:$0xff]  ;;  %8187 = vst [vmem:[#allocation16_spill] sm:$0xff] %v6009_v60  ;;  %v699_v39 = vpack.c.bf16 %v6009_v60, %v6007_v38 }
  0xe7   : > { %5232 = vmatprep.subr.bf16.mxu0 %v5410_v40  ;;  %2240 = vperm.xlu1 %5342, %v208_v30   ;;  %v847_v60 = vld [vmem:[#allocation2 + $0xee] sm:$0xff] }
  0xe8   : > { %2255 = vperm.xlu0 %5341, %v211_v42  }
  0xea   : > { %5233 = vmatpush3.bf16.msra.mxu0 %v5410_v40  ;;  %v754_v40 = vpack.c.bf16 %v726_v33, %v725_v32  ;;  %v218_v32 = vld [vmem:[%s8037_s0 + $0x98] sm:$0xff]  ;;  %v219_v33 = vld [vmem:[%s8037_s0 + $0xa0] sm:$0xff] }
  0xeb   : > { %5234 = vmatprep.subr.bf16.mxu0 %v5411_v45  ;;  %2250 = vperm.xlu1 %5342, %v210_v41  }
  0xec   : > { %1711 = vmatmul.mubr.bf16.gmra.mxu0 %v695_v48  ;;  %v212_v48 = vld [vmem:[%s8037_s0 + $0x68] sm:$0xff] }
  0xed   : > { %1888 = vmatmul.mubr.bf16.gmra.mxu1 %v750_v49  ;;  %1718 = vmatprep.mubr.bf16.mxu0 %v750_v49  ;;  %v213_v49 = vld [vmem:[%s8037_s0 + $0x70] sm:$0xff] }
  0xee   : > { %1895 = vmatprep.mubr.bf16.mxu1 %v807_v50  ;;  %5235 = vmatpush3.bf16.msra.mxu0 %v5411_v45 }
  0xef   : > { %5236 = vmatprep.subr.bf16.mxu0 %v5412_v51  ;;  %2260 = vperm.xlu1 %5342, %v212_v48  }
  0xf0   : > { %2265 = vperm.xlu0 %5341, %v213_v49   ;;  %v731_v49 = vld [vmem:[#allocation2 + $0xb4] sm:$0xff] }
  0xf2   : > { %5237 = vmatpush3.bf16.msra.mxu0 %v5412_v51 }
  0xf3   : > { %5238 = vmatprep.subr.bf16.mxu0 %v5413_v56  ;;  %2270 = vperm.xlu1 %5342, %v214_v3   ;;  %v222_v3 = vld [vmem:[%s8037_s0 + $0xb8] sm:$0xff] }
  0xf4   : > { %1719 = vmatmul.mubr.bf16.gmra.mxu0 %v696_v59  ;;  %2275 = vperm.xlu0 %5341, %v215_v4   ;;  %v223_v4 = vld [vmem:[%s8037_s0 + $0xc0] sm:$0xff] }
  0xf5   : > { %1896 = vmatmul.mubr.bf16.gmra.mxu1 %v751_v61  ;;  %1726 = vmatprep.mubr.bf16.mxu0 %v751_v61  ;;  %v6027_v61 = vld [vmem:[#allocation2 + $0x83] sm:$0xff] }
  0xf6   : > { %1903 = vmatprep.mubr.bf16.mxu1 %v808_v63  ;;  %5239 = vmatpush3.bf16.msra.mxu0 %v5413_v56  ;;  %v785_v56 = vld [vmem:[#allocation2 + $0xad] sm:$0xff]  ;;  %8188 = vst [vmem:[#allocation17_spill] sm:$0xff] %v6027_v61  ;;  %v700_v63 = vpack.c.bf16 %v6029_v62, %v6027_v61 }
  0xf7   : > { %5240 = vmatprep.subr.bf16.mxu0 %v5414_v0  ;;  %v812_v7 = vpack.c.bf16 %v785_v56, %v784_v55  ;;  %2280 = vperm.xlu1 %5342, %v216_v13   ;;  %v6071_v56 = vld [vmem:[#allocation2 + $0xa3] sm:$0xff]  ;;  %v843_v62 = vld [vmem:[#allocation2 + $0xce] sm:$0xff] }
  0xf8   : > { %8192 = vst [vmem:[#allocation21_spill] sm:$0xff] %v6071_v56 }
  0xfa   : > { %5241 = vmatpush3.bf16.msra.mxu0 %v5414_v0 }
  0xfb   : > { %3884 = vmatprep.subr.bf16.mxu0 %v8042_v1  ;;  %2290 = vperm.xlu1 %5342, %v218_v32   ;;  %v6095_v32 = vld [vmem:[#allocation2 + $0xbb] sm:$0xff] }
  0xfc   : > { %1727 = vmatmul.mubr.bf16.gmra.mxu0 %v697_v10  ;;  %8195 = vst [vmem:[#allocation24_spill] sm:$0xff] %v6095_v32 }
  0xfd   : > { %1904 = vmatmul.mubr.bf16.gmra.mxu1 %v752_v11  ;;  %1734 = vmatprep.mubr.bf16.mxu0 %v752_v11 }
  0xfe   : > { %1911 = vmatprep.mubr.bf16.mxu1 %v809_v14  ;;  %v217_v14 = vld [vmem:[%s8037_s0 + $0x90] sm:$0xff] }
  0xff   : > { %2285 = vperm.xlu0 %5341, %v217_v14   ;;  %v224_v14 = vld [vmem:[%s8037_s0 + $0xc8] sm:$0xff] }
 0x103   : > { %2295 = vperm.xlu0 %5341, %v219_v33  }
 0x104   : > { %1735 = vmatmul.mubr.bf16.gmra.mxu0 %v698_v23  ;;  %v787_v23 = vld [vmem:[#allocation2 + $0xbd] sm:$0xff] }
 0x105   : > { %1912 = vmatmul.mubr.bf16.gmra.mxu1 %v753_v24  ;;  %1742 = vmatprep.mubr.bf16.mxu0 %v753_v24 }
 0x106   : > { %1919 = vmatprep.mubr.bf16.mxu1 %v810_v29  ;;  %v701_v29 = vpack.c.bf16 %v6051_v28, %v6049_v27  ;;  %v839_v28 = vld [vmem:[#allocation2 + $0xae] sm:$0xff] }
 0x10c   : > { %v1342_v44 = vpop.f32.mrf.mxu0  ;;  %1743 = vmatmul.mubr.bf16.gmra.mxu0 %v699_v39  ;;  %v813_v39 = vpack.c.bf16 %v787_v23, %v786_v20  ;;  %v734_v20 = vld [vmem:[#allocation2 + $0xcc] sm:$0xff] }
 0x10d   : > { %v1519_v45 = vpop.f32.mrf.mxu1  ;;  %1920 = vmatmul.mubr.bf16.gmra.mxu1 %v754_v40  ;;  %1750 = vmatprep.mubr.bf16.mxu0 %v754_v40 }
 0x10e   : > { %v6025_v50 = vadd.f32 %v1519_v45, %v1342_v44  ;;  %v1344_v51 = vpop.f32.mrf.mxu0  ;;  %1927 = vmatprep.mubr.bf16.mxu1 %v811_v43  ;;  %v220_v43 = vld [vmem:[%s8037_s0 + $0xa8] sm:$0xff]  ;;  %v221_v44 = vld [vmem:[%s8037_s0 + $0xb0] sm:$0xff] }
 0x10f   : > { %v1521_v54 = vpop.f32.mrf.mxu1  ;;  %v732_v51 = vld [vmem:[#allocation2 + $0xbc] sm:$0xff]  ;;  %2300 = vperm.xlu1 %5342, %v220_v43   ;;  %2305 = vperm.xlu0 %5341, %v221_v44  }
 0x110   : > { %v1345_v59 = vpop.f32.mrf.mxu0  ;;  %v789_v54 = vld [vmem:[#allocation2 + $0xcd] sm:$0xff] }
 0x111   : > { %v1522_v0 = vpop.f32.mrf.mxu1 }
 0x112   : > { %v6039_v5 = vadd.f32 %v1522_v0, %v1345_v59  ;;  %v1347_v6 = vpop.f32.mrf.mxu0  ;;  %v6073_v59 = vld [vmem:[#allocation2 + $0xab] sm:$0xff] }
 0x113   : > { %v1524_v10 = vpop.f32.mrf.mxu1  ;;  %8193 = vst [vmem:[#allocation22_spill] sm:$0xff] %v6073_v59  ;;  %2310 = vperm.xlu1 %5342, %v222_v3   ;;  %2315 = vperm.xlu0 %5341, %v223_v4   ;;  %v792_v3 = vld [vmem:[#allocation2 + $0xe5] sm:$0xff]  ;;  %v793_v4 = vld [vmem:[#allocation2 + $0xed] sm:$0xff] }
 0x114   : > { %v1350_v11 = vpop.f32.mrf.mxu0  ;;  %1751 = vmatmul.mubr.bf16.gmra.mxu0 %v700_v63  ;;  %v702_v63 = vpack.c.bf16 %v6073_v59, %v6071_v56  ;;  %v814_v10 = vpack.c.bf16 %v789_v54, %v788_v53  ;;  %v229_v53 = vld [vmem:[%s8037_s0 + $0xf0] sm:$0xff] }
 0x115   : > { %v1527_v12 = vpop.f32.mrf.mxu1  ;;  %1928 = vmatmul.mubr.bf16.gmra.mxu1 %v755_v2  ;;  %1758 = vmatprep.mubr.bf16.mxu0 %v755_v2  ;;  %v757_v2 = vpack.c.bf16 %v732_v51, %v731_v49  ;;  %v835_v59 = vld [vmem:[#allocation2 + $0x8e] sm:$0xff] }
 0x116   : > { %v6047_v15 = vadd.f32 %v1527_v12, %v1350_v11  ;;  %v1352_v16 = vpop.f32.mrf.mxu0  ;;  %1935 = vmatprep.mubr.bf16.mxu1 %v812_v7 }
 0x117   : > { %v1529_v19 = vpop.f32.mrf.mxu1  ;;  %v225_v16 = vld [vmem:[%s8037_s0 + $0xd0] sm:$0xff]  ;;  %2320 = vperm.xlu1 %5342, %v224_v14  }
 0x118   : > { %v1353_v24 = vpop.f32.mrf.mxu0  ;;  %v733_v19 = vld [vmem:[#allocation2 + $0xc4] sm:$0xff]  ;;  %2325 = vperm.xlu0 %5341, %v225_v16   ;;  %v230_v16 = vld [vmem:[%s8037_s0 + $0xf8] sm:$0xff] }
 0x119   : > { %v1530_v30 = vpop.f32.mrf.mxu1 }
 0x11a   : > { %v6061_v34 = vadd.f32 %v1530_v30, %v1353_v24  ;;  %v1355_v35 = vpop.f32.mrf.mxu0  ;;  %v790_v24 = vld [vmem:[#allocation2 + $0xd5] sm:$0xff] }
 0x11b   : > { %v1532_v40 = vpop.f32.mrf.mxu1 }
 0x11c   : > { %v1358_v41 = vpop.f32.mrf.mxu0  ;;  %1759 = vmatmul.mubr.bf16.gmra.mxu0 %v701_v29  ;;  %v791_v29 = vld [vmem:[#allocation2 + $0xdd] sm:$0xff] }
 0x11d   : > { %v1535_v42 = vpop.f32.mrf.mxu1  ;;  %1936 = vmatmul.mubr.bf16.gmra.mxu1 %v756_v31  ;;  %1766 = vmatprep.mubr.bf16.mxu0 %v756_v31  ;;  %v6093_v31 = vld [vmem:[#allocation2 + $0xb3] sm:$0xff]  ;;  %v815_v44 = vpack.c.bf16 %v791_v29, %v790_v24 }
 0x11e   : > { %v6069_v45 = vadd.f32 %v1535_v42, %v1358_v41  ;;  %v1360_v48 = vpop.f32.mrf.mxu0  ;;  %1943 = vmatprep.mubr.bf16.mxu1 %v813_v39  ;;  %8194 = vst [vmem:[#allocation23_spill] sm:$0xff] %v6093_v31  ;;  %v703_v33 = vpack.c.bf16 %v6095_v32, %v6093_v31  ;;  %v758_v39 = vpack.c.bf16 %v734_v20, %v733_v19  ;;  %v226_v40 = vld [vmem:[%s8037_s0 + $0xd8] sm:$0xff]  ;;  %v227_v41 = vld [vmem:[%s8037_s0 + $0xe0] sm:$0xff]  ;;  %v827_v32 = vld [vmem:[#allocation2 + $0x4e] sm:$0xff] }
 0x11f   : > { %v1537_v52 = vpop.f32.mrf.mxu1  ;;  %2330 = vperm.xlu1 %5342, %v226_v40   ;;  %2335 = vperm.xlu0 %5341, %v227_v41   ;;  %v737_v41 = vld [vmem:[#allocation2 + $0xe4] sm:$0xff] }
 0x120   : > { %v1361_v55 = vpop.f32.mrf.mxu0  ;;  %v228_v52 = vld [vmem:[%s8037_s0 + $0xe8] sm:$0xff] }
 0x121   : > { %v1538_v0 = vpop.f32.mrf.mxu1 }
 0x122   : > { %v6083_v6 = vadd.f32 %v1538_v0, %v1361_v55  ;;  %v1363_v7 = vpop.f32.mrf.mxu0  ;;  %v736_v0 = vld [vmem:[#allocation2 + $0xdc] sm:$0xff] }
 0x123   : > { %v1540_v11 = vpop.f32.mrf.mxu1  ;;  %2340 = vperm.xlu1 %5342, %v228_v52   ;;  %2345 = vperm.xlu0 %5341, %v229_v53   ;;  %v6137_v52 = vld [vmem:[#allocation2 + $0xd3] sm:$0xff]  ;;  %v6139_v53 = vld [vmem:[#allocation2 + $0xdb] sm:$0xff] }
 0x124   : > { %v1366_v12 = vpop.f32.mrf.mxu0  ;;  %1767 = vmatmul.mubr.bf16.gmra.mxu0 %v702_v63  ;;  %v735_v63 = vld [vmem:[#allocation2 + $0xd4] sm:$0xff]  ;;  %v6117_v11 = vld [vmem:[#allocation2 + $0xcb] sm:$0xff]  ;;  %8198 = vst [vmem:[#allocation27_spill] sm:$0xff] %v6137_v52  ;;  %8199 = vst [vmem:[#allocation28_spill] sm:$0xff] %v6139_v53 }
 0x125   : > { %v1543_v13 = vpop.f32.mrf.mxu1  ;;  %1944 = vmatmul.mubr.bf16.gmra.mxu1 %v757_v2  ;;  %1774 = vmatprep.mubr.bf16.mxu0 %v757_v2  ;;  %8197 = vst [vmem:[#allocation26_spill] sm:$0xff] %v6117_v11  ;;  %v759_v14 = vpack.c.bf16 %v736_v0, %v735_v63 }
 0x126   : > { %v6091_v17 = vadd.f32 %v1543_v13, %v1366_v12  ;;  %v1368_v18 = vpop.f32.mrf.mxu0  ;;  %1951 = vmatprep.mubr.bf16.mxu1 %v814_v10  ;;  %v6115_v10 = vld [vmem:[#allocation2 + $0xc3] sm:$0xff] }
 0x127   : > { %v1545_v23 = vpop.f32.mrf.mxu1  ;;  %8196 = vst [vmem:[#allocation25_spill] sm:$0xff] %v6115_v10  ;;  %v704_v12 = vpack.c.bf16 %v6117_v11, %v6115_v10  ;;  %v231_v18 = vld [vmem:[%s8037_s0 + $0x100] sm:$0xff]  ;;  %2350 = vperm.xlu1 %5342, %v230_v16  }
 0x128   : > { %v1369_v30 = vpop.f32.mrf.mxu0  ;;  %v816_v23 = vpack.c.bf16 %v793_v4, %v792_v3  ;;  %2355 = vperm.xlu0 %5341, %v231_v18   ;;  %v826_v10 = vld [vmem:[#allocation2 + $0x46] sm:$0xff] }
 0x129   : > { %v1546_v35 = vpop.f32.mrf.mxu1 }
 0x12a   : > { %v6105_v42 = vadd.f32 %v1546_v35, %v1369_v30  ;;  %v1371_v43 = vpop.f32.mrf.mxu0  ;;  %v233_v35 = vld [vmem:[%s8037_s0 + $0x110] sm:$0xff] }
 0x12b   : > { %v1548_v48 = vpop.f32.mrf.mxu1  ;;  %v738_v43 = vld [vmem:[#allocation2 + $0xec] sm:$0xff] }
 0x12c   : > { %v1374_v49 = vpop.f32.mrf.mxu0  ;;  %1775 = vmatmul.mubr.bf16.gmra.mxu0 %v703_v33  ;;  %v232_v33 = vld [vmem:[%s8037_s0 + $0x108] sm:$0xff]  ;;  %v794_v48 = vld [vmem:[#allocation2 + $0xf5] sm:$0xff]  ;;  %2365 = vperm.xlu0 %5341, %v233_v35   ;;  %v760_v0 = vpack.c.bf16 %v738_v43, %v737_v41 }
 0x12d   : > { %v1551_v51 = vpop.f32.mrf.mxu1  ;;  %1952 = vmatmul.mubr.bf16.gmra.mxu1 %v758_v39  ;;  %1782 = vmatprep.mubr.bf16.mxu0 %v758_v39  ;;  %v6150_v35 = vld [vmem:[#allocation2 + $0xe3] sm:$0xff] }
 0x12e   : > { %v6113_v54 = vadd.f32 %v1551_v51, %v1374_v49  ;;  %v1376_v55 = vpop.f32.mrf.mxu0  ;;  %1959 = vmatprep.mubr.bf16.mxu1 %v815_v44  ;;  %v795_v49 = vld [vmem:[#allocation2 + $0xfd] sm:$0xff]  ;;  %2360 = vperm.xlu1 %5342, %v232_v33   ;;  %8200 = vst [vmem:[#allocation29_spill] sm:$0xff] %v6150_v35 }
 0x12f   : > { %v1553_v2 = vpop.f32.mrf.mxu1  ;;  %v705_v55 = vpack.c.bf16 %v6139_v53, %v6137_v52  ;;  %v766_v53 = vld [vmem:[#allocation2 + $0x13c] sm:$0xff]  ;;  %v822_v52 = vld [vmem:[#allocation2 + $0x26] sm:$0xff] }
 0x130   : > { %v1377_v7 = vpop.f32.mrf.mxu0  ;;  %v234_v2 = vld [vmem:[%s8037_s0 + $0x118] sm:$0xff] }
 0x131   : > { %v1554_v13 = vpop.f32.mrf.mxu1 }
 0x132   : > { %v6127_v19 = vadd.f32 %v1554_v13, %v1377_v7  ;;  %v1379_v20 = vpop.f32.mrf.mxu0  ;;  %v817_v7 = vpack.c.bf16 %v795_v49, %v794_v48  ;;  %2370 = vperm.xlu1 %5342, %v234_v2  }
 0x133   : > { %v1556_v24 = vpop.f32.mrf.mxu1  ;;  %v739_v20 = vld [vmem:[#allocation2 + $0xf4] sm:$0xff] }
 0x134   : > { %v1382_v29 = vpop.f32.mrf.mxu0  ;;  %1783 = vmatmul.mubr.bf16.gmra.mxu0 %v704_v12 }
 0x135   : > { %v1559_v30 = vpop.f32.mrf.mxu1  ;;  %1960 = vmatmul.mubr.bf16.gmra.mxu1 %v759_v14  ;;  %1790 = vmatprep.mubr.bf16.mxu0 %v759_v14 }
 0x136   : > { %v6135_v39 = vadd.f32 %v1559_v30, %v1382_v29  ;;  %v1384_v40 = vpop.f32.mrf.mxu0  ;;  %1967 = vmatprep.mubr.bf16.mxu1 %v816_v23  ;;  %v740_v23 = vld [vmem:[#allocation2 + $0xfc] sm:$0xff]  ;;  %v796_v29 = vld [vmem:[#allocation2 + $0x105] sm:$0xff]  ;;  %v797_v30 = vld [vmem:[#allocation2 + $0x10d] sm:$0xff] }
 0x137   : > { %v1561_v44 = vpop.f32.mrf.mxu1  ;;  %v6152_v40 = vld [vmem:[#allocation2 + $0xeb] sm:$0xff] }
 0x138   : > { %v1385_v51 = vpop.f32.mrf.mxu0  ;;  %8201 = vst [vmem:[#allocation30_spill] sm:$0xff] %v6152_v40  ;;  %v706_v41 = vpack.c.bf16 %v6152_v40, %v6150_v35  ;;  %v761_v44 = vpack.c.bf16 %v740_v23, %v739_v20  ;;  %v6160_v23 = vld [vmem:[#allocation2 + $0xf3] sm:$0xff] }
 0x139   : > { %v1562_v63 = vpop.f32.mrf.mxu1  ;;  %8202 = vst [vmem:[#allocation31_spill] sm:$0xff] %v6160_v23  ;;  %v746_v40 = vld [vmem:[#allocation2 + $0x12c] sm:$0xff] }
 0x13a   : > { %v6146_v3 = vadd.f32 %v1562_v63, %v1385_v51  ;;  %v1387_v4 = vpop.f32.mrf.mxu0  ;;  %v818_v51 = vpack.c.bf16 %v797_v30, %v796_v29 }
 0x13b   : > { %v1564_v12 = vpop.f32.mrf.mxu1 }
 0x13c   : > { %v1390_v13 = vpop.f32.mrf.mxu0  ;;  %1791 = vmatmul.mubr.bf16.gmra.mxu0 %v705_v55  ;;  %v742_v12 = vld [vmem:[#allocation2 + $0x10c] sm:$0xff] }
 0x13d   : > { %v1567_v14 = vpop.f32.mrf.mxu1  ;;  %1968 = vmatmul.mubr.bf16.gmra.mxu1 %v760_v0  ;;  %1798 = vmatprep.mubr.bf16.mxu0 %v760_v0 }
 0x13e   : > { %v6148_v16 = vadd.f32 %v1567_v14, %v1390_v13  ;;  %v1392_v18 = vpop.f32.mrf.mxu0  ;;  %1975 = vmatprep.mubr.bf16.mxu1 %v817_v7  ;;  %v741_v7 = vld [vmem:[#allocation2 + $0x104] sm:$0xff]  ;;  %v798_v14 = vld [vmem:[#allocation2 + $0x115] sm:$0xff] }
 0x13f   : > { %v1569_v24 = vpop.f32.mrf.mxu1  ;;  %v799_v18 = vld [vmem:[#allocation2 + $0x11d] sm:$0xff] }
 0x140   : > { %v1393_v33 = vpop.f32.mrf.mxu0  ;;  %v6162_v24 = vld [vmem:[#allocation2 + $0xfb] sm:$0xff] }
 0x141   : > { %v1570_v43 = vpop.f32.mrf.mxu1  ;;  %8203 = vst [vmem:[#allocation32_spill] sm:$0xff] %v6162_v24  ;;  %v707_v29 = vpack.c.bf16 %v6162_v24, %v6160_v23  ;;  %v800_v24 = vld [vmem:[#allocation2 + $0x125] sm:$0xff]  ;;  %v801_v23 = vld [vmem:[#allocation2 + $0x12d] sm:$0xff] }
 0x142   : > { %v6156_v48 = vadd.f32 %v1570_v43, %v1393_v33  ;;  %v1395_v49 = vpop.f32.mrf.mxu0  ;;  %v762_v33 = vpack.c.bf16 %v742_v12, %v741_v7  ;;  %v6170_v12 = vld [vmem:[#allocation2 + $0x103] sm:$0xff] }
 0x143   : > { %v1572_v55 = vpop.f32.mrf.mxu1  ;;  %8204 = vst [vmem:[#allocation33_spill] sm:$0xff] %v6170_v12 }
 0x144   : > { %v1398_v63 = vpop.f32.mrf.mxu0  ;;  %1799 = vmatmul.mubr.bf16.gmra.mxu0 %v706_v41 }
 0x145   : > { %v1575_v0 = vpop.f32.mrf.mxu1  ;;  %1976 = vmatmul.mubr.bf16.gmra.mxu1 %v761_v44  ;;  %1806 = vmatprep.mubr.bf16.mxu0 %v761_v44  ;;  %v819_v44 = vpack.c.bf16 %v799_v18, %v798_v14 }
 0x146   : > { %v6158_v2 = vadd.f32 %v1575_v0, %v1398_v63  ;;  %v1400_v4 = vpop.f32.mrf.mxu0  ;;  %1983 = vmatprep.mubr.bf16.mxu1 %v818_v51 }
 0x147   : > { %v1577_v13 = vpop.f32.mrf.mxu1  ;;  %v743_v4 = vld [vmem:[#allocation2 + $0x114] sm:$0xff] }
 0x148   : > { %v1401_v20 = vpop.f32.mrf.mxu0  ;;  %v744_v13 = vld [vmem:[#allocation2 + $0x11c] sm:$0xff] }
 0x149   : > { %v1578_v30 = vpop.f32.mrf.mxu1 }
 0x14a   : > { %v6166_v41 = vadd.f32 %v1578_v30, %v1401_v20  ;;  %v1403_v43 = vpop.f32.mrf.mxu0  ;;  %v6172_v20 = vld [vmem:[#allocation2 + $0x10b] sm:$0xff] }
 0x14b   : > { %v1580_v49 = vpop.f32.mrf.mxu1  ;;  %8205 = vst [vmem:[#allocation34_spill] sm:$0xff] %v6172_v20  ;;  %v708_v14 = vpack.c.bf16 %v6172_v20, %v6170_v12  ;;  %v820_v43 = vpack.c.bf16 %v801_v23, %v800_v24  ;;  %v802_v20 = vld [vmem:[#allocation2 + $0x135] sm:$0xff]  ;;  %v803_v12 = vld [vmem:[#allocation2 + $0x13d] sm:$0xff] }
 0x14c   : > { %v1406_v51 = vpop.f32.mrf.mxu0  ;;  %1807 = vmatmul.mubr.bf16.gmra.mxu0 %v707_v29  ;;  %v763_v29 = vpack.c.bf16 %v744_v13, %v743_v4  ;;  %v6180_v13 = vld [vmem:[#allocation2 + $0x113] sm:$0xff] }
 0x14d   : > { %v1583_v55 = vpop.f32.mrf.mxu1  ;;  %1984 = vmatmul.mubr.bf16.gmra.mxu1 %v762_v33  ;;  %1814 = vmatprep.mubr.bf16.mxu0 %v762_v33  ;;  %8206 = vst [vmem:[#allocation35_spill] sm:$0xff] %v6180_v13 }
 0x14e   : > { %v6168_v63 = vadd.f32 %v1583_v55, %v1406_v51  ;;  %v1408_v0 = vpop.f32.mrf.mxu0  ;;  %1991 = vmatprep.mubr.bf16.mxu1 %v819_v44 }
 0x14f   : > { %v1585_v1 = vpop.f32.mrf.mxu1  ;;  %v745_v0 = vld [vmem:[#allocation2 + $0x124] sm:$0xff] }
 0x150   : > { %v1409_v7 = vpop.f32.mrf.mxu0 }
 0x151   : > { %v1586_v18 = vpop.f32.mrf.mxu1 }
 0x152   : > { %v6176_v30 = vadd.f32 %v1586_v18, %v1409_v7  ;;  %v1411_v33 = vpop.f32.mrf.mxu0  ;;  %v6182_v7 = vld [vmem:[#allocation2 + $0x11b] sm:$0xff] }
 0x153   : > { %v1588_v44 = vpop.f32.mrf.mxu1  ;;  %8207 = vst [vmem:[#allocation36_spill] sm:$0xff] %v6182_v7  ;;  %v709_v23 = vpack.c.bf16 %v6182_v7, %v6180_v13  ;;  %v821_v33 = vpack.c.bf16 %v803_v12, %v802_v20  ;;  %v823_v7 = vld [vmem:[#allocation2 + $0x2e] sm:$0xff] }
 0x154   : > { %v1414_v49 = vpop.f32.mrf.mxu0  ;;  %1815 = vmatmul.mubr.bf16.gmra.mxu0 %v708_v14  ;;  %v764_v14 = vpack.c.bf16 %v746_v40, %v745_v0  ;;  %v6190_v0 = vld [vmem:[#allocation2 + $0x123] sm:$0xff] }
 0x155   : > { %v1591_v1 = vpop.f32.mrf.mxu1  ;;  %1992 = vmatmul.mubr.bf16.gmra.mxu1 %v763_v29  ;;  %1822 = vmatprep.mubr.bf16.mxu0 %v763_v29  ;;  %8208 = vst [vmem:[#allocation37_spill] sm:$0xff] %v6190_v0 }
 0x156   : > { %v6178_v51 = vadd.f32 %v1591_v1, %v1414_v49  ;;  %v1416_v55 = vpop.f32.mrf.mxu0  ;;  %1999 = vmatprep.mubr.bf16.mxu1 %v820_v43  ;;  %v765_v49 = vld [vmem:[#allocation2 + $0x134] sm:$0xff] }
 0x157   : > { %v1593_v35 = vpop.f32.mrf.mxu1 }
 0x158   : > { %v1417_v4 = vpop.f32.mrf.mxu0 }
 0x159   : > { %v1594_v24 = vpop.f32.mrf.mxu1 }
 0x15a   : > { %v6186_v18 = vadd.f32 %v1594_v24, %v1417_v4  ;;  %v1419_v29 = vpop.f32.mrf.mxu0  ;;  %v6192_v4 = vld [vmem:[#allocation2 + $0x12b] sm:$0xff]  ;;  %v858_v24 = vpack.c.bf16 %v823_v7, %v822_v52  ;;  %v860_v7 = vpack.c.bf16 %v827_v32, %v826_v10 }
 0x15b   : > { %v1596_v43 = vpop.f32.mrf.mxu1  ;;  %8209 = vst [vmem:[#allocation38_spill] sm:$0xff] %v6192_v4  ;;  %v710_v12 = vpack.c.bf16 %v6192_v4, %v6190_v0 }
 0x15c   : > { %v1422_v44 = vpop.f32.mrf.mxu0  ;;  %1823 = vmatmul.mubr.bf16.gmra.mxu0 %v709_v23  ;;  %v767_v23 = vpack.c.bf16 %v766_v53, %v765_v49 }
 0x15d   : > { %v1599_v35 = vpop.f32.mrf.mxu1  ;;  %2000 = vmatmul.mubr.bf16.gmra.mxu1 %v764_v14  ;;  %1830 = vmatprep.mubr.bf16.mxu0 %v764_v14 }
 0x15e   : > { %v6188_v1 = vadd.f32 %v1599_v35, %v1422_v44  ;;  %v1424_v55 = vpop.f32.mrf.mxu0  ;;  %2007 = vmatprep.mubr.bf16.mxu1 %v821_v33  ;;  %v825_v35 = vld [vmem:[#allocation2 + $0x3e] sm:$0xff] }
 0x15f   : > { %v1601_v13 = vpop.f32.mrf.mxu1 }
 0x160   : > { %v1425_v40 = vpop.f32.mrf.mxu0  ;;  %v824_v13 = vld [vmem:[#allocation2 + $0x36] sm:$0xff] }
 0x161   : > { %v1602_v20 = vpop.f32.mrf.mxu1  ;;  %v859_v53 = vpack.c.bf16 %v825_v35, %v824_v13 }
 0x162   : > { %v6196_v14 = vadd.f32 %v1602_v20, %v1425_v40  ;;  %v1427_v29 = vpop.f32.mrf.mxu0 }
 0x163   : > { %v1604_v43 = vpop.f32.mrf.mxu1  ;;  %v829_v29 = vld [vmem:[#allocation2 + $0x5e] sm:$0xff] }
 0x164   : > { %v1430_v33 = vpop.f32.mrf.mxu0  ;;  %1831 = vmatmul.mubr.bf16.gmra.mxu0 %v710_v12 }
 0x165   : > { %v1607_v44 = vpop.f32.mrf.mxu1  ;;  %2008 = vmatmul.mubr.bf16.gmra.mxu1 %v767_v23  ;;  %5242 = vmatprep.mubr.bf16.mxu0 %v858_v24  ;;  %v828_v24 = vld [vmem:[#allocation2 + $0x56] sm:$0xff] }
 0x166   : > { %v6198_v55 = vadd.f32 %v1607_v44, %v1430_v33  ;;  %v1432_v11 = vpop.f32.mrf.mxu0  ;;  %v830_v33 = vld [vmem:[#allocation2 + $0x66] sm:$0xff]  ;;  %v831_v44 = vld [vmem:[#allocation2 + $0x6e] sm:$0xff]  ;;  %v861_v13 = vpack.c.bf16 %v829_v29, %v828_v24 }
 0x167   : > { %v1609_v4 = vpop.f32.mrf.mxu1  ;;  %v862_v32 = vpack.c.bf16 %v831_v44, %v830_v33 }
 0x168   : > { %v1433_v0 = vpop.f32.mrf.mxu0 }
 0x169   : > { %v1610_v52 = vpop.f32.mrf.mxu1 }
 0x16a   : > { %v6200_v49 = vadd.f32 %v1610_v52, %v1433_v0  ;;  %v1435_v40 = vpop.f32.mrf.mxu0 }
 0x16b   : > { %v1612_v20 = vpop.f32.mrf.mxu1 }
 0x16c   : > { %v1438_v12 = vpop.f32.mrf.mxu0  ;;  %5243 = vmatmul.mubr.bf16.vlgmr.msra.gmra.mxu0 %v859_v53  ;;  %v833_v20 = vld [vmem:[#allocation2 + $0x7e] sm:$0xff] }
 0x16d   : > { %v1615_v23 = vpop.f32.mrf.mxu1  ;;  %5246 = vmatprep.mubr.bf16.mxu0 %v860_v7  ;;  %v832_v7 = vld [vmem:[#allocation2 + $0x76] sm:$0xff] }
 0x16e   : > { %v6202_v43 = vadd.f32 %v1615_v23, %v1438_v12  ;;  %v1440_v11 = vpop.f32.mrf.mxu0  ;;  %v863_v24 = vpack.c.bf16 %v833_v20, %v832_v7 }
 0x16f   : > { %v1617_v4 = vpop.f32.mrf.mxu1  ;;  %v834_v11 = vld [vmem:[#allocation2 + $0x86] sm:$0xff] }
 0x170   : > { %v1441_v31 = vpop.f32.mrf.mxu0  ;;  %v864_v33 = vpack.c.bf16 %v835_v59, %v834_v11 }
 0x171   : > { %v1618_v35 = vpop.f32.mrf.mxu1 }
 0x172   : > { %v6204_v10 = vadd.f32 %v1618_v35, %v1441_v31  ;;  %v1443_v0 = vpop.f32.mrf.mxu0 }
 0x173   : > { %v1620_v52 = vpop.f32.mrf.mxu1 }
 0x174   : > { %v1446_v40 = vpop.f32.mrf.mxu0  ;;  %5247 = vmatmul.mubr.bf16.gmra.mxu0 %v861_v13  ;;  %v837_v52 = vld [vmem:[#allocation2 + $0x9e] sm:$0xff] }
 0x175   : > { %v1623_v53 = vpop.f32.mrf.mxu1  ;;  %5250 = vmatprep.mubr.bf16.mxu0 %v862_v32  ;;  %v836_v32 = vld [vmem:[#allocation2 + $0x96] sm:$0xff] }
 0x176   : > { %v6206_v12 = vadd.f32 %v1623_v53, %v1446_v40  ;;  %v1448_v23 = vpop.f32.mrf.mxu0  ;;  %v865_v7 = vpack.c.bf16 %v837_v52, %v836_v32 }
 0x177   : > { %v1625_v4 = vpop.f32.mrf.mxu1  ;;  %v838_v23 = vld [vmem:[#allocation2 + $0xa6] sm:$0xff] }
 0x178   : > { %v1449_v56 = vpop.f32.mrf.mxu0  ;;  %v866_v59 = vpack.c.bf16 %v839_v28, %v838_v23 }
 0x179   : > { %v1626_v29 = vpop.f32.mrf.mxu1 }
 0x17a   : > { %v6208_v31 = vadd.f32 %v1626_v29, %v1449_v56  ;;  %v1451_v44 = vpop.f32.mrf.mxu0 }
 0x17b   : > { %v1628_v35 = vpop.f32.mrf.mxu1 }
 0x17c   : > { %v1454_v0 = vpop.f32.mrf.mxu0  ;;  %5251 = vmatmul.mubr.bf16.gmra.mxu0 %v863_v24  ;;  %v841_v35 = vld [vmem:[#allocation2 + $0xbe] sm:$0xff] }
 0x17d   : > { %v1631_v13 = vpop.f32.mrf.mxu1  ;;  %5254 = vmatprep.mubr.bf16.mxu0 %v864_v33  ;;  %v840_v33 = vld [vmem:[#allocation2 + $0xb6] sm:$0xff] }
 0x17e   : > { %v6210_v40 = vadd.f32 %v1631_v13, %v1454_v0  ;;  %v1456_v53 = vpop.f32.mrf.mxu0  ;;  %v867_v32 = vpack.c.bf16 %v841_v35, %v840_v33 }
 0x17f   : > { %v1633_v4 = vpop.f32.mrf.mxu1  ;;  %v842_v53 = vld [vmem:[#allocation2 + $0xc6] sm:$0xff] }
 0x180   : > { %v1457_v27 = vpop.f32.mrf.mxu0  ;;  %v868_v28 = vpack.c.bf16 %v843_v62, %v842_v53 }
 0x181   : > { %v1634_v20 = vpop.f32.mrf.mxu1 }
 0x182   : > { %v6212_v56 = vadd.f32 %v1634_v20, %v1457_v27  ;;  %v1459_v11 = vpop.f32.mrf.mxu0 }
 0x183   : > { %v1636_v29 = vpop.f32.mrf.mxu1 }
 0x184   : > { %v1462_v44 = vpop.f32.mrf.mxu0  ;;  %5255 = vmatmul.mubr.bf16.gmra.mxu0 %v865_v7  ;;  %v845_v29 = vld [vmem:[#allocation2 + $0xde] sm:$0xff] }
 0x185   : > { %v1639_v24 = vpop.f32.mrf.mxu1  ;;  %5258 = vmatprep.mubr.bf16.mxu0 %v866_v59  ;;  %v844_v59 = vld [vmem:[#allocation2 + $0xd6] sm:$0xff] }
 0x186   : > { %v6214_v0 = vadd.f32 %v1639_v24, %v1462_v44  ;;  %v1464_v13 = vpop.f32.mrf.mxu0  ;;  %v869_v33 = vpack.c.bf16 %v845_v29, %v844_v59 }
 0x187   : > { %v1641_v4 = vpop.f32.mrf.mxu1  ;;  %v846_v13 = vld [vmem:[#allocation2 + $0xe6] sm:$0xff] }
 0x188   : > { %v1465_v61 = vpop.f32.mrf.mxu0  ;;  %v870_v62 = vpack.c.bf16 %v847_v60, %v846_v13 }
 0x189   : > { %v1642_v52 = vpop.f32.mrf.mxu1 }
 0x18a   : > { %v6216_v27 = vadd.f32 %v1642_v52, %v1465_v61  ;;  %v1467_v23 = vpop.f32.mrf.mxu0 }
 0x18b   : > { %v1644_v20 = vpop.f32.mrf.mxu1 }
 0x18c   : > { %v1470_v11 = vpop.f32.mrf.mxu0  ;;  %5259 = vmatmul.mubr.bf16.gmra.mxu0 %v867_v32  ;;  %v849_v20 = vld [vmem:[#allocation2 + $0xfe] sm:$0xff] }
 0x18d   : > { %v1647_v7 = vpop.f32.mrf.mxu1  ;;  %5262 = vmatprep.mubr.bf16.mxu0 %v868_v28  ;;  %v848_v28 = vld [vmem:[#allocation2 + $0xf6] sm:$0xff] }
 0x18e   : > { %v6218_v44 = vadd.f32 %v1647_v7, %v1470_v11  ;;  %v1472_v24 = vpop.f32.mrf.mxu0  ;;  %v871_v59 = vpack.c.bf16 %v849_v20, %v848_v28 }
 0x18f   : > { %v1649_v4 = vpop.f32.mrf.mxu1  ;;  %v850_v24 = vld [vmem:[#allocation2 + $0x106] sm:$0xff] }
 0x190   : > { %v1473_v38 = vpop.f32.mrf.mxu0  ;;  %v872_v60 = vpack.c.bf16 %v851_v22, %v850_v24 }
 0x191   : > { %v1650_v35 = vpop.f32.mrf.mxu1 }
 0x192   : > { %v6220_v61 = vadd.f32 %v1650_v35, %v1473_v38  ;;  %v1475_v53 = vpop.f32.mrf.mxu0 }
 0x193   : > { %v1652_v52 = vpop.f32.mrf.mxu1 }
 0x194   : > { %v1478_v23 = vpop.f32.mrf.mxu0  ;;  %5263 = vmatmul.mubr.bf16.gmra.mxu0 %v869_v33  ;;  %v852_v52 = vld [vmem:[#allocation2 + $0x116] sm:$0xff] }
 0x195   : > { %v1655_v32 = vpop.f32.mrf.mxu1  ;;  %5266 = vmatprep.mubr.bf16.mxu0 %v870_v62 }
 0x196   : > { %v6222_v11 = vadd.f32 %v1655_v32, %v1478_v23  ;;  %v1480_v7 = vpop.f32.mrf.mxu0  ;;  %v853_v23 = vld [vmem:[#allocation2 + $0x11e] sm:$0xff] }
 0x197   : > { %v1657_v4 = vpop.f32.mrf.mxu1  ;;  %v854_v7 = vld [vmem:[#allocation2 + $0x126] sm:$0xff]  ;;  %v873_v22 = vpack.c.bf16 %v853_v23, %v852_v52 }
 0x198   : > { %v1481_v21 = vpop.f32.mrf.mxu0 }
 0x199   : > { %v1658_v29 = vpop.f32.mrf.mxu1 }
 0x19a   : > { %v6224_v38 = vadd.f32 %v1658_v29, %v1481_v21  ;;  %v1483_v13 = vpop.f32.mrf.mxu0  ;;  %v874_v29 = vpack.c.bf16 %v855_v9, %v854_v7 }
 0x19b   : > { %v1660_v35 = vpop.f32.mrf.mxu1 }
 0x19c   : > { %v1696_v53 = vpop.f32.mrf.mxu0  ;;  %5267 = vmatmul.mubr.bf16.gmra.mxu0 %v871_v59 }
 0x19d   : > { %v1697_v33 = vadd.f32 %v1696_v53, %v6025_v50  ;;  %v1873_v62 = vpop.f32.mrf.mxu1  ;;  %5270 = vmatprep.mubr.bf16.mxu0 %v872_v60 }
 0x19e   : > { %v1698_v32 = vpop.f32.mrf.mxu0 }
 0x19f   : > { %v6227_v4 = vadd.f32 %v1873_v62, %v1697_v33  ;;  %v1875_v28 = vpop.f32.mrf.mxu1  ;;  %v856_v32 = vld [vmem:[#allocation2 + $0x136] sm:$0xff]  ;;  %v857_v33 = vld [vmem:[#allocation2 + $0x13e] sm:$0xff] }
 0x1a0   : > { %v1699_v20 = vpop.f32.mrf.mxu0 }
 0x1a1   : > { %v1700_v21 = vadd.f32 %v1699_v20, %v6039_v5  ;;  %v1876_v24 = vpop.f32.mrf.mxu1  ;;  %v875_v5 = vpack.c.bf16 %v857_v33, %v856_v32 }
 0x1a2   : > { %v1701_v13 = vpop.f32.mrf.mxu0 }
 0x1a3   : > { %v6230_v59 = vadd.f32 %v1876_v24, %v1700_v21  ;;  %v1878_v50 = vpop.f32.mrf.mxu1 }
 0x1a4   : > { %v1704_v35 = vpop.f32.mrf.mxu0  ;;  %5271 = vmatmul.mubr.bf16.gmra.mxu0 %v873_v22 }
 0x1a5   : > { %v1705_v60 = vadd.f32 %v1704_v35, %v6047_v15  ;;  %v1881_v53 = vpop.f32.mrf.mxu1  ;;  %5274 = vmatprep.mubr.bf16.mxu0 %v874_v29 }
 0x1a6   : > { %v1706_v62 = vpop.f32.mrf.mxu0 }
 0x1a7   : > { %v6233_v28 = vadd.f32 %v1881_v53, %v1705_v60  ;;  %v1883_v52 = vpop.f32.mrf.mxu1 }
 0x1a8   : > { %v1707_v23 = vpop.f32.mrf.mxu0 }
 0x1a9   : > { %v1708_v9 = vadd.f32 %v1707_v23, %v6061_v34  ;;  %v1884_v7 = vpop.f32.mrf.mxu1 }
 0x1aa   : > { %v1709_v20 = vpop.f32.mrf.mxu0 }
 0x1ab   : > { %v6236_v21 = vadd.f32 %v1884_v7, %v1708_v9  ;;  %v1886_v24 = vpop.f32.mrf.mxu1 }
 0x1ac   : > { %v1712_v22 = vpop.f32.mrf.mxu0  ;;  %5275 = vmatmul.mubr.bf16.gmra.mxu0 %v875_v5 }
 0x1ad   : > { %v1713_v15 = vadd.f32 %v1712_v22, %v6069_v45  ;;  %v1889_v29 = vpop.f32.mrf.mxu1 }
 0x1ae   : > { %v1714_v13 = vpop.f32.mrf.mxu0 }
 0x1af   : > { %v6239_v50 = vadd.f32 %v1889_v29, %v1713_v15  ;;  %v1891_v35 = vpop.f32.mrf.mxu1 }
 0x1b0   : > { %v1715_v60 = vpop.f32.mrf.mxu0 }
 0x1b1   : > { %v1716_v53 = vadd.f32 %v1715_v60, %v6083_v6  ;;  %v1892_v32 = vpop.f32.mrf.mxu1 }
 0x1b2   : > { %v1717_v33 = vpop.f32.mrf.mxu0 }
 0x1b3   : > { %v6242_v34 = vadd.f32 %v1892_v32, %v1716_v53  ;;  %v1894_v62 = vpop.f32.mrf.mxu1 }
 0x1b4   : > { %v1720_v52 = vpop.f32.mrf.mxu0 }
 0x1b5   : > { %v1721_v23 = vadd.f32 %v1720_v52, %v6091_v17  ;;  %v1897_v9 = vpop.f32.mrf.mxu1 }
 0x1b6   : > { %v1722_v5 = vpop.f32.mrf.mxu0 }
 0x1b7   : > { %v6245_v7 = vadd.f32 %v1897_v9, %v1721_v23  ;;  %v1899_v45 = vpop.f32.mrf.mxu1 }
 0x1b8   : > { %v1723_v20 = vpop.f32.mrf.mxu0 }
 0x1b9   : > { %v1724_v24 = vadd.f32 %v1723_v20, %v6105_v42  ;;  %v1900_v22 = vpop.f32.mrf.mxu1 }
 0x1ba   : > { %v1725_v15 = vpop.f32.mrf.mxu0 }
 0x1bb   : > { %v6248_v29 = vadd.f32 %v1900_v22, %v1724_v24  ;;  %v1902_v6 = vpop.f32.mrf.mxu1 }
 0x1bc   : > { %v1728_v13 = vpop.f32.mrf.mxu0 }
 0x1bd   : > { %v1729_v35 = vadd.f32 %v1728_v13, %v6113_v54  ;;  %v1905_v60 = vpop.f32.mrf.mxu1 }
 0x1be   : > { %v1730_v53 = vpop.f32.mrf.mxu0 }
 0x1bf   : > { %v6251_v32 = vadd.f32 %v1905_v60, %v1729_v35  ;;  %v1907_v17 = vpop.f32.mrf.mxu1 }
 0x1c0   : > { %v1731_v33 = vpop.f32.mrf.mxu0 }
 0x1c1   : > { %v1732_v62 = vadd.f32 %v1731_v33, %v6127_v19  ;;  %v1908_v52 = vpop.f32.mrf.mxu1 }
 0x1c2   : > { %v1733_v23 = vpop.f32.mrf.mxu0 }
 0x1c3   : > { %v6254_v9 = vadd.f32 %v1908_v52, %v1732_v62  ;;  %v1910_v42 = vpop.f32.mrf.mxu1 }
 0x1c4   : > { %v1736_v5 = vpop.f32.mrf.mxu0 }
 0x1c5   : > { %v1737_v45 = vadd.f32 %v1736_v5, %v6135_v39  ;;  %v1913_v20 = vpop.f32.mrf.mxu1 }
 0x1c6   : > { %v1738_v24 = vpop.f32.mrf.mxu0 }
 0x1c7   : > { %v6257_v22 = vadd.f32 %v1913_v20, %v1737_v45  ;;  %v1915_v54 = vpop.f32.mrf.mxu1 }
 0x1c8   : > { %v1739_v15 = vpop.f32.mrf.mxu0 }
 0x1c9   : > { %v1740_v6 = vadd.f32 %v1739_v15, %v6146_v3  ;;  %v1916_v13 = vpop.f32.mrf.mxu1 }
 0x1ca   : > { %v1741_v35 = vpop.f32.mrf.mxu0 }
 0x1cb   : > { %v6260_v60 = vadd.f32 %v1916_v13, %v1740_v6  ;;  %v1918_v19 = vpop.f32.mrf.mxu1 }
 0x1cc   : > { %v1744_v53 = vpop.f32.mrf.mxu0 }
 0x1cd   : > { %v1745_v17 = vadd.f32 %v1744_v53, %v6148_v16  ;;  %v1921_v33 = vpop.f32.mrf.mxu1 }
 0x1ce   : > { %v1746_v62 = vpop.f32.mrf.mxu0 }
 0x1cf   : > { %v6263_v52 = vadd.f32 %v1921_v33, %v1745_v17  ;;  %v1923_v39 = vpop.f32.mrf.mxu1 }
 0x1d0   : > { %v1747_v23 = vpop.f32.mrf.mxu0 }
 0x1d1   : > { %v1748_v42 = vadd.f32 %v1747_v23, %v6156_v48  ;;  %v1924_v5 = vpop.f32.mrf.mxu1 }
 0x1d2   : > { %v1749_v45 = vpop.f32.mrf.mxu0 }
 0x1d3   : > { %v6266_v20 = vadd.f32 %v1924_v5, %v1748_v42  ;;  %v1926_v3 = vpop.f32.mrf.mxu1 }
 0x1d4   : > { %v1752_v24 = vpop.f32.mrf.mxu0 }
 0x1d5   : > { %v1753_v54 = vadd.f32 %v1752_v24, %v6158_v2  ;;  %v1929_v15 = vpop.f32.mrf.mxu1 }
 0x1d6   : > { %v1754_v6 = vpop.f32.mrf.mxu0 }
 0x1d7   : > { %v6269_v13 = vadd.f32 %v1929_v15, %v1753_v54  ;;  %v1931_v16 = vpop.f32.mrf.mxu1 }
 0x1d8   : > { %v1755_v35 = vpop.f32.mrf.mxu0 }
 0x1d9   : > { %v1756_v19 = vadd.f32 %v1755_v35, %v6166_v41  ;;  %v1932_v53 = vpop.f32.mrf.mxu1 }
 0x1da   : > { %v1757_v17 = vpop.f32.mrf.mxu0 }
 0x1db   : > { %v6272_v33 = vadd.f32 %v1932_v53, %v1756_v19  ;;  %v1934_v48 = vpop.f32.mrf.mxu1 }
 0x1dc   : > { %v1760_v62 = vpop.f32.mrf.mxu0 }
 0x1dd   : > { %v1761_v39 = vadd.f32 %v1760_v62, %v6168_v63  ;;  %v1937_v23 = vpop.f32.mrf.mxu1 }
 0x1de   : > { %v1762_v42 = vpop.f32.mrf.mxu0 }
 0x1df   : > { %v6275_v5 = vadd.f32 %v1937_v23, %v1761_v39  ;;  %v1939_v2 = vpop.f32.mrf.mxu1 }
 0x1e0   : > { %v1763_v45 = vpop.f32.mrf.mxu0 }
 0x1e1   : > { %v1764_v3 = vadd.f32 %v1763_v45, %v6176_v30  ;;  %v1940_v24 = vpop.f32.mrf.mxu1 }
 0x1e2   : > { %v1765_v54 = vpop.f32.mrf.mxu0 }
 0x1e3   : > { %v6278_v15 = vadd.f32 %v1940_v24, %v1764_v3  ;;  %v1942_v41 = vpop.f32.mrf.mxu1 }
 0x1e4   : > { %v1768_v6 = vpop.f32.mrf.mxu0 }
 0x1e5   : > { %v1769_v16 = vadd.f32 %v1768_v6, %v6178_v51  ;;  %v1945_v35 = vpop.f32.mrf.mxu1 }
 0x1e6   : > { %v1770_v19 = vpop.f32.mrf.mxu0 }
 0x1e7   : > { %v6281_v53 = vadd.f32 %v1945_v35, %v1769_v16  ;;  %v1947_v63 = vpop.f32.mrf.mxu1 }
 0x1e8   : > { %v1771_v17 = vpop.f32.mrf.mxu0 }
 0x1e9   : > { %v1772_v48 = vadd.f32 %v1771_v17, %v6186_v18  ;;  %v1948_v62 = vpop.f32.mrf.mxu1 }
 0x1ea   : > { %v1773_v39 = vpop.f32.mrf.mxu0 }
 0x1eb   : > { %v6284_v23 = vadd.f32 %v1948_v62, %v1772_v48  ;;  %v1950_v30 = vpop.f32.mrf.mxu1 }
 0x1ec   : > { %v1776_v42 = vpop.f32.mrf.mxu0 }
 0x1ed   : > { %v1777_v2 = vadd.f32 %v1776_v42, %v6188_v1  ;;  %v1953_v45 = vpop.f32.mrf.mxu1  ;;  %v5415_v1 = vld [vmem:[%s8040_s3 + $0x38] sm:$0xff]  }
 0x1ee   : > { %v1778_v3 = vpop.f32.mrf.mxu0  ;;  %3708 = vmatpush1.bf16.msra.mxu1 %v5415_v1 }
 0x1ef   : > { %v6287_v24 = vadd.f32 %v1953_v45, %v1777_v2  ;;  %v1955_v51 = vpop.f32.mrf.mxu1 }
 0x1f0   : > { %v1779_v54 = vpop.f32.mrf.mxu0 }
 0x1f1   : > { %v1780_v41 = vadd.f32 %v1779_v54, %v6196_v14  ;;  %v1956_v6 = vpop.f32.mrf.mxu1  ;;  %v8210_v14 = vmov 0  }
 0x1f2   : > { %v1781_v16 = vpop.f32.mrf.mxu0  ;;  %3709 = vmatprep.subr.bf16.mxu1 %v8210_v14 }
 0x1f3   : > { %v6290_v35 = vadd.f32 %v1956_v6, %v1780_v41  ;;  %v1958_v18 = vpop.f32.mrf.mxu1 }
 0x1f4   : > { %v1784_v19 = vpop.f32.mrf.mxu0 }
 0x1f5   : > { %v1785_v63 = vadd.f32 %v1784_v19, %v6198_v55  ;;  %v1961_v17 = vpop.f32.mrf.mxu1 }
 0x1f6   : > { %v1786_v48 = vpop.f32.mrf.mxu0 }
 0x1f7   : > { %v6296_v62 = vadd.f32 %v1961_v17, %v1785_v63  ;;  %v1963_v39 = vpop.f32.mrf.mxu1 }
 0x1f8   : > { %v1787_v30 = vpop.f32.mrf.mxu0 }
 0x1f9   : > { %v1788_v42 = vadd.f32 %v1787_v30, %v6200_v49  ;;  %v1964_v2 = vpop.f32.mrf.mxu1 }
 0x1fa   : > { %v1789_v45 = vpop.f32.mrf.mxu0 }
 0x1fb   : > { %v6300_v3 = vadd.f32 %v1964_v2, %v1788_v42  ;;  %v1966_v55 = vpop.f32.mrf.mxu1 }
 0x1fc   : > { %v1792_v51 = vpop.f32.mrf.mxu0 }
 0x1fd   : > { %v1793_v54 = vadd.f32 %v1792_v51, %v6202_v43  ;;  %v1969_v41 = vpop.f32.mrf.mxu1 }
 0x1fe   : > { %v1794_v6 = vpop.f32.mrf.mxu0 }
 0x1ff   : > { %v6303_v16 = vadd.f32 %v1969_v41, %v1793_v54  ;;  %v1971_v18 = vpop.f32.mrf.mxu1 }
 0x200   : > { %v1795_v19 = vpop.f32.mrf.mxu0 }
 0x201   : > { %v1796_v63 = vadd.f32 %v1795_v19, %v6204_v10  ;;  %v1972_v17 = vpop.f32.mrf.mxu1 }
 0x202   : > { %v1797_v1 = vpop.f32.mrf.mxu0 }
 0x203   : > { %v6306_v48 = vadd.f32 %v1972_v17, %v1796_v63  ;;  %v1974_v49 = vpop.f32.mrf.mxu1 }
 0x204   : > { %v1800_v39 = vpop.f32.mrf.mxu0  ;;  %v6317_v49 = vpop.permute.xlu0 %2195 }
 0x205   : > { %v1801_v30 = vadd.f32 %v1800_v39, %v6206_v12  ;;  %v1977_v42 = vpop.f32.mrf.mxu1  ;;  %8211 = vst [vmem:[#allocation39_spill] sm:$0xff] %v6317_v49 }
 0x206   : > { %v1802_v2 = vpop.f32.mrf.mxu0 }
 0x207   : > { %v6309_v45 = vadd.f32 %v1977_v42, %v1801_v30  ;;  %v1979_v43 = vpop.f32.mrf.mxu1 }
 0x208   : > { %v1803_v55 = vpop.f32.mrf.mxu0 }
 0x209   : > { %v1804_v51 = vadd.f32 %v1803_v55, %v6208_v31  ;;  %v1980_v54 = vpop.f32.mrf.mxu1  ;;  %v6320_v31 = vpop.permute.xlu1 %2205 }
 0x20a   : > { %v1805_v41 = vpop.f32.mrf.mxu0  ;;  %8212 = vst [vmem:[#allocation40_spill] sm:$0xff] %v6320_v31 }
 0x20b   : > { %v6312_v6 = vadd.f32 %v1980_v54, %v1804_v51  ;;  %v1982_v10 = vpop.f32.mrf.mxu1  ;;  %v6325_v41 = vpop.permute.xlu0 %2200 }
 0x20c   : > { %v1808_v18 = vpop.f32.mrf.mxu0  ;;  %8213 = vst [vmem:[#allocation41_spill] sm:$0xff] %v6325_v41 }
 0x20d   : > { %v1809_v19 = vadd.f32 %v1808_v18, %v6210_v40  ;;  %v1985_v63 = vpop.f32.mrf.mxu1 }
 0x20e   : > { %v1810_v17 = vpop.f32.mrf.mxu0 }
 0x20f   : > { %v6315_v1 = vadd.f32 %v1985_v63, %v1809_v19  ;;  %v1987_v12 = vpop.f32.mrf.mxu1  ;;  %v6329_v63 = vpop.permute.xlu1 %2210 }
 0x210   : > { %v1811_v39 = vpop.f32.mrf.mxu0  ;;  %8214 = vst [vmem:[#allocation42_spill] sm:$0xff] %v6329_v63 }
 0x211   : > { %v1812_v30 = vadd.f32 %v1811_v39, %v6212_v56  ;;  %v1988_v42 = vpop.f32.mrf.mxu1 }
 0x212   : > { %v1813_v2 = vpop.f32.mrf.mxu0 }
 0x213   : > { %v6322_v43 = vadd.f32 %v1988_v42, %v1812_v30  ;;  %v1990_v55 = vpop.f32.mrf.mxu1  ;;  %v6334_v2 = vpop.permute.xlu0 %2215 }
 0x214   : > { %v1816_v51 = vpop.f32.mrf.mxu0  ;;  %8215 = vst [vmem:[#allocation43_spill] sm:$0xff] %v6334_v2 }
 0x215   : > { %v1817_v40 = vadd.f32 %v1816_v51, %v6214_v0  ;;  %v1993_v54 = vpop.f32.mrf.mxu1 }
 0x216   : > { %v1818_v10 = vpop.f32.mrf.mxu0 }
 0x217   : > { %v6327_v18 = vadd.f32 %v1993_v54, %v1817_v40  ;;  %v1995_v19 = vpop.f32.mrf.mxu1  ;;  %v6337_v10 = vpop.permute.xlu1 %2220 }
 0x218   : > { %v1819_v56 = vpop.f32.mrf.mxu0  ;;  %8216 = vst [vmem:[#allocation44_spill] sm:$0xff] %v6337_v10 }
 0x219   : > { %v1820_v17 = vadd.f32 %v1819_v56, %v6216_v27  ;;  %v1996_v12 = vpop.f32.mrf.mxu1 }
 0x21a   : > { %v1821_v39 = vpop.f32.mrf.mxu0 }
 0x21b   : > { %v6332_v30 = vadd.f32 %v1996_v12, %v1820_v17  ;;  %v1998_v42 = vpop.f32.mrf.mxu1  ;;  %v6342_v39 = vpop.permute.xlu0 %2225 }
 0x21c   : > { %v1824_v0 = vpop.f32.mrf.mxu0  ;;  %8217 = vst [vmem:[#allocation45_spill] sm:$0xff] %v6342_v39  ;;  %v6346_v58 = vpop.permute.xlu1 %2230 }
 0x21d   : > { %v1825_v55 = vadd.f32 %v1824_v0, %v6218_v44  ;;  %v2001_v51 = vpop.f32.mrf.mxu1  ;;  %8218 = vst [vmem:[#allocation46_spill] sm:$0xff] %v6346_v58 }
 0x21e   : > { %v1826_v40 = vpop.f32.mrf.mxu0 }
 0x21f   : > { %v6339_v54 = vadd.f32 %v2001_v51, %v1825_v55  ;;  %v2003_v19 = vpop.f32.mrf.mxu1 }
 0x220   : > { %v1827_v8 = vpop.f32.mrf.mxu0  ;;  %v6351_v19 = vpop.permute.xlu0 %2235 }
 0x221   : > { %v1828_v27 = vadd.f32 %v1827_v8, %v6220_v61  ;;  %v2004_v56 = vpop.f32.mrf.mxu1  ;;  %8219 = vst [vmem:[#allocation47_spill] sm:$0xff] %v6351_v19 }
 0x222   : > { %v1829_v17 = vpop.f32.mrf.mxu0 }
 0x223   : > { %v6344_v12 = vadd.f32 %v2004_v56, %v1828_v27  ;;  %v2006_v42 = vpop.f32.mrf.mxu1  ;;  %v6354_v17 = vpop.permute.xlu1 %2240 }
 0x224   : > { %v1832_v44 = vpop.f32.mrf.mxu0  ;;  %8220 = vst [vmem:[#allocation48_spill] sm:$0xff] %v6354_v17  ;;  %v6358_v37 = vpop.permute.xlu0 %2245 }
 0x225   : > { %v1833_v0 = vadd.f32 %v1832_v44, %v6222_v11  ;;  %v2009_v57 = vpop.f32.mrf.mxu1  ;;  %8221 = vst [vmem:[#allocation49_spill] sm:$0xff] %v6358_v37 }
 0x226   : > { %v1834_v40 = vpop.f32.mrf.mxu0 }
 0x227   : > { %v6349_v55 = vadd.f32 %v2009_v57, %v1833_v0  ;;  %v2011_v51 = vpop.f32.mrf.mxu1  ;;  %v6360_v44 = vpop.permute.xlu1 %2250 }
 0x228   : > { %v1835_v8 = vpop.f32.mrf.mxu0  ;;  %8222 = vst [vmem:[#allocation50_spill] sm:$0xff] %v6360_v44 }
 0x229   : > { %v1836_v61 = vadd.f32 %v1835_v8, %v6224_v38  ;;  %v2012_v47 = vpop.f32.mrf.mxu1 }
 0x22a   : > { %v1837_v27 = vpop.f32.mrf.mxu0 }
 0x22b   : > { %v6356_v56 = vadd.f32 %v2012_v47, %v1836_v61  ;;  %v2014_v42 = vpop.f32.mrf.mxu1  ;;  %v6371_v47 = vpop.permute.xlu0 %2255 }
 0x22c   : > { %v5244_v46 = vpop.f32.mrf.mxu0  ;;  %8223 = vst [vmem:[#allocation51_spill] sm:$0xff] %v6371_v47  ;;  %v6380_v42 = vpop.permute.xlu1 %2260 }
 0x22d   : > { %v6366_v38 = vadd.f32 %v5244_v46, %v6233_v28  ;;  %8224 = vst [vmem:[#allocation52_spill] sm:$0xff] %v6380_v42 }
 0x22e   : > { %v2050_v11 = vpop.f32.mrf.mxu0 }
 0x22f   : > { %v6363_v0 = vadd.f32 %v2050_v11, %v6227_v4  ;;  %v2375_v46 = vmul.f32 %v6320_v31, %v6366_v38 }
 0x230   : > { %v5245_v57 = vpop.f32.mrf.mxu0 }
 0x231   : > { %v2373_v61 = vmul.f32 %v6317_v49, %v6363_v0  ;;  %v6376_v27 = vadd.f32 %v5245_v57, %v6236_v21  ;;  %v6389_v21 = vpop.permute.xlu0 %2265 }
 0x232   : > { %v2053_v40 = vpop.f32.mrf.mxu0  ;;  %8225 = vst [vmem:[#allocation53_spill] sm:$0xff] %v6389_v21 }
 0x233   : > { %v6369_v51 = vadd.f32 %v2053_v40, %v6230_v59  ;;  %v2376_v36 = vmul.f32 %v6329_v63, %v6376_v27 }
 0x234   : > { %v5248_v8 = vpop.f32.mrf.mxu0 }
 0x235   : > { %v2374_v4 = vmul.f32 %v6325_v41, %v6369_v51  ;;  %v6392_v25 = vadd.f32 %v5248_v8, %v6245_v7 }
 0x236   : > { %v2066_v11 = vpop.f32.mrf.mxu0 }
 0x237   : > { %v2409_v59 = vadd.f32 %v2374_v4, %v2373_v61  ;;  %v6385_v28 = vadd.f32 %v2066_v11, %v6239_v50  ;;  %v6399_v50 = vpop.permute.xlu1 %2270  ;;  %v2379_v7 = vmul.f32 %v6342_v39, %v6392_v25 }
 0x238   : > { %v5249_v40 = vpop.f32.mrf.mxu0  ;;  %8226 = vst [vmem:[#allocation54_spill] sm:$0xff] %v6399_v50 }
 0x239   : > { %v2410_v26 = vadd.f32 %v2409_v59, %v2375_v46  ;;  %v2377_v41 = vmul.f32 %v6334_v2, %v6385_v28  ;;  %v6402_v63 = vadd.f32 %v5249_v40, %v6248_v29 }
 0x23a   : > { %v2069_v57 = vpop.f32.mrf.mxu0 }
 0x23b   : > { %v2411_v49 = vadd.f32 %v2410_v26, %v2376_v36  ;;  %v6397_v61 = vadd.f32 %v2069_v57, %v6242_v34  ;;  %v6411_v36 = vpop.permute.xlu0 %2275  ;;  %v6415_v29 = vpop.permute.xlu1 %2280 }
 0x23c   : > { %v5252_v4 = vpop.f32.mrf.mxu0  ;;  %8227 = vst [vmem:[#allocation55_spill] sm:$0xff] %v6411_v36  ;;  %8228 = vst [vmem:[#allocation56_spill] sm:$0xff] %v6415_v29 }
 0x23d   : > { %v2412_v11 = vadd.f32 %v2411_v49, %v2377_v41  ;;  %v2378_v46 = vmul.f32 %v6337_v10, %v6397_v61  ;;  %v2380_v49 = vmul.f32 %v6346_v58, %v6402_v63  ;;  %v6418_v57 = vadd.f32 %v5252_v4, %v6257_v22 }
 0x23e   : > { %v2082_v59 = vpop.f32.mrf.mxu0 }
 0x23f   : > { %v2413_v8 = vadd.f32 %v2412_v11, %v2378_v46  ;;  %v6409_v26 = vadd.f32 %v2082_v59, %v6251_v32  ;;  %v2383_v22 = vmul.f32 %v6358_v37, %v6418_v57 }
 0x240   : > { %v5253_v34 = vpop.f32.mrf.mxu0 }
 0x241   : > { %v2414_v41 = vadd.f32 %v2413_v8, %v2379_v7  ;;  %v2381_v39 = vmul.f32 %v6351_v19, %v6409_v26  ;;  %v6426_v10 = vadd.f32 %v5253_v34, %v6260_v60  ;;  %v6430_v8 = vpop.permute.xlu0 %2285 }
 0x242   : > { %v2085_v40 = vpop.f32.mrf.mxu0  ;;  %8229 = vst [vmem:[#allocation57_spill] sm:$0xff] %v6430_v8 }
 0x243   : > { %v2415_v11 = vadd.f32 %v2414_v41, %v2380_v49  ;;  %v6423_v32 = vadd.f32 %v2085_v40, %v6254_v9  ;;  %v6437_v9 = vpop.permute.xlu1 %2290  ;;  %v2384_v60 = vmul.f32 %v6360_v44, %v6426_v10 }
 0x244   : > { %v5256_v46 = vpop.f32.mrf.mxu0  ;;  %8230 = vst [vmem:[#allocation58_spill] sm:$0xff] %v6437_v9 }
 0x245   : > { %v2416_v59 = vadd.f32 %v2415_v11, %v2381_v39  ;;  %v2382_v7 = vmul.f32 %v6354_v17, %v6423_v32  ;;  %v6442_v40 = vadd.f32 %v5256_v46, %v6269_v13 }
 0x246   : > { %v2098_v58 = vpop.f32.mrf.mxu0 }
 0x247   : > { %v2417_v4 = vadd.f32 %v2416_v59, %v2382_v7  ;;  %v6435_v49 = vadd.f32 %v2098_v58, %v6263_v52  ;;  %v6449_v58 = vpop.permute.xlu0 %2295  ;;  %v2387_v46 = vmul.f32 %v6389_v21, %v6442_v40 }
 0x248   : > { %v5257_v41 = vpop.f32.mrf.mxu0  ;;  %8231 = vst [vmem:[#allocation59_spill] sm:$0xff] %v6449_v58 }
 0x249   : > { %v2418_v39 = vadd.f32 %v2417_v4, %v2383_v22  ;;  %v2385_v11 = vmul.f32 %v6371_v47, %v6435_v49  ;;  %v6452_v37 = vadd.f32 %v5257_v41, %v6272_v33  ;;  %v6456_v4 = vpop.permute.xlu1 %2300 }
 0x24a   : > { %v2101_v34 = vpop.f32.mrf.mxu0  ;;  %8232 = vst [vmem:[#allocation60_spill] sm:$0xff] %v6456_v4 }
 0x24b   : > { %v2419_v17 = vadd.f32 %v2418_v39, %v2384_v60  ;;  %v6447_v59 = vadd.f32 %v2101_v34, %v6266_v20  ;;  %v6465_v33 = vpop.permute.xlu0 %2305 }
 0x24c   : > { %v5260_v52 = vpop.f32.mrf.mxu0  ;;  %8233 = vst [vmem:[#allocation61_spill] sm:$0xff] %v6465_v33 }
 0x24d   : > { %v2420_v7 = vadd.f32 %v2419_v17, %v2385_v11  ;;  %v2386_v22 = vmul.f32 %v6380_v42, %v6447_v59  ;;  %v2388_v17 = vmul.f32 %v6399_v50, %v6452_v37  ;;  %v6468_v11 = vadd.f32 %v5260_v52, %v6281_v53 }
 0x24e   : > { %v2114_v13 = vpop.f32.mrf.mxu0 }
 0x24f   : > { %v2421_v60 = vadd.f32 %v2420_v7, %v2386_v22  ;;  %v6461_v20 = vadd.f32 %v2114_v13, %v6275_v5  ;;  %v6475_v5 = vpop.permute.xlu1 %2310  ;;  %v2391_v53 = vmul.f32 %v6430_v8, %v6468_v11 }
 0x250   : > { %v5261_v39 = vpop.f32.mrf.mxu0  ;;  %8234 = vst [vmem:[#allocation62_spill] sm:$0xff] %v6475_v5 }
 0x251   : > { %v2422_v34 = vadd.f32 %v2421_v60, %v2387_v46  ;;  %v2389_v42 = vmul.f32 %v6411_v36, %v6461_v20  ;;  %v6478_v50 = vadd.f32 %v5261_v39, %v6284_v23 }
 0x252   : > { %v2117_v41 = vpop.f32.mrf.mxu0 }
 0x253   : > { %v2423_v47 = vadd.f32 %v2422_v34, %v2388_v17  ;;  %v6473_v7 = vadd.f32 %v2117_v41, %v6278_v15  ;;  %v6487_v15 = vpop.permute.xlu0 %2315  ;;  %v6491_v23 = vpop.permute.xlu1 %2320 }
 0x254   : > { %v5264_v22 = vpop.f32.mrf.mxu0  ;;  %8235 = vst [vmem:[#allocation63_spill] sm:$0xff] %v6487_v15  ;;  %8236 = vst [vmem:[#allocation64_spill] sm:$0xff] %v6491_v23 }
 0x255   : > { %v2424_v13 = vadd.f32 %v2423_v47, %v2389_v42  ;;  %v2390_v46 = vmul.f32 %v6415_v29, %v6473_v7  ;;  %v2392_v47 = vmul.f32 %v6437_v9, %v6478_v50  ;;  %v6494_v41 = vadd.f32 %v5264_v22, %v6296_v62 }
 0x256   : > { %v2130_v60 = vpop.f32.mrf.mxu0 }
 0x257   : > { %v2425_v52 = vadd.f32 %v2424_v13, %v2390_v46  ;;  %v6485_v17 = vadd.f32 %v2130_v60, %v6287_v24  ;;  %v2395_v62 = vmul.f32 %v6465_v33, %v6494_v41 }
 0x258   : > { %v5265_v34 = vpop.f32.mrf.mxu0 }
 0x259   : > { %v2426_v42 = vadd.f32 %v2425_v52, %v2391_v53  ;;  %v2393_v8 = vmul.f32 %v6449_v58, %v6485_v17  ;;  %v6502_v29 = vadd.f32 %v5265_v34, %v6300_v3  ;;  %v6506_v52 = vpop.permute.xlu0 %2325 }
 0x25a   : > { %v2133_v39 = vpop.f32.mrf.mxu0  ;;  %8237 = vst [vmem:[#allocation65_spill] sm:$0xff] %v6506_v52 }
 0x25b   : > { %v2427_v13 = vadd.f32 %v2426_v42, %v2392_v47  ;;  %v6499_v24 = vadd.f32 %v2133_v39, %v6290_v35  ;;  %v6513_v35 = vpop.permute.xlu1 %2330  ;;  %v2396_v3 = vmul.f32 %v6475_v5, %v6502_v29 }
 0x25c   : > { %v5268_v46 = vpop.f32.mrf.mxu0  ;;  %8238 = vst [vmem:[#allocation66_spill] sm:$0xff] %v6513_v35 }
 0x25d   : > { %v2428_v60 = vadd.f32 %v2427_v13, %v2393_v8  ;;  %v2394_v53 = vmul.f32 %v6456_v4, %v6499_v24  ;;  %v6518_v39 = vadd.f32 %v5268_v46, %v6309_v45  ;;  %v5416_v46 = vld [vmem:[%s8040_s3 + $0x30] sm:$0xff]  }
 0x25e   : > { %v2146_v9 = vpop.f32.mrf.mxu0  ;;  %3710 = vmatpush1.bf16.msra.mxu1 %v5416_v46 }
 0x25f   : > { %v2429_v22 = vadd.f32 %v2428_v60, %v2394_v53  ;;  %v6511_v47 = vadd.f32 %v2146_v9, %v6303_v16  ;;  %v6525_v16 = vpop.permute.xlu0 %2335  ;;  %3711 = vmatprep.subr.bf16.mxu1 %v8210_v14 }
 0x260   : > { %v5269_v42 = vpop.f32.mrf.mxu0  ;;  %8239 = vst [vmem:[#allocation67_spill] sm:$0xff] %v6525_v16 }
 0x261   : > { %v2430_v8 = vadd.f32 %v2429_v22, %v2395_v62  ;;  %v2397_v13 = vmul.f32 %v6487_v15, %v6511_v47  ;;  %v6528_v33 = vadd.f32 %v5269_v42, %v6312_v6  ;;  %v6532_v22 = vpop.permute.xlu1 %2340 }
 0x262   : > { %v2149_v34 = vpop.f32.mrf.mxu0  ;;  %8240 = vst [vmem:[#allocation68_spill] sm:$0xff] %v6532_v22 }
 0x263   : > { %v2431_v4 = vadd.f32 %v2430_v8, %v2396_v3  ;;  %v6523_v60 = vadd.f32 %v2149_v34, %v6306_v48  ;;  %v2399_v48 = vmul.f32 %v6506_v52, %v6518_v39  ;;  %v2400_v6 = vmul.f32 %v6513_v35, %v6528_v33  ;;  %v6545_v34 = vpop.permute.xlu0 %2345 }
 0x264   : > { %v5272_v9 = vpop.f32.mrf.mxu0  ;;  %8241 = vst [vmem:[#allocation69_spill] sm:$0xff] %v6545_v34 }
 0x265   : > { %v2432_v53 = vadd.f32 %v2431_v4, %v2397_v13  ;;  %v2398_v62 = vmul.f32 %v6491_v23, %v6523_v60  ;;  %v5417_v23 = vld [vmem:[%s8040_s3 + $0x28] sm:$0xff]   ;;  %v6558_v46 = vpop.permute.xlu1 %2350 }
 0x266   : > { %v2162_v45 = vpop.f32.mrf.mxu0  ;;  %8242 = vst [vmem:[#allocation70_spill] sm:$0xff] %v6558_v46  ;;  %3712 = vmatpush1.bf16.msra.mxu1 %v5417_v23 }
 0x267   : > { %v2433_v3 = vadd.f32 %v2432_v53, %v2398_v62  ;;  %v6540_v8 = vadd.f32 %v2162_v45, %v6315_v1  ;;  %v6551_v53 = vadd.f32 %v5272_v9, %v6327_v18  ;;  %3713 = vmatprep.subr.bf16.mxu1 %v8210_v14  ;;  %v5418_v9 = vld [vmem:[%s8040_s3 + $0x20] sm:$0xff]  }
 0x268   : > { %v5273_v4 = vpop.f32.mrf.mxu0 }
 0x269   : > { %v2434_v42 = vadd.f32 %v2433_v3, %v2399_v48  ;;  %v2401_v1 = vmul.f32 %v6525_v16, %v6540_v8  ;;  %v6561_v35 = vadd.f32 %v5273_v4, %v6332_v30  ;;  %v5425_v4 = vld [vmem:[%s8040_s3 + $0xb8] sm:$0xff]  }
 0x26a   : > { %v2165_v13 = vpop.f32.mrf.mxu0  ;;  %3714 = vmatpush1.bf16.msra.mxu1 %v5418_v9  ;;  %3885 = vmatpush1.bf16.msra.mxu0 %v5425_v4 }
 0x26b   : > { %v2435_v62 = vadd.f32 %v2434_v42, %v2400_v6  ;;  %v6556_v45 = vadd.f32 %v2165_v13, %v6322_v43  ;;  %v2403_v43 = vmul.f32 %v6545_v34, %v6551_v53  ;;  %v6574_v42 = vpop.permute.xlu0 %2355  ;;  %v2404_v13 = vmul.f32 %v6558_v46, %v6561_v35  ;;  %3715 = vmatprep.subr.bf16.mxu1 %v8210_v14 }
 0x26c   : > { %v5276_v48 = vpop.f32.mrf.mxu0  ;;  %8243 = vst [vmem:[#allocation71_spill] sm:$0xff] %v6574_v42  ;;  %3886 = vmatprep.subr.bf16.mxu0 %v8210_v14 }
 0x26d   : > { %v2436_v3 = vadd.f32 %v2435_v62, %v2401_v1  ;;  %v2402_v52 = vmul.f32 %v6532_v22, %v6556_v45  ;;  %v6582_v62 = vpop.permute.xlu1 %2360 }
 0x26e   : > { %v2178_v18 = vpop.f32.mrf.mxu0  ;;  %8244 = vst [vmem:[#allocation72_spill] sm:$0xff] %v6582_v62 }
 0x26f   : > { %v2437_v6 = vadd.f32 %v2436_v3, %v2402_v52  ;;  %v6572_v23 = vadd.f32 %v2178_v18, %v6339_v54  ;;  %v5419_v54 = vld [vmem:[%s8040_s3 + $0x18] sm:$0xff]   ;;  %v6588_v3 = vadd.f32 %v5276_v48, %v6349_v55  ;;  %v6605_v48 = vpop.permute.xlu0 %2365 }
 0x270   : > { %v5277_v30 = vpop.f32.mrf.mxu0  ;;  %3716 = vmatpush1.bf16.msra.mxu1 %v5419_v54  ;;  %8245 = vst [vmem:[#allocation73_spill] sm:$0xff] %v6605_v48 }
 0x271   : > { %v2438_v1 = vadd.f32 %v2437_v6, %v2403_v43  ;;  %v2405_v18 = vmul.f32 %v6574_v42, %v6572_v23  ;;  %v5427_v43 = vld [vmem:[%s8040_s3 + $0xb0] sm:$0xff]   ;;  %v6600_v4 = vadd.f32 %v5277_v30, %v6356_v56  ;;  %3717 = vmatprep.subr.bf16.mxu1 %v8210_v14  ;;  %v6613_v56 = vpop.permute.xlu1 %2370  ;;  %v5428_v30 = vld [vmem:[%s8040_s3 + $0xa8] sm:$0xff]  }
 0x272   : > { %v2181_v52 = vpop.f32.mrf.mxu0  ;;  %3887 = vmatpush1.bf16.msra.mxu0 %v5427_v43  ;;  %8246 = vst [vmem:[#allocation74_spill] sm:$0xff] %v6613_v56  ;;  %v5430_v43 = vld [vmem:[%s8040_s3 + $0xa0] sm:$0xff]  }
 0x273   : > { %v2439_v9 = vadd.f32 %v2438_v1, %v2404_v13  ;;  %v6593_v46 = vadd.f32 %v2181_v52, %v6344_v12  ;;  %v5420_v12 = vld [vmem:[%s8040_s3 + $0x10] sm:$0xff]   ;;  %v2407_v13 = vmul.f32 %v6605_v48, %v6588_v3  ;;  %3888 = vmatprep.subr.bf16.mxu0 %v8210_v14  ;;  %v2408_v52 = vmul.f32 %v6613_v56, %v6600_v4  ;;  %v5446_v48 = vld [vmem:[%s8040_s3 + $0x138] sm:$0xff]  }
 0x274   : > { %3718 = vmatpush1.bf16.msra.mxu1 %v5420_v12 }
 0x275   : > { %v2440_v6 = vadd.f32 %v2439_v9, %v2405_v18  ;;  %v2406_v55 = vmul.f32 %v6582_v62, %v6593_v46  ;;  %3719 = vmatprep.subr.bf16.mxu1 %v8210_v14  ;;  %v5421_v18 = vld [vmem:[%s8040_s3 + $0x8] sm:$0xff]  }
 0x276   : > { %3889 = vmatpush1.bf16.msra.mxu0 %v5428_v30  ;;  %v5423_v30 = vld [vmem:[%s8040_s3 + $0x78] sm:$0xff]  }
 0x277   : > { %v2441_v1 = vadd.f32 %v2440_v6, %v2406_v55  ;;  %3890 = vmatprep.subr.bf16.mxu0 %v8210_v14  ;;  %v5422_v55 = vld [vmem:[%s8040_s3] sm:$0xff]  }
 0x278   : > { %3720 = vmatpush1.bf16.msra.mxu1 %v5421_v18 }
 0x279   : > { %v2442_v54 = vadd.f32 %v2441_v1, %v2407_v13  ;;  %3721 = vmatprep.subr.bf16.mxu1 %v8210_v14  ;;  %v5431_v13 = vld [vmem:[%s8040_s3 + $0x98] sm:$0xff]  }
 0x27a   : > { %3891 = vmatpush1.bf16.msra.mxu0 %v5430_v43 }
 0x27b   : > { %v2443_v9 = vadd.f32 %v2442_v54, %v2408_v52  ;;  %3892 = vmatprep.subr.bf16.mxu0 %v8210_v14  ;;  %v5433_v54 = vld [vmem:[%s8040_s3 + $0x90] sm:$0xff]  }
 0x27c   : > { %3722 = vmatpush1.bf16.msra.mxu1 %v5422_v55  ;;  %v5426_v55 = vld [vmem:[%s8040_s3 + $0x68] sm:$0xff]  }
 0x27d   : > { %v2444_v6 = vrot.slane %v2443_v9, 4  ;;  %3723 = vmatprep.subr.bf16.mxu1 %v8210_v14 }
 0x27e   : > { %3893 = vmatpush1.bf16.msra.mxu0 %v5431_v13  ;;  %v5435_v13 = vld [vmem:[%s8040_s3 + $0x80] sm:$0xff]  }
 0x27f   : > { %v2445_v12 = vadd.f32 %v2444_v6, %v2443_v9  ;;  %3894 = vmatprep.subr.bf16.mxu0 %v8210_v14  ;;  %v5424_v9 = vld [vmem:[%s8040_s3 + $0x70] sm:$0xff]   ;;  %v5434_v6 = vld [vmem:[%s8040_s3 + $0x88] sm:$0xff]  }
 0x280   : > { %3724 = vmatpush2.bf16.msra.mxu1 %v5423_v30 }
 0x281   : > { %v2446_v1 = vrot.slane %v2445_v12, 2  ;;  %3725 = vmatprep.subr.bf16.mxu1 %v8210_v14 }
 0x282   : > { %3895 = vmatpush1.bf16.msra.mxu0 %v5433_v54 }
 0x283   : > { %v2447_v52 = vadd.f32 %v2446_v1, %v2445_v12  ;;  %3896 = vmatprep.subr.bf16.mxu0 %v8210_v14  ;;  %v5429_v1 = vld [vmem:[%s8040_s3 + $0x60] sm:$0xff]  }
 0x284   : > { %3726 = vmatpush2.bf16.msra.mxu1 %v5424_v9 }
 0x285   : > { %v2448_v18 = vrot.slane %v2447_v52, 1  ;;  %3727 = vmatprep.subr.bf16.mxu1 %v8210_v14 }
 0x286   : > { %3897 = vmatpush1.bf16.msra.mxu0 %v5434_v6 }
 0x287   : > { %v2449_v43 = vadd.f32 %v2448_v18, %v2447_v52  ;;  %3898 = vmatprep.subr.bf16.mxu0 %v8210_v14 }
 0x288   : > { %3728 = vmatpush2.bf16.msra.mxu1 %v5426_v55  ;;  %v5439_v55 = vld [vmem:[%s8040_s3 + $0x48] sm:$0xff]  }
 0x289   : > { %v6656_v12 = vmul.f32 0.00390625, %v2449_v43  ;;  %3729 = vmatprep.subr.bf16.mxu1 %v8210_v14 }
 0x28a   : > { %3899 = vmatpush1.bf16.msra.mxu0 %v5435_v13  ;;  %v5441_v13 = vld [vmem:[%s8040_s3 + $0xe0] sm:$0xff]  }
 0x28b   : > { %v6668_v30 = vsub.f32 %v6461_v20, %v6656_v12  ;;  %v6672_v52 = vsub.f32 %v6473_v7, %v6656_v12  ;;  %v6676_v54 = vsub.f32 %v6468_v11, %v6656_v12  ;;  %v6680_v18 = vsub.f32 %v6478_v50, %v6656_v12  ;;  %3900 = vmatprep.subr.bf16.mxu0 %v8210_v14  ;;  %v5437_v50 = vld [vmem:[%s8040_s3 + $0xf8] sm:$0xff]  }
 0x28c   : > { %v6685_v9 = vsub.f32 %v6485_v17, %v6656_v12  ;;  %v6689_v20 = vsub.f32 %v6499_v24, %v6656_v12  ;;  %v6693_v7 = vsub.f32 %v6494_v41, %v6656_v12  ;;  %v6697_v11 = vsub.f32 %v6502_v29, %v6656_v12  ;;  %3730 = vmatpush2.bf16.msra.mxu1 %v5429_v1 }
 0x28d   : > { %v6704_v17 = vsub.f32 %v6511_v47, %v6656_v12  ;;  %v6708_v24 = vsub.f32 %v6523_v60, %v6656_v12  ;;  %v6712_v41 = vsub.f32 %v6518_v39, %v6656_v12  ;;  %v6716_v29 = vsub.f32 %v6528_v33, %v6656_v12  ;;  %3731 = vmatprep.subr.bf16.mxu1 %v8210_v14  ;;  %v5432_v33 = vld [vmem:[%s8040_s3 + $0x58] sm:$0xff]  }
 0x28e   : > { %v6721_v43 = vsub.f32 %v6540_v8, %v6656_v12  ;;  %v6725_v47 = vsub.f32 %v6556_v45, %v6656_v12  ;;  %v6729_v60 = vsub.f32 %v6551_v53, %v6656_v12  ;;  %v6733_v39 = vsub.f32 %v6561_v35, %v6656_v12  ;;  %3901 = vmatpush2.bf16.msra.mxu0 %v5437_v50  ;;  %v5442_v50 = vld [vmem:[%s8040_s3 + $0x40] sm:$0xff]  }
 0x28f   : > { %v6740_v8 = vsub.f32 %v6572_v23, %v6656_v12  ;;  %v6744_v45 = vsub.f32 %v6593_v46, %v6656_v12  ;;  %v6748_v53 = vsub.f32 %v6588_v3, %v6656_v12  ;;  %v6752_v35 = vsub.f32 %v6600_v4, %v6656_v12  ;;  %3902 = vmatprep.subr.bf16.mxu0 %v8210_v14  ;;  %v5438_v23 = vld [vmem:[%s8040_s3 + $0xf0] sm:$0xff]   ;;  %v5440_v3 = vld [vmem:[%s8040_s3 + $0xe8] sm:$0xff]  }
 0x290   : > { %3732 = vmatpush2.bf16.msra.mxu1 %v5432_v33  ;;  %v5436_v46 = vld [vmem:[%s8040_s3 + $0x50] sm:$0xff]   ;;  %v6769_v4 = vsub.f32 %v6363_v0, %v6656_v12  ;;  %v6773_v6 = vsub.f32 %v6369_v51, %v6656_v12  ;;  %v6785_v0 = vsub.f32 %v6366_v38, %v6656_v12  ;;  %v6797_v33 = vsub.f32 %v6376_v27, %v6656_v12  ;;  %v5443_v38 = vld [vmem:[%s8040_s3 + $0xd8] sm:$0xff]   ;;  %v2945_v27 = vld [vmem:[#allocation2 + $0x1] sm:$0xff] }
 0x291   : > { %3733 = vmatprep.subr.bf16.mxu1 %v8210_v14 }
 0x292   : > { %3903 = vmatpush2.bf16.msra.mxu0 %v5438_v23  ;;  %8247 = vst [vmem:[#allocation75_spill] sm:$0xff] %v6769_v4  ;;  %8248 = vst [vmem:[#allocation76_spill] sm:$0xff] %v6773_v6  ;;  %v2487_v51 = vmul.f32 %v6769_v4, %v6769_v4  ;;  %v2488_v1 = vmul.f32 %v6773_v6, %v6773_v6  ;;  %v6804_v23 = vsub.f32 %v6385_v28, %v6656_v12 }
 0x293   : > { %3904 = vmatprep.subr.bf16.mxu0 %v8210_v14  ;;  %8249 = vst [vmem:[#allocation77_spill] sm:$0xff] %v6785_v0  ;;  %8250 = vst [vmem:[#allocation78_spill] sm:$0xff] %v6797_v33  ;;  %v6814_v4 = vsub.f32 %v6397_v61, %v6656_v12  ;;  %v2490_v28 = vmul.f32 %v6797_v33, %v6797_v33  ;;  %v5527_v61 = vld [vmem:[#allocation2] sm:$0xff]  ;;  %v5445_v33 = vld [vmem:[%s8040_s3 + $0xc8] sm:$0xff]  }
 0x294   : > { %3734 = vmatpush2.bf16.msra.mxu1 %v5436_v46  ;;  %v2489_v46 = vmul.f32 %v6785_v0, %v6785_v0  ;;  %v5444_v0 = vld [vmem:[%s8040_s3 + $0xd0] sm:$0xff]   ;;  %v2927_v56 = vpack.c.bf16 %v5527_v61, %v5527_v61 }
 0x295   : > { %3735 = vmatprep.subr.bf16.mxu1 %v8210_v14 }
 0x296   : > { %3905 = vmatpush2.bf16.msra.mxu0 %v5440_v3  ;;  %v8251_v3 = vld [vmem:[#allocation39_spill] sm:$0xff] }
 0x297   : > { %3906 = vmatprep.subr.bf16.mxu0 %v8210_v14 }
 0x298   : > { %3736 = vmatpush2.bf16.msra.mxu1 %v5439_v55  ;;  %v2523_v55 = vmul.f32 %v2487_v51, %v8251_v3  ;;  %v6823_v51 = vsub.f32 %v6392_v25, %v6656_v12  ;;  %v6837_v25 = vsub.f32 %v6402_v63, %v6656_v12  ;;  %v5447_v63 = vld [vmem:[%s8040_s3 + $0xc0] sm:$0xff]  }
 0x299   : > { %3737 = vmatprep.subr.bf16.mxu1 %v8210_v14 }
 0x29a   : > { %3907 = vmatpush2.bf16.msra.mxu0 %v5441_v13  ;;  %v8252_v13 = vld [vmem:[#allocation41_spill] sm:$0xff] }
 0x29b   : > { %3908 = vmatprep.subr.bf16.mxu0 %v8210_v14  ;;  %v2524_v6 = vmul.f32 %v2488_v1, %v8252_v13  ;;  %v2491_v1 = vmul.f32 %v6804_v23, %v6804_v23 }
 0x29c   : > { %3738 = vmatpush2.bf16.msra.mxu1 %v5442_v50  ;;  %v2946_v50 = vld [vmem:[#allocation2 + $0x9] sm:$0xff] }
 0x29d   : > { %4061 = vmatprep.subr.bf16.mxu1 %v8210_v14  ;;  %v2559_v13 = vadd.f32 %v2524_v6, %v2523_v55  ;;  %v2981_v3 = vpack.c.bf16 %v2946_v50, %v2945_v27  ;;  %v2492_v6 = vmul.f32 %v6814_v4, %v6814_v4  ;;  %v6844_v27 = vsub.f32 %v6409_v26, %v6656_v12  ;;  %v5448_v26 = vld [vmem:[%s8040_s3 + $0x130] sm:$0xff]  }
 0x29e   : > { %3909 = vmatpush2.bf16.msra.mxu0 %v5443_v38  ;;  %v2525_v38 = vmul.f32 %v2489_v46, %v6320_v31  ;;  %v8253_v46 = vld [vmem:[#allocation42_spill] sm:$0xff]  ;;  %v2493_v50 = vmul.f32 %v6823_v51, %v6823_v51  ;;  %v2527_v61 = vmul.f32 %v2491_v1, %v6334_v2 }
 0x29f   : > { %3910 = vmatprep.subr.bf16.mxu0 %v8210_v14  ;;  %v2526_v55 = vmul.f32 %v2490_v28, %v8253_v46  ;;  %3739 = vmatprep.mubr.bf16.mxu1 %v2981_v3  ;;  %v6866_v28 = vsub.f32 %v6418_v57, %v6656_v12  ;;  %v2495_v1 = vmul.f32 %v6844_v27, %v6844_v27  ;;  %v8256_v57 = vld [vmem:[#allocation46_spill] sm:$0xff] }
 0x2a0   : > { %3740 = vmatmul.mubr.bf16.vlgmr.msra.gmra.mxu1 %v2927_v56  ;;  %v6859_v56 = vsub.f32 %v6423_v32, %v6656_v12  ;;  %v6875_v32 = vsub.f32 %v6426_v10, %v6656_v12  ;;  %v5449_v10 = vld [vmem:[%s8040_s3 + $0x128] sm:$0xff]  }
 0x2a1   : > { %4062 = vmatpush1.bf16.msra.mxu1 %v5446_v48  ;;  %v8254_v48 = vld [vmem:[#allocation44_spill] sm:$0xff] }
 0x2a2   : > { %3911 = vmatpush2.bf16.msra.mxu0 %v5444_v0  ;;  %v2560_v0 = vadd.f32 %v2559_v13, %v2525_v38  ;;  %4063 = vmatprep.subr.bf16.mxu1 %v8210_v14  ;;  %v2528_v3 = vmul.f32 %v2492_v6, %v8254_v48  ;;  %v8255_v38 = vld [vmem:[#allocation45_spill] sm:$0xff] }
 0x2a3   : > { %3912 = vmatprep.subr.bf16.mxu0 %v8210_v14 }
 0x2a4   : > { %v2561_v31 = vadd.f32 %v2560_v0, %v2526_v55  ;;  %v2529_v55 = vmul.f32 %v2493_v50, %v8255_v38  ;;  %v6882_v50 = vsub.f32 %v6435_v49, %v6656_v12 }
 0x2a5   : > { %4064 = vmatpush1.bf16.msra.mxu1 %v5448_v26  ;;  %v2531_v26 = vmul.f32 %v2495_v1, %v6351_v19 }
 0x2a6   : > { %3913 = vmatpush2.bf16.msra.mxu0 %v5445_v33  ;;  %v2494_v33 = vmul.f32 %v6837_v25, %v6837_v25  ;;  %v2562_v13 = vadd.f32 %v2561_v31, %v2527_v61  ;;  %4065 = vmatprep.subr.bf16.mxu1 %v8210_v14  ;;  %v2496_v31 = vmul.f32 %v6859_v56, %v6859_v56 }
 0x2a7   : > { %3914 = vmatprep.subr.bf16.mxu0 %v8210_v14  ;;  %v2499_v1 = vmul.f32 %v6882_v50, %v6882_v50 }
 0x2a8   : > { %v2563_v0 = vadd.f32 %v2562_v13, %v2528_v3  ;;  %v2530_v6 = vmul.f32 %v2494_v33, %v8256_v57  ;;  %v6892_v13 = vsub.f32 %v6447_v59, %v6656_v12  ;;  %v2498_v33 = vmul.f32 %v6875_v32, %v6875_v32 }
 0x2a9   : > { %4066 = vmatpush1.bf16.msra.mxu1 %v5449_v10  ;;  %v6899_v57 = vsub.f32 %v6442_v40, %v6656_v12  ;;  %v6907_v59 = vsub.f32 %v6452_v37, %v6656_v12  ;;  %v8259_v10 = vld [vmem:[#allocation51_spill] sm:$0xff]  ;;  %v8260_v12 = vld [vmem:[#allocation52_spill] sm:$0xff] }
 0x2aa   : > { %3915 = vmatpush2.bf16.msra.mxu0 %v5447_v63  ;;  %v2564_v61 = vadd.f32 %v2563_v0, %v2529_v55  ;;  %v2497_v63 = vmul.f32 %v6866_v28, %v6866_v28  ;;  %v8257_v55 = vld [vmem:[#allocation48_spill] sm:$0xff]  ;;  %4067 = vmatprep.subr.bf16.mxu1 %v8210_v14 }
 0x2ab   : > { %4238 = vmatprep.subr.bf16.mxu0 %v8210_v14  ;;  %v2532_v49 = vmul.f32 %v2496_v31, %v8257_v55  ;;  %v2500_v31 = vmul.f32 %v6892_v13, %v6892_v13  ;;  %v2501_v40 = vmul.f32 %v6899_v57, %v6899_v57  ;;  %v2535_v55 = vmul.f32 %v2499_v1, %v8259_v10 }
 0x2ac   : > { %v2565_v3 = vadd.f32 %v2564_v61, %v2530_v6  ;;  %v8258_v6 = vld [vmem:[#allocation49_spill] sm:$0xff]  ;;  %v2502_v37 = vmul.f32 %v6907_v59, %v6907_v59  ;;  %v2504_v1 = vmul.f32 %v6672_v52, %v6672_v52 }
 0x2ad   : > { %v2533_v61 = vmul.f32 %v2497_v63, %v8258_v6  ;;  %v5450_v63 = vld [vmem:[%s8040_s3 + $0x120] sm:$0xff]  }
 0x2ae   : > { %v2566_v0 = vadd.f32 %v2565_v3, %v2531_v26  ;;  %v2534_v26 = vmul.f32 %v2498_v33, %v6360_v44  ;;  %4068 = vmatpush1.bf16.msra.mxu1 %v5450_v63  ;;  %v2537_v33 = vmul.f32 %v2501_v40, %v6389_v21  ;;  %v2505_v44 = vmul.f32 %v6676_v54, %v6676_v54  ;;  %v8262_v63 = vld [vmem:[#allocation56_spill] sm:$0xff] }
 0x2af   : > { %4069 = vmatprep.subr.bf16.mxu1 %v8210_v14  ;;  %v2506_v40 = vmul.f32 %v6680_v18, %v6680_v18  ;;  %v2509_v21 = vmul.f32 %v6693_v7, %v6693_v7 }
 0x2b0   : > { %v2567_v19 = vadd.f32 %v2566_v0, %v2532_v49  ;;  %v2536_v49 = vmul.f32 %v2500_v31, %v8260_v12  ;;  %v5451_v31 = vld [vmem:[%s8040_s3 + $0x118] sm:$0xff]  }
 0x2b2   : > { %v2568_v3 = vadd.f32 %v2567_v19, %v2533_v61  ;;  %v2503_v19 = vmul.f32 %v6668_v30, %v6668_v30  ;;  %4070 = vmatpush1.bf16.msra.mxu1 %v5451_v31  ;;  %v8265_v31 = vld [vmem:[#allocation60_spill] sm:$0xff] }
 0x2b3   : > { %4071 = vmatprep.subr.bf16.mxu1 %v8210_v14 }
 0x2b4   : > { %v2569_v38 = vadd.f32 %v2568_v3, %v2534_v26  ;;  %v8261_v26 = vld [vmem:[#allocation54_spill] sm:$0xff] }
 0x2b5   : > { %v2538_v3 = vmul.f32 %v2502_v37, %v8261_v26  ;;  %v2507_v37 = vmul.f32 %v6685_v9, %v6685_v9 }
 0x2b6   : > { %v2570_v0 = vadd.f32 %v2569_v38, %v2535_v55  ;;  %v2539_v38 = vmul.f32 %v2503_v19, %v6411_v36  ;;  %v8264_v19 = vld [vmem:[#allocation58_spill] sm:$0xff] }
 0x2b8   : > { %v2571_v61 = vadd.f32 %v2570_v0, %v2536_v49  ;;  %v2540_v49 = vmul.f32 %v2504_v1, %v8262_v63  ;;  %v2543_v1 = vmul.f32 %v2507_v37, %v6449_v58  ;;  %v2513_v58 = vmul.f32 %v6712_v41, %v6712_v41 }
 0x2ba   : > { %v2572_v10 = vadd.f32 %v2571_v61, %v2537_v33  ;;  %v8263_v33 = vld [vmem:[#allocation57_spill] sm:$0xff] }
 0x2bb   : > { %v2541_v61 = vmul.f32 %v2505_v44, %v8263_v33  ;;  %v2510_v44 = vmul.f32 %v6697_v11, %v6697_v11 }
 0x2bc   : > { %v2573_v55 = vadd.f32 %v2572_v10, %v2538_v3  ;;  %v2508_v10 = vmul.f32 %v6689_v20, %v6689_v20  ;;  %v2542_v3 = vmul.f32 %v2506_v40, %v8264_v19  ;;  %v8266_v40 = vld [vmem:[#allocation61_spill] sm:$0xff] }
 0x2bd   : > { %v2546_v37 = vmul.f32 %v2510_v44, %v6475_v5  ;;  %v8268_v44 = vld [vmem:[#allocation65_spill] sm:$0xff] }
 0x2be   : > { %v2574_v0 = vadd.f32 %v2573_v55, %v2539_v38  ;;  %v5452_v55 = vld [vmem:[%s8040_s3 + $0x110] sm:$0xff]  }
 0x2bf   : > { %4072 = vmatpush1.bf16.msra.mxu1 %v5452_v55  ;;  %v8267_v55 = vld [vmem:[#allocation64_spill] sm:$0xff] }
 0x2c0   : > { %v2575_v26 = vadd.f32 %v2574_v0, %v2540_v49  ;;  %v2544_v49 = vmul.f32 %v2508_v10, %v8265_v31  ;;  %4073 = vmatprep.subr.bf16.mxu1 %v8210_v14 }
 0x2c2   : > { %v2576_v36 = vadd.f32 %v2575_v26, %v2541_v61  ;;  %v2511_v26 = vmul.f32 %v6704_v17, %v6704_v17  ;;  %v2545_v61 = vmul.f32 %v2509_v21, %v8266_v40  ;;  %v2514_v21 = vmul.f32 %v6716_v29, %v6716_v29 }
 0x2c3   : > { %v2517_v40 = vmul.f32 %v6729_v60, %v6729_v60 }
 0x2c4   : > { %v2577_v38 = vadd.f32 %v2576_v36, %v2542_v3  ;;  %v2512_v36 = vmul.f32 %v6708_v24, %v6708_v24  ;;  %v2547_v10 = vmul.f32 %v2511_v26, %v6487_v15  ;;  %v2516_v26 = vmul.f32 %v6725_v47, %v6725_v47 }
 0x2c6   : > { %v2578_v0 = vadd.f32 %v2577_v38, %v2543_v1  ;;  %v5453_v38 = vld [vmem:[%s8040_s3 + $0x108] sm:$0xff]  }
 0x2c7   : > { %4074 = vmatpush1.bf16.msra.mxu1 %v5453_v38 }
 0x2c8   : > { %v2579_v19 = vadd.f32 %v2578_v0, %v2544_v49  ;;  %v2548_v49 = vmul.f32 %v2512_v36, %v8267_v55  ;;  %4075 = vmatprep.subr.bf16.mxu1 %v8210_v14 }
 0x2ca   : > { %v2580_v3 = vadd.f32 %v2579_v19, %v2545_v61  ;;  %v2515_v19 = vmul.f32 %v6721_v43, %v6721_v43  ;;  %v2549_v61 = vmul.f32 %v2513_v58, %v8268_v44  ;;  %v2552_v58 = vmul.f32 %v2516_v26, %v6532_v22  ;;  %v5454_v26 = vld [vmem:[%s8040_s3 + $0x100] sm:$0xff]  }
 0x2cb   : > { %4076 = vmatpush1.bf16.msra.mxu1 %v5454_v26 }
 0x2cc   : > { %v2581_v1 = vadd.f32 %v2580_v3, %v2546_v37  ;;  %v8269_v37 = vld [vmem:[#allocation66_spill] sm:$0xff]  ;;  %v2551_v36 = vmul.f32 %v2515_v19, %v6525_v16  ;;  %4077 = vmatprep.subr.bf16.mxu1 %v8210_v14 }
 0x2cd   : > { %v2550_v3 = vmul.f32 %v2514_v21, %v8269_v37  ;;  %v8270_v21 = vld [vmem:[#allocation70_spill] sm:$0xff] }
 0x2ce   : > { %v2582_v0 = vadd.f32 %v2581_v1, %v2547_v10  ;;  %v2518_v1 = vmul.f32 %v6733_v39, %v6733_v39 }
 0x2d0   : > { %v2583_v5 = vadd.f32 %v2582_v0, %v2548_v49  ;;  %v2519_v49 = vmul.f32 %v6740_v8, %v6740_v8  ;;  %v2553_v0 = vmul.f32 %v2517_v40, %v6545_v34  ;;  %v2522_v40 = vmul.f32 %v6752_v35, %v6752_v35 }
 0x2d2   : > { %v2584_v15 = vadd.f32 %v2583_v5, %v2549_v61  ;;  %v2520_v5 = vmul.f32 %v6744_v45, %v6744_v45  ;;  %v2554_v61 = vmul.f32 %v2518_v1, %v8270_v21  ;;  %v2555_v19 = vmul.f32 %v2519_v49, %v6574_v42 }
 0x2d4   : > { %v2585_v10 = vadd.f32 %v2584_v15, %v2550_v3  ;;  %v2521_v15 = vmul.f32 %v6748_v53, %v6748_v53 }
 0x2d6   : > { %v2586_v38 = vadd.f32 %v2585_v10, %v2551_v36  ;;  %v2556_v36 = vmul.f32 %v2520_v5, %v6582_v62 }
 0x2d8   : > { %v2587_v44 = vadd.f32 %v2586_v38, %v2552_v58  ;;  %v8272_v38 = vld [vmem:[#allocation74_spill] sm:$0xff] }
 0x2da   : > { %v2588_v37 = vadd.f32 %v2587_v44, %v2553_v0  ;;  %v8271_v44 = vld [vmem:[#allocation73_spill] sm:$0xff]  ;;  %v2558_v0 = vmul.f32 %v2522_v40, %v8272_v38 }
 0x2db   : > { %v2557_v1 = vmul.f32 %v2521_v15, %v8271_v44  ;;  %v5457_v15 = vld [vmem:[%s8040_s3 + $0x170] sm:$0xff]  }
 0x2dc   : > { %v2589_v3 = vadd.f32 %v2588_v37, %v2554_v61  ;;  %v5455_v61 = vld [vmem:[%s8040_s3 + $0x178] sm:$0xff]  }
 0x2dd   : > { %4078 = vmatpush2.bf16.msra.mxu1 %v5455_v61  ;;  %v8275_v61 = vld [vmem:[#allocation77_spill] sm:$0xff] }
 0x2de   : > { %v2590_v10 = vadd.f32 %v2589_v3, %v2555_v19  ;;  %4079 = vmatprep.subr.bf16.mxu1 %v8210_v14 }
 0x2e0   : > { %v2591_v58 = vadd.f32 %v2590_v10, %v2556_v36  ;;  %v5459_v10 = vld [vmem:[%s8040_s3 + $0x168] sm:$0xff]  }
 0x2e1   : > { %4080 = vmatpush2.bf16.msra.mxu1 %v5457_v15 }
 0x2e2   : > { %v2592_v49 = vadd.f32 %v2591_v58, %v2557_v1  ;;  %4081 = vmatprep.subr.bf16.mxu1 %v8210_v14  ;;  %v8273_v58 = vld [vmem:[#allocation75_spill] sm:$0xff] }
 0x2e4   : > { %v2593_v37 = vadd.f32 %v2592_v49, %v2558_v0  ;;  %v8274_v49 = vld [vmem:[#allocation76_spill] sm:$0xff] }
 0x2e5   : > { %4082 = vmatpush2.bf16.msra.mxu1 %v5459_v10 }
 0x2e6   : > { %v2594_v42 = vrot.slane %v2593_v37, 4  ;;  %4083 = vmatprep.subr.bf16.mxu1 %v8210_v14 }
 0x2e8   : > { %v2595_v21 = vadd.f32 %v2594_v42, %v2593_v37  ;;  %v5461_v42 = vld [vmem:[%s8040_s3 + $0x160] sm:$0xff]  }
 0x2e9   : > { %4084 = vmatpush2.bf16.msra.mxu1 %v5461_v42 }
 0x2ea   : > { %v2596_v5 = vrot.slane %v2595_v21, 2  ;;  %4085 = vmatprep.subr.bf16.mxu1 %v8210_v14 }
 0x2ec   : > { %v2597_v19 = vadd.f32 %v2596_v5, %v2595_v21 }
 0x2ee   : > { %v2598_v3 = vrot.slane %v2597_v19, 1 }
 0x2f0   : > { %v2599_v26 = vadd.f32 %v2598_v3, %v2597_v19  ;;  %v8276_v19 = vld [vmem:[#allocation78_spill] sm:$0xff] }
 0x2f2   : > { %v2600_v40 = vmul.f32 0.00390625, %v2599_v26 }
 0x2f4   : > { %v2601_v36 = vadd.f32 1e-05, %v2600_v40  ;;  %v5464_v40 = vld [vmem:[%s8040_s3 + $0x158] sm:$0xff]  }
 0x2f5   : > { %4086 = vmatpush2.bf16.msra.mxu1 %v5464_v40 }
 0x2f6   : > { %5487 = vrsqrt.f32 %v2601_v36  ;;  %4087 = vmatprep.subr.bf16.mxu1 %v8210_v14 }
 0x303   : > { %v5488_v21 = vpop.eup %5487 }
 0x304   : > { %v2636_v1 = vmul.f32 %v5488_v21, %v6744_v45  ;;  %v7018_v0 = vmul.f32 %v5488_v21, %v8273_v58  ;;  %v7021_v37 = vmul.f32 %v5488_v21, %v8274_v49  ;;  %v7024_v5 = vmul.f32 %v5488_v21, %v8275_v61 }
 0x305   : > { %v7027_v15 = vmul.f32 %v5488_v21, %v8276_v19  ;;  %v7030_v3 = vmul.f32 %v5488_v21, %v6804_v23  ;;  %v7033_v26 = vmul.f32 %v5488_v21, %v6814_v4  ;;  %v7036_v45 = vmul.f32 %v5488_v21, %v6823_v51 }
 0x306   : > { %v2672_v36 = vmax.f32 %v2636_v1, 0.0  ;;  %v7042_v10 = vmul.f32 %v5488_v21, %v6837_v25  ;;  %v7045_v42 = vmul.f32 %v5488_v21, %v6844_v27  ;;  %v7048_v23 = vmul.f32 %v5488_v21, %v6859_v56 }
 0x307   : > { %v7051_v4 = vmul.f32 %v5488_v21, %v6866_v28  ;;  %v7054_v51 = vmul.f32 %v5488_v21, %v6875_v32  ;;  %v7057_v58 = vmul.f32 %v5488_v21, %v6882_v50  ;;  %v7060_v1 = vmul.f32 %v5488_v21, %v6892_v13 }
 0x308   : > { %v2708_v25 = vmul.f32 %v2672_v36, %v6582_v62  ;;  %v7064_v27 = vmul.f32 %v5488_v21, %v6899_v57  ;;  %v7067_v56 = vmul.f32 %v5488_v21, %v6907_v59  ;;  %v7070_v28 = vmul.f32 %v5488_v21, %v6668_v30  ;;  %v8282_v62 = vld [vmem:[#allocation46_spill] sm:$0xff] }
 0x309   : > { %v7074_v32 = vmul.f32 %v5488_v21, %v6672_v52  ;;  %v7077_v50 = vmul.f32 %v5488_v21, %v6676_v54  ;;  %v7080_v13 = vmul.f32 %v5488_v21, %v6680_v18  ;;  %v7083_v57 = vmul.f32 %v5488_v21, %v6685_v9 }
 0x30a   : > { %v7086_v59 = vmul.f32 %v5488_v21, %v6689_v20  ;;  %v7089_v30 = vmul.f32 %v5488_v21, %v6693_v7  ;;  %v7092_v49 = vmul.f32 %v5488_v21, %v6697_v11  ;;  %v7095_v52 = vmul.f32 %v5488_v21, %v6704_v17  ;;  %2744 = vst [vmem:[#allocation2 + $0x11b] sm:$0xff] %v2708_v25 }
 0x30b   : > { %v7098_v54 = vmul.f32 %v5488_v21, %v6708_v24  ;;  %v7101_v18 = vmul.f32 %v5488_v21, %v6712_v41  ;;  %v7104_v9 = vmul.f32 %v5488_v21, %v6716_v29  ;;  %v7107_v20 = vmul.f32 %v5488_v21, %v6721_v43 }
 0x30c   : > { %v7110_v7 = vmul.f32 %v5488_v21, %v6725_v47  ;;  %v7113_v11 = vmul.f32 %v5488_v21, %v6729_v60  ;;  %v7116_v17 = vmul.f32 %v5488_v21, %v6733_v39  ;;  %v7119_v24 = vmul.f32 %v5488_v21, %v6740_v8  ;;  %v5468_v60 = vld [vmem:[%s8040_s3 + $0x150] sm:$0xff]  }
 0x30d   : > { %v7122_v41 = vmul.f32 %v5488_v21, %v6748_v53  ;;  %v7125_v29 = vmul.f32 %v5488_v21, %v6752_v35  ;;  %v2639_v43 = vmax.f32 %v7018_v0, 0.0  ;;  %v2640_v47 = vmax.f32 %v7021_v37, 0.0  ;;  %4088 = vmatpush2.bf16.msra.mxu1 %v5468_v60  ;;  %v8280_v60 = vld [vmem:[#allocation40_spill] sm:$0xff] }
 0x30e   : > { %v2641_v39 = vmax.f32 %v7024_v5, 0.0  ;;  %v2642_v61 = vmax.f32 %v7027_v15, 0.0  ;;  %v2643_v8 = vmax.f32 %v7030_v3, 0.0  ;;  %v2644_v53 = vmax.f32 %v7033_v26, 0.0  ;;  %4089 = vmatprep.subr.bf16.mxu1 %v8210_v14 }
 0x30f   : > { %8277 = vst [vmem:[#allocation75_spill] sm:$0xff] %v7125_v29  ;;  %v2645_v19 = vmax.f32 %v7036_v45, 0.0  ;;  %v2646_v35 = vmax.f32 %v7042_v10, 0.0  ;;  %v2647_v21 = vmax.f32 %v7045_v42, 0.0  ;;  %v2648_v0 = vmax.f32 %v7048_v23, 0.0  ;;  %v8283_v29 = vld [vmem:[#allocation47_spill] sm:$0xff] }
 0x310   : > { %v2649_v37 = vmax.f32 %v7051_v4, 0.0  ;;  %v2650_v40 = vmax.f32 %v7054_v51, 0.0  ;;  %v2651_v5 = vmax.f32 %v7057_v58, 0.0  ;;  %v2652_v15 = vmax.f32 %v7060_v1, 0.0 }
 0x311   : > { %v2653_v3 = vmax.f32 %v7064_v27, 0.0  ;;  %v2654_v26 = vmax.f32 %v7067_v56, 0.0  ;;  %v2655_v45 = vmax.f32 %v7070_v28, 0.0  ;;  %v2656_v36 = vmax.f32 %v7074_v32, 0.0 }
 0x312   : > { %v2657_v10 = vmax.f32 %v7077_v50, 0.0  ;;  %v2658_v42 = vmax.f32 %v7080_v13, 0.0  ;;  %v2659_v23 = vmax.f32 %v7083_v57, 0.0  ;;  %v2660_v4 = vmax.f32 %v7086_v59, 0.0  ;;  %v8281_v13 = vld [vmem:[#allocation45_spill] sm:$0xff] }
 0x313   : > { %v2661_v51 = vmax.f32 %v7089_v30, 0.0  ;;  %v2662_v58 = vmax.f32 %v7092_v49, 0.0  ;;  %v2663_v1 = vmax.f32 %v7095_v52, 0.0  ;;  %v2664_v25 = vmax.f32 %v7098_v54, 0.0  ;;  %v8278_v49 = vld [vmem:[#allocation39_spill] sm:$0xff]  ;;  %v8279_v54 = vld [vmem:[#allocation41_spill] sm:$0xff] }
 0x314   : > { %v2665_v27 = vmax.f32 %v7101_v18, 0.0  ;;  %v2666_v56 = vmax.f32 %v7104_v9, 0.0  ;;  %v2667_v28 = vmax.f32 %v7107_v20, 0.0  ;;  %v2668_v32 = vmax.f32 %v7110_v7, 0.0  ;;  %v5471_v20 = vld [vmem:[%s8040_s3 + $0x148] sm:$0xff]  }
 0x315   : > { %v2669_v50 = vmax.f32 %v7113_v11, 0.0  ;;  %v2675_v52 = vmul.f32 %v2639_v43, %v8278_v49  ;;  %v2676_v18 = vmul.f32 %v2640_v47, %v8279_v54  ;;  %v2677_v9 = vmul.f32 %v2641_v39, %v8280_v60  ;;  %v8284_v49 = vld [vmem:[#allocation48_spill] sm:$0xff]  ;;  %4090 = vmatpush2.bf16.msra.mxu1 %v5471_v20  ;;  %v8285_v60 = vld [vmem:[#allocation50_spill] sm:$0xff]  ;;  %v8295_v20 = vld [vmem:[#allocation65_spill] sm:$0xff] }
 0x316   : > { %v2678_v7 = vmul.f32 %v2642_v61, %v8253_v46  ;;  %v2679_v11 = vmul.f32 %v2643_v8, %v6334_v2  ;;  %v2680_v57 = vmul.f32 %v2644_v53, %v8254_v48  ;;  %v2681_v59 = vmul.f32 %v2645_v19, %v8281_v13  ;;  %v8286_v46 = vld [vmem:[#allocation51_spill] sm:$0xff]  ;;  %v8287_v48 = vld [vmem:[#allocation53_spill] sm:$0xff]  ;;  %4091 = vmatprep.subr.bf16.mxu1 %v8210_v14 }
 0x317   : > { %v2682_v30 = vmul.f32 %v2646_v35, %v8282_v62  ;;  %v2683_v43 = vmul.f32 %v2647_v21, %v8283_v29  ;;  %v2684_v47 = vmul.f32 %v2648_v0, %v8284_v49  ;;  %v2685_v39 = vmul.f32 %v2649_v37, %v8258_v6  ;;  %2711 = vst [vmem:[#allocation2 + $0x13] sm:$0xff] %v2675_v52  ;;  %v8288_v35 = vld [vmem:[#allocation54_spill] sm:$0xff]  ;;  %v8289_v0 = vld [vmem:[#allocation55_spill] sm:$0xff] }
 0x318   : > { %2712 = vst [vmem:[#allocation2 + $0x1b] sm:$0xff] %v2676_v18  ;;  %2713 = vst [vmem:[#allocation2 + $0x23] sm:$0xff] %v2677_v9  ;;  %v2686_v61 = vmul.f32 %v2650_v40, %v8285_v60  ;;  %v2687_v8 = vmul.f32 %v2651_v5, %v8286_v46  ;;  %v2688_v53 = vmul.f32 %v2652_v15, %v8260_v12  ;;  %v8290_v5 = vld [vmem:[#allocation58_spill] sm:$0xff] }
 0x319   : > { %v2689_v19 = vmul.f32 %v2653_v3, %v8287_v48  ;;  %2714 = vst [vmem:[#allocation2 + $0x2b] sm:$0xff] %v2678_v7  ;;  %2715 = vst [vmem:[#allocation2 + $0x33] sm:$0xff] %v2679_v11  ;;  %v2690_v21 = vmul.f32 %v2654_v26, %v8288_v35  ;;  %v2691_v37 = vmul.f32 %v2655_v45, %v8289_v0  ;;  %v8291_v3 = vld [vmem:[#allocation59_spill] sm:$0xff]  ;;  %v8293_v26 = vld [vmem:[#allocation62_spill] sm:$0xff] }
 0x31a   : > { %2716 = vst [vmem:[#allocation2 + $0x3b] sm:$0xff] %v2680_v57  ;;  %2717 = vst [vmem:[#allocation2 + $0x43] sm:$0xff] %v2681_v59  ;;  %v2692_v52 = vmul.f32 %v2656_v36, %v8262_v63  ;;  %v2693_v40 = vmul.f32 %v2657_v10, %v8263_v33  ;;  %v2694_v15 = vmul.f32 %v2658_v42, %v8290_v5  ;;  %v8292_v59 = vld [vmem:[#allocation61_spill] sm:$0xff]  ;;  %v8294_v36 = vld [vmem:[#allocation63_spill] sm:$0xff] }
 0x31b   : > { %2718 = vst [vmem:[#allocation2 + $0x4b] sm:$0xff] %v2682_v30  ;;  %2719 = vst [vmem:[#allocation2 + $0x53] sm:$0xff] %v2683_v43  ;;  %v2695_v18 = vmul.f32 %v2659_v23, %v8291_v3  ;;  %v2696_v57 = vmul.f32 %v2660_v4, %v8265_v31  ;;  %v2697_v9 = vmul.f32 %v2661_v51, %v8292_v59  ;;  %v8296_v42 = vld [vmem:[#allocation66_spill] sm:$0xff] }
 0x31c   : > { %2720 = vst [vmem:[#allocation2 + $0x5b] sm:$0xff] %v2684_v47  ;;  %2721 = vst [vmem:[#allocation2 + $0x63] sm:$0xff] %v2685_v39  ;;  %v2698_v45 = vmul.f32 %v2662_v58, %v8293_v26  ;;  %v2699_v10 = vmul.f32 %v2663_v1, %v8294_v36  ;;  %v2700_v30 = vmul.f32 %v2664_v25, %v8267_v55  ;;  %v2999_v58 = vld [vmem:[#allocation2 + $0x2] sm:$0xff]  ;;  %v3000_v1 = vld [vmem:[#allocation2 + $0xa] sm:$0xff]  ;;  %v8300_v39 = vmax.f32 %v7119_v24, 0.0 }
 0x31d   : > { %2722 = vst [vmem:[#allocation2 + $0x6b] sm:$0xff] %v2686_v61  ;;  %2723 = vst [vmem:[#allocation2 + $0x73] sm:$0xff] %v2687_v8  ;;  %v2701_v7 = vmul.f32 %v2665_v27, %v8295_v20  ;;  %v2702_v23 = vmul.f32 %v2666_v56, %v8296_v42  ;;  %v2703_v4 = vmul.f32 %v2667_v28, %v6525_v16  ;;  %v8297_v25 = vld [vmem:[#allocation70_spill] sm:$0xff]  ;;  %v8298_v27 = vmax.f32 %v7116_v17, 0.0  ;;  %v8299_v47 = vld [vmem:[#allocation71_spill] sm:$0xff] }
 0x31e   : > { %2724 = vst [vmem:[#allocation2 + $0x7b] sm:$0xff] %v2688_v53  ;;  %2725 = vst [vmem:[#allocation2 + $0x83] sm:$0xff] %v2689_v19  ;;  %v2704_v51 = vmul.f32 %v2668_v32, %v6532_v22  ;;  %v2705_v11 = vmul.f32 %v2669_v50, %v6545_v34  ;;  %v2707_v56 = vmul.f32 %v8300_v39, %v8299_v47  ;;  %v8301_v28 = vmax.f32 %v7122_v41, 0.0  ;;  %v8302_v50 = vld [vmem:[#allocation75_spill] sm:$0xff]  ;;  %v2947_v17 = vld [vmem:[#allocation2 + $0x11] sm:$0xff] }
 0x31f   : > { %2726 = vst [vmem:[#allocation2 + $0x8b] sm:$0xff] %v2690_v21  ;;  %2727 = vst [vmem:[#allocation2 + $0x93] sm:$0xff] %v2691_v37  ;;  %v2706_v43 = vmul.f32 %v8298_v27, %v8297_v25  ;;  %v8303_v61 = vmax.f32 %v8302_v50, 0.0  ;;  %v2948_v53 = vld [vmem:[#allocation2 + $0x19] sm:$0xff]  ;;  %v2893_v37 = vld [vmem:[#allocation2 + $0x10] sm:$0xff] }
 0x320   : > { %2728 = vst [vmem:[#allocation2 + $0x9b] sm:$0xff] %v2692_v52  ;;  %2729 = vst [vmem:[#allocation2 + $0xa3] sm:$0xff] %v2693_v40  ;;  %v2709_v32 = vmul.f32 %v8301_v28, %v8271_v44  ;;  %v3001_v24 = vld [vmem:[#allocation2 + $0x12] sm:$0xff]  ;;  %v2982_v19 = vpack.c.bf16 %v2948_v53, %v2947_v17  ;;  %v3002_v21 = vld [vmem:[#allocation2 + $0x1a] sm:$0xff]  ;;  %v3035_v40 = vpack.c.bf16 %v3000_v1, %v2999_v58 }
 0x321   : > { %2730 = vst [vmem:[#allocation2 + $0xab] sm:$0xff] %v2694_v15  ;;  %2731 = vst [vmem:[#allocation2 + $0xb3] sm:$0xff] %v2695_v18  ;;  %v2710_v8 = vmul.f32 %v8303_v61, %v8272_v38  ;;  %v5456_v41 = vld [vmem:[%s8040_s3 + $0x1b8] sm:$0xff]   ;;  %v3036_v15 = vpack.c.bf16 %v3002_v21, %v3001_v24  ;;  %v5460_v39 = vld [vmem:[%s8040_s3 + $0x1a8] sm:$0xff]  }
 0x322   : > { %2732 = vst [vmem:[#allocation2 + $0xbb] sm:$0xff] %v2696_v57  ;;  %2733 = vst [vmem:[#allocation2 + $0xc3] sm:$0xff] %v2697_v9  ;;  %v2894_v52 = vld [vmem:[#allocation2 + $0x18] sm:$0xff]  ;;  %v2949_v57 = vld [vmem:[#allocation2 + $0x21] sm:$0xff]  ;;  %3747 = vmatprep.mubr.bf16.mxu1 %v2982_v19 }
 0x323   : > { %2734 = vst [vmem:[#allocation2 + $0xcb] sm:$0xff] %v2698_v45  ;;  %2735 = vst [vmem:[#allocation2 + $0xd3] sm:$0xff] %v2699_v10  ;;  %v2928_v18 = vpack.c.bf16 %v2894_v52, %v2893_v37  ;;  %v2950_v9 = vld [vmem:[#allocation2 + $0x29] sm:$0xff]  ;;  %3916 = vmatprep.mubr.bf16.mxu0 %v3036_v15  ;;  %v2952_v58 = vld [vmem:[#allocation2 + $0x39] sm:$0xff] }
 0x324   : > { %2736 = vst [vmem:[#allocation2 + $0xdb] sm:$0xff] %v2700_v30  ;;  %2737 = vst [vmem:[#allocation2 + $0xe3] sm:$0xff] %v2701_v7  ;;  %v3003_v45 = vld [vmem:[#allocation2 + $0x22] sm:$0xff]  ;;  %v2983_v10 = vpack.c.bf16 %v2950_v9, %v2949_v57  ;;  %v3004_v30 = vld [vmem:[#allocation2 + $0x2a] sm:$0xff]  ;;  %3917 = vmatmul.mubr.bf16.vlgmr.msra.gmra.mxu0 %v3035_v40 }
 0x325   : > { %2738 = vst [vmem:[#allocation2 + $0xeb] sm:$0xff] %v2702_v23  ;;  %2739 = vst [vmem:[#allocation2 + $0xf3] sm:$0xff] %v2703_v4  ;;  %3748 = vmatmul.mubr.bf16.gmra.mxu1 %v2928_v18  ;;  %v3037_v7 = vpack.c.bf16 %v3004_v30, %v3003_v45  ;;  %4239 = vmatpush1.bf16.msra.mxu0 %v5456_v41  ;;  %v5458_v23 = vld [vmem:[%s8040_s3 + $0x1b0] sm:$0xff]   ;;  %v2895_v4 = vld [vmem:[#allocation2 + $0x20] sm:$0xff] }
 0x326   : > { %2740 = vst [vmem:[#allocation2 + $0xfb] sm:$0xff] %v2704_v51  ;;  %2741 = vst [vmem:[#allocation2 + $0x103] sm:$0xff] %v2705_v11  ;;  %3755 = vmatprep.mubr.bf16.mxu1 %v2983_v10  ;;  %v2896_v51 = vld [vmem:[#allocation2 + $0x28] sm:$0xff]  ;;  %4240 = vmatprep.subr.bf16.mxu0 %v8210_v14  ;;  %v2951_v11 = vld [vmem:[#allocation2 + $0x31] sm:$0xff] }
 0x327   : > { %2742 = vst [vmem:[#allocation2 + $0x10b] sm:$0xff] %v2706_v43  ;;  %2743 = vst [vmem:[#allocation2 + $0x113] sm:$0xff] %v2707_v56  ;;  %3924 = vmatprep.mubr.bf16.mxu0 %v3037_v7  ;;  %v3005_v1 = vld [vmem:[#allocation2 + $0x32] sm:$0xff]  ;;  %v3006_v27 = vld [vmem:[#allocation2 + $0x3a] sm:$0xff]  ;;  %v2929_v43 = vpack.c.bf16 %v2896_v51, %v2895_v4  ;;  %v2984_v56 = vpack.c.bf16 %v2952_v58, %v2951_v11 }
 0x328   : > { %2745 = vst [vmem:[#allocation2 + $0x123] sm:$0xff] %v2709_v32  ;;  %2746 = vst [vmem:[#allocation2 + $0x12b] sm:$0xff] %v2710_v8  ;;  %v3038_v28 = vpack.c.bf16 %v3006_v27, %v3005_v1  ;;  %v5462_v32 = vld [vmem:[%s8040_s3 + $0x1a0] sm:$0xff]   ;;  %v2897_v50 = vld [vmem:[#allocation2 + $0x30] sm:$0xff] }
 0x329   : > { %4241 = vmatpush1.bf16.msra.mxu0 %v5458_v23  ;;  %v2898_v61 = vld [vmem:[#allocation2 + $0x38] sm:$0xff]  ;;  %v2953_v8 = vld [vmem:[#allocation2 + $0x41] sm:$0xff]  ;;  %v2954_v17 = vld [vmem:[#allocation2 + $0x49] sm:$0xff] }
 0x32a   : > { %4242 = vmatprep.subr.bf16.mxu0 %v8210_v14  ;;  %v3007_v53 = vld [vmem:[#allocation2 + $0x42] sm:$0xff]  ;;  %v3008_v24 = vld [vmem:[#allocation2 + $0x4a] sm:$0xff]  ;;  %v2930_v41 = vpack.c.bf16 %v2898_v61, %v2897_v50  ;;  %v5463_v19 = vld [vmem:[%s8040_s3 + $0x198] sm:$0xff]   ;;  %v2985_v21 = vpack.c.bf16 %v2954_v17, %v2953_v8 }
 0x32b   : > { %v3039_v37 = vpack.c.bf16 %v3008_v24, %v3007_v53  ;;  %v5465_v52 = vld [vmem:[%s8040_s3 + $0x190] sm:$0xff]   ;;  %v2899_v40 = vld [vmem:[#allocation2 + $0x40] sm:$0xff]  ;;  %v5466_v30 = vld [vmem:[%s8040_s3 + $0x188] sm:$0xff]  }
 0x32c   : > { %3925 = vmatmul.mubr.bf16.gmra.mxu0 %v3036_v15  ;;  %v2900_v15 = vld [vmem:[#allocation2 + $0x48] sm:$0xff]  ;;  %v2955_v18 = vld [vmem:[#allocation2 + $0x51] sm:$0xff]  ;;  %v2956_v57 = vld [vmem:[#allocation2 + $0x59] sm:$0xff] }
 0x32d   : > { %3756 = vmatmul.mubr.bf16.gmra.mxu1 %v2929_v43  ;;  %3932 = vmatprep.mubr.bf16.mxu0 %v3038_v28  ;;  %v3009_v9 = vld [vmem:[#allocation2 + $0x52] sm:$0xff]  ;;  %v3010_v45 = vld [vmem:[#allocation2 + $0x5a] sm:$0xff]  ;;  %v2931_v10 = vpack.c.bf16 %v2900_v15, %v2899_v40  ;;  %v2958_v1 = vld [vmem:[#allocation2 + $0x69] sm:$0xff] }
 0x32e   : > { %3763 = vmatprep.mubr.bf16.mxu1 %v2984_v56  ;;  %4243 = vmatpush1.bf16.msra.mxu0 %v5460_v39  ;;  %v3040_v23 = vpack.c.bf16 %v3010_v45, %v3009_v9  ;;  %v5467_v4 = vld [vmem:[%s8040_s3 + $0x180] sm:$0xff]   ;;  %v2901_v51 = vld [vmem:[#allocation2 + $0x50] sm:$0xff]  ;;  %v2902_v11 = vld [vmem:[#allocation2 + $0x58] sm:$0xff] }
 0x32f   : > { %4244 = vmatprep.subr.bf16.mxu0 %v8210_v14  ;;  %v2957_v58 = vld [vmem:[#allocation2 + $0x61] sm:$0xff]  ;;  %v3012_v43 = vld [vmem:[#allocation2 + $0x6a] sm:$0xff]  ;;  %v2932_v39 = vpack.c.bf16 %v2902_v11, %v2901_v51  ;;  %v5469_v56 = vld [vmem:[%s8040_s3 + $0x1f8] sm:$0xff]  }
 0x330   : > { %v3011_v27 = vld [vmem:[#allocation2 + $0x62] sm:$0xff]  ;;  %v7254_v61 = vld [vmem:[%s8040_s3 + $0x238] sm:$0xff]   ;;  %v5470_v8 = vld [vmem:[%s8040_s3 + $0x1f0] sm:$0xff]  }
 0x331   : > { %v3041_v50 = vpack.c.bf16 %v3012_v43, %v3011_v27  ;;  %v2903_v17 = vld [vmem:[#allocation2 + $0x60] sm:$0xff]  ;;  %v2904_v53 = vld [vmem:[#allocation2 + $0x68] sm:$0xff]  ;;  %v2959_v24 = vld [vmem:[#allocation2 + $0x71] sm:$0xff] }
 0x332   : > { %4245 = vmatpush1.bf16.msra.mxu0 %v5462_v32  ;;  %v5474_v32 = vld [vmem:[%s8040_s3 + $0x140] sm:$0xff]   ;;  %v2906_v9 = vld [vmem:[#allocation2 + $0x78] sm:$0xff]  ;;  %v2908_v27 = vld [vmem:[#allocation2 + $0x88] sm:$0xff] }
 0x333   : > { %4246 = vmatprep.subr.bf16.mxu0 %v8210_v14  ;;  %4092 = vmatpush2.bf16.msra.mxu1 %v5474_v32  ;;  %v2961_v45 = vld [vmem:[#allocation2 + $0x81] sm:$0xff]  ;;  %v2963_v43 = vld [vmem:[#allocation2 + $0x91] sm:$0xff] }
 0x334   : > { %3933 = vmatmul.mubr.bf16.gmra.mxu0 %v3037_v7  ;;  %v2986_v7 = vpack.c.bf16 %v2956_v57, %v2955_v18  ;;  %5278 = vmatprep.subr.bf16.mxu1 %v7254_v61  ;;  %v5473_v18 = vld [vmem:[%s8040_s3 + $0x1e0] sm:$0xff]   ;;  %v2905_v57 = vld [vmem:[#allocation2 + $0x70] sm:$0xff] }
 0x335   : > { %3764 = vmatmul.mubr.bf16.gmra.mxu1 %v2930_v41  ;;  %3940 = vmatprep.mubr.bf16.mxu0 %v3039_v37  ;;  %v2960_v41 = vld [vmem:[#allocation2 + $0x79] sm:$0xff]  ;;  %v3083_v44 = vld [vmem:[#allocation2 + $0xeb] sm:$0xff] }
 0x336   : > { %3771 = vmatprep.mubr.bf16.mxu1 %v2985_v21  ;;  %4247 = vmatpush1.bf16.msra.mxu0 %v5463_v19  ;;  %v3013_v19 = vld [vmem:[#allocation2 + $0x72] sm:$0xff]  ;;  %v3014_v21 = vld [vmem:[#allocation2 + $0x7a] sm:$0xff]  ;;  %v2988_v40 = vpack.c.bf16 %v2960_v41, %v2959_v24  ;;  %v3229_v3 = vld [vmem:[#allocation2 + $0x66] sm:$0xff] }
 0x337   : > { %4248 = vmatprep.subr.bf16.mxu0 %v8210_v14  ;;  %v3042_v15 = vpack.c.bf16 %v3014_v21, %v3013_v19  ;;  %v2909_v24 = vld [vmem:[#allocation2 + $0x90] sm:$0xff]  ;;  %v2910_v41 = vld [vmem:[#allocation2 + $0x98] sm:$0xff]  ;;  %v2965_v19 = vld [vmem:[#allocation2 + $0xa1] sm:$0xff] }
 0x338   : > { %v2966_v21 = vld [vmem:[#allocation2 + $0xa9] sm:$0xff]  ;;  %v3085_v25 = vld [vmem:[#allocation2 + $0xfb] sm:$0xff] }
 0x339   : > { %v3087_v22 = vld [vmem:[#allocation2 + $0x10b] sm:$0xff]  ;;  %v3089_v42 = vld [vmem:[#allocation2 + $0x11b] sm:$0xff] }
 0x33a   : > { %4249 = vmatpush1.bf16.msra.mxu0 %v5465_v52  ;;  %v5472_v52 = vld [vmem:[%s8040_s3 + $0x1e8] sm:$0xff]   ;;  %v3201_v36 = vld [vmem:[#allocation2 + $0x135] sm:$0xff] }
 0x33b   : > { %4250 = vmatprep.subr.bf16.mxu0 %v8210_v14  ;;  %v3091_v55 = vld [vmem:[#allocation2 + $0x12b] sm:$0xff]  ;;  %v3223_v59 = vld [vmem:[#allocation2 + $0x36] sm:$0xff] }
 0x33c   : > { %3941 = vmatmul.mubr.bf16.gmra.mxu0 %v3038_v28  ;;  %v2987_v28 = vpack.c.bf16 %v2958_v1, %v2957_v58  ;;  %v5476_v58 = vld [vmem:[%s8040_s3 + $0x1d0] sm:$0xff]   ;;  %v2907_v1 = vld [vmem:[#allocation2 + $0x80] sm:$0xff] }
 0x33d   : > { %3772 = vmatmul.mubr.bf16.gmra.mxu1 %v2931_v10  ;;  %3948 = vmatprep.mubr.bf16.mxu0 %v3040_v23  ;;  %v2962_v10 = vld [vmem:[#allocation2 + $0x89] sm:$0xff]  ;;  %v2935_v32 = vpack.c.bf16 %v2908_v27, %v2907_v1 }
 0x33e   : > { %3779 = vmatprep.mubr.bf16.mxu1 %v2986_v7  ;;  %4251 = vmatpush1.bf16.msra.mxu0 %v5466_v30  ;;  %v3015_v30 = vld [vmem:[#allocation2 + $0x82] sm:$0xff]  ;;  %v3016_v7 = vld [vmem:[#allocation2 + $0x8a] sm:$0xff]  ;;  %v2989_v51 = vpack.c.bf16 %v2962_v10, %v2961_v45 }
 0x33f   : > { %4252 = vmatprep.subr.bf16.mxu0 %v8210_v14  ;;  %v3043_v11 = vpack.c.bf16 %v3016_v7, %v3015_v30  ;;  %v2911_v45 = vld [vmem:[#allocation2 + $0xa0] sm:$0xff]  ;;  %v2912_v10 = vld [vmem:[#allocation2 + $0xa8] sm:$0xff]  ;;  %v2967_v30 = vld [vmem:[#allocation2 + $0xb1] sm:$0xff] }
 0x340   : > { %v2968_v7 = vld [vmem:[#allocation2 + $0xb9] sm:$0xff]  ;;  %v3238_v33 = vld [vmem:[#allocation2 + $0xae] sm:$0xff] }
 0x341   : > { %v2992_v1 = vpack.c.bf16 %v2968_v7, %v2967_v30  ;;  %v2974_v30 = vld [vmem:[#allocation2 + $0xe9] sm:$0xff] }
 0x342   : > { %4253 = vmatpush1.bf16.msra.mxu0 %v5467_v4  ;;  %v2934_v4 = vpack.c.bf16 %v2906_v9, %v2905_v57  ;;  %v3028_v7 = vld [vmem:[#allocation2 + $0xea] sm:$0xff] }
 0x343   : > { %4254 = vmatprep.subr.bf16.mxu0 %v8210_v14  ;;  %v3242_v0 = vld [vmem:[#allocation2 + $0xce] sm:$0xff] }
 0x344   : > { %3949 = vmatmul.mubr.bf16.gmra.mxu0 %v3039_v37  ;;  %v2933_v37 = vpack.c.bf16 %v2904_v53, %v2903_v17  ;;  %v5479_v53 = vld [vmem:[%s8040_s3 + $0x1c0] sm:$0xff]   ;;  %v3246_v48 = vld [vmem:[#allocation2 + $0xee] sm:$0xff] }
 0x345   : > { %3780 = vmatmul.mubr.bf16.gmra.mxu1 %v2932_v39  ;;  %3956 = vmatprep.mubr.bf16.mxu0 %v3041_v50  ;;  %v2964_v39 = vld [vmem:[#allocation2 + $0x99] sm:$0xff]  ;;  %v3250_v46 = vld [vmem:[#allocation2 + $0x10e] sm:$0xff] }
 0x346   : > { %3787 = vmatprep.mubr.bf16.mxu1 %v2987_v28  ;;  %4255 = vmatpush2.bf16.msra.mxu0 %v5469_v56  ;;  %v3017_v56 = vld [vmem:[#allocation2 + $0x92] sm:$0xff]  ;;  %v3018_v28 = vld [vmem:[#allocation2 + $0x9a] sm:$0xff] }
 0x347   : > { %4256 = vmatprep.subr.bf16.mxu0 %v8210_v14  ;;  %v3044_v17 = vpack.c.bf16 %v3018_v28, %v3017_v56  ;;  %v2970_v56 = vld [vmem:[#allocation2 + $0xc9] sm:$0xff] }
 0x348   : > { %v3023_v28 = vld [vmem:[#allocation2 + $0xc2] sm:$0xff] }
 0x34a   : > { %4257 = vmatpush2.bf16.msra.mxu0 %v5470_v8  ;;  %v2990_v8 = vpack.c.bf16 %v2964_v39, %v2963_v43  ;;  %v2914_v43 = vld [vmem:[#allocation2 + $0xb8] sm:$0xff]  ;;  %v2969_v39 = vld [vmem:[#allocation2 + $0xc1] sm:$0xff] }
 0x34b   : > { %4258 = vmatprep.subr.bf16.mxu0 %v8210_v14 }
 0x34c   : > { %3957 = vmatmul.mubr.bf16.gmra.mxu0 %v3040_v23  ;;  %v5475_v23 = vld [vmem:[%s8040_s3 + $0x1d8] sm:$0xff]  }
 0x34d   : > { %3788 = vmatmul.mubr.bf16.gmra.mxu1 %v2933_v37  ;;  %3964 = vmatprep.mubr.bf16.mxu0 %v3042_v15  ;;  %v3019_v37 = vld [vmem:[#allocation2 + $0xa2] sm:$0xff] }
 0x34e   : > { %3795 = vmatprep.mubr.bf16.mxu1 %v2988_v40  ;;  %4259 = vmatpush2.bf16.msra.mxu0 %v5472_v52  ;;  %v3020_v52 = vld [vmem:[#allocation2 + $0xaa] sm:$0xff]  ;;  %v2936_v40 = vpack.c.bf16 %v2910_v41, %v2909_v24  ;;  %v2915_v24 = vld [vmem:[#allocation2 + $0xc0] sm:$0xff] }
 0x34f   : > { %4260 = vmatprep.subr.bf16.mxu0 %v8210_v14  ;;  %v2916_v41 = vld [vmem:[#allocation2 + $0xc8] sm:$0xff] }
 0x352   : > { %4261 = vmatpush2.bf16.msra.mxu0 %v5473_v18  ;;  %v2991_v18 = vpack.c.bf16 %v2966_v21, %v2965_v19  ;;  %v2971_v19 = vld [vmem:[#allocation2 + $0xd1] sm:$0xff]  ;;  %v2972_v21 = vld [vmem:[#allocation2 + $0xd9] sm:$0xff] }
 0x353   : > { %4262 = vmatprep.subr.bf16.mxu0 %v8210_v14 }
 0x354   : > { %3965 = vmatmul.mubr.bf16.gmra.mxu0 %v3041_v50  ;;  %v5478_v50 = vld [vmem:[%s8040_s3 + $0x1c8] sm:$0xff]  }
 0x355   : > { %3796 = vmatmul.mubr.bf16.gmra.mxu1 %v2934_v4  ;;  %3972 = vmatprep.mubr.bf16.mxu0 %v3043_v11  ;;  %v3021_v4 = vld [vmem:[#allocation2 + $0xb2] sm:$0xff] }
 0x356   : > { %3803 = vmatprep.mubr.bf16.mxu1 %v2989_v51  ;;  %4263 = vmatpush2.bf16.msra.mxu0 %v5475_v23  ;;  %v3022_v23 = vld [vmem:[#allocation2 + $0xba] sm:$0xff]  ;;  %v2937_v51 = vpack.c.bf16 %v2912_v10, %v2911_v45 }
 0x357   : > { %4264 = vmatprep.subr.bf16.mxu0 %v8210_v14  ;;  %v3046_v27 = vpack.c.bf16 %v3022_v23, %v3021_v4  ;;  %v2918_v45 = vld [vmem:[#allocation2 + $0xd8] sm:$0xff]  ;;  %v2973_v10 = vld [vmem:[#allocation2 + $0xe1] sm:$0xff] }
 0x358   : > { %v2995_v23 = vpack.c.bf16 %v2974_v30, %v2973_v10  ;;  %v3034_v10 = vld [vmem:[#allocation2 + $0x11a] sm:$0xff] }
 0x35a   : > { %4265 = vmatpush2.bf16.msra.mxu0 %v5476_v58 }
 0x35b   : > { %4266 = vmatprep.subr.bf16.mxu0 %v8210_v14 }
 0x35c   : > { %3973 = vmatmul.mubr.bf16.gmra.mxu0 %v3042_v15  ;;  %v3045_v15 = vpack.c.bf16 %v3020_v52, %v3019_v37  ;;  %v3026_v37 = vld [vmem:[#allocation2 + $0xda] sm:$0xff]  ;;  %v2939_v52 = vpack.c.bf16 %v2916_v41, %v2915_v24  ;;  %v2978_v41 = vld [vmem:[#allocation2 + $0x109] sm:$0xff] }
 0x35d   : > { %3804 = vmatmul.mubr.bf16.gmra.mxu1 %v2935_v32  ;;  %3980 = vmatprep.mubr.bf16.mxu0 %v3044_v17  ;;  %v3024_v32 = vld [vmem:[#allocation2 + $0xca] sm:$0xff]  ;;  %v2977_v24 = vld [vmem:[#allocation2 + $0x101] sm:$0xff] }
 0x35e   : > { %3811 = vmatprep.mubr.bf16.mxu1 %v2990_v8  ;;  %4267 = vmatpush2.bf16.msra.mxu0 %v5478_v50  ;;  %v2993_v8 = vpack.c.bf16 %v2970_v56, %v2969_v39  ;;  %v3030_v39 = vld [vmem:[#allocation2 + $0xfa] sm:$0xff] }
 0x35f   : > { %4268 = vmatprep.subr.bf16.mxu0 %v8210_v14 }
 0x360   : > { %v7285_v57 = vpop.f32.mrf.mxu1 }
 0x362   : > { %4269 = vmatpush2.bf16.msra.mxu0 %v5479_v53  ;;  %v3743_v9 = vpop.f32.mrf.mxu1  ;;  %v3047_v53 = vpack.c.bf16 %v3024_v32, %v3023_v28 }
 0x363   : > { %v2917_v9 = vld [vmem:[#allocation2 + $0xd0] sm:$0xff] }
 0x364   : > { %3981 = vmatmul.mubr.bf16.gmra.mxu0 %v3043_v11  ;;  %v7287_v14 = vpop.f32.mrf.mxu1  ;;  %v2913_v11 = vld [vmem:[#allocation2 + $0xb0] sm:$0xff]  ;;  %v2940_v4 = vpack.c.bf16 %v2918_v45, %v2917_v9  ;;  %v2980_v45 = vld [vmem:[#allocation2 + $0x119] sm:$0xff] }
 0x365   : > { %3812 = vmatmul.mubr.bf16.gmra.mxu1 %v2936_v40  ;;  %3988 = vmatprep.mubr.bf16.mxu0 %v3045_v15  ;;  %v2938_v50 = vpack.c.bf16 %v2914_v43, %v2913_v11  ;;  %v2994_v40 = vpack.c.bf16 %v2972_v21, %v2971_v19  ;;  %v2975_v11 = vld [vmem:[#allocation2 + $0xf1] sm:$0xff]  ;;  %v2976_v43 = vld [vmem:[#allocation2 + $0xf9] sm:$0xff] }
 0x366   : > { %3819 = vmatprep.mubr.bf16.mxu1 %v2991_v18  ;;  %v3746_v58 = vpop.f32.mrf.mxu1  ;;  %v2996_v28 = vpack.c.bf16 %v2976_v43, %v2975_v11  ;;  %v3032_v19 = vld [vmem:[#allocation2 + $0x10a] sm:$0xff] }
 0x367   : > { %v2919_v58 = vld [vmem:[#allocation2 + $0xe0] sm:$0xff]  ;;  %v2979_v9 = vld [vmem:[#allocation2 + $0x111] sm:$0xff] }
 0x368   : > { %v3054_v11 = vld [vmem:[#allocation2 + $0x12a] sm:$0xff] }
 0x36c   : > { %3989 = vmatmul.mubr.bf16.gmra.mxu0 %v3044_v17  ;;  %v3025_v17 = vld [vmem:[#allocation2 + $0xd2] sm:$0xff] }
 0x36d   : > { %3820 = vmatmul.mubr.bf16.gmra.mxu1 %v2937_v51  ;;  %3996 = vmatprep.mubr.bf16.mxu0 %v3046_v27  ;;  %v3048_v18 = vpack.c.bf16 %v3026_v37, %v3025_v17  ;;  %v2997_v17 = vpack.c.bf16 %v2978_v41, %v2977_v24  ;;  %v3168_v24 = vld [vmem:[#allocation2 + $0x2d] sm:$0xff] }
 0x36e   : > { %3827 = vmatprep.mubr.bf16.mxu1 %v2992_v1  ;;  %v2920_v1 = vld [vmem:[#allocation2 + $0xe8] sm:$0xff] }
 0x36f   : > { %v2941_v56 = vpack.c.bf16 %v2920_v1, %v2919_v58  ;;  %v3110_v58 = vld [vmem:[#allocation2 + $0x14] sm:$0xff]  ;;  %v3111_v1 = vld [vmem:[#allocation2 + $0x1c] sm:$0xff] }
 0x374   : > { %3997 = vmatmul.mubr.bf16.gmra.mxu0 %v3045_v15  ;;  %v3027_v15 = vld [vmem:[#allocation2 + $0xe2] sm:$0xff] }
 0x375   : > { %3828 = vmatmul.mubr.bf16.gmra.mxu1 %v2938_v50  ;;  %4004 = vmatprep.mubr.bf16.mxu0 %v3047_v53  ;;  %v3049_v51 = vpack.c.bf16 %v3028_v7, %v3027_v15  ;;  %v2921_v50 = vld [vmem:[#allocation2 + $0xf0] sm:$0xff]  ;;  %v2998_v15 = vpack.c.bf16 %v2980_v45, %v2979_v9  ;;  %v3115_v9 = vld [vmem:[#allocation2 + $0x3c] sm:$0xff] }
 0x376   : > { %3835 = vmatprep.mubr.bf16.mxu1 %v2993_v8  ;;  %v2922_v8 = vld [vmem:[#allocation2 + $0xf8] sm:$0xff] }
 0x377   : > { %v2942_v21 = vpack.c.bf16 %v2922_v8, %v2921_v50  ;;  %v3112_v50 = vld [vmem:[#allocation2 + $0x24] sm:$0xff]  ;;  %v3113_v8 = vld [vmem:[#allocation2 + $0x2c] sm:$0xff]  ;;  %v3169_v45 = vld [vmem:[#allocation2 + $0x35] sm:$0xff] }
 0x37c   : > { %4005 = vmatmul.mubr.bf16.gmra.mxu0 %v3046_v27  ;;  %v3029_v27 = vld [vmem:[#allocation2 + $0xf2] sm:$0xff] }
 0x37d   : > { %3836 = vmatmul.mubr.bf16.gmra.mxu1 %v2939_v52  ;;  %4012 = vmatprep.mubr.bf16.mxu0 %v3048_v18  ;;  %v3050_v32 = vpack.c.bf16 %v3030_v39, %v3029_v27  ;;  %v2923_v52 = vld [vmem:[#allocation2 + $0x100] sm:$0xff]  ;;  %v3146_v27 = vpack.c.bf16 %v3111_v1, %v3110_v58  ;;  %v3117_v1 = vld [vmem:[#allocation2 + $0x4c] sm:$0xff] }
 0x37e   : > { %3843 = vmatprep.mubr.bf16.mxu1 %v2994_v40  ;;  %v2924_v40 = vld [vmem:[#allocation2 + $0x108] sm:$0xff] }
 0x37f   : > { %v2943_v30 = vpack.c.bf16 %v2924_v40, %v2923_v52  ;;  %v5481_v52 = vld [vmem:[%s8040_s3 + $0x228] sm:$0xff]   ;;  %v3114_v40 = vld [vmem:[#allocation2 + $0x34] sm:$0xff] }
 0x380   : > { %v3116_v58 = vld [vmem:[#allocation2 + $0x44] sm:$0xff] }
 0x384   : > { %4013 = vmatmul.mubr.bf16.gmra.mxu0 %v3047_v53  ;;  %v3031_v53 = vld [vmem:[#allocation2 + $0x102] sm:$0xff] }
 0x385   : > { %3844 = vmatmul.mubr.bf16.gmra.mxu1 %v2940_v4  ;;  %4020 = vmatprep.mubr.bf16.mxu0 %v3049_v51  ;;  %v3051_v37 = vpack.c.bf16 %v3032_v19, %v3031_v53  ;;  %v2925_v4 = vld [vmem:[#allocation2 + $0x110] sm:$0xff]  ;;  %v3147_v53 = vpack.c.bf16 %v3113_v8, %v3112_v50  ;;  %v5485_v8 = vld [vmem:[%s8040_s3 + $0x208] sm:$0xff]  }
 0x386   : > { %3851 = vmatprep.mubr.bf16.mxu1 %v2995_v23  ;;  %v2926_v23 = vld [vmem:[#allocation2 + $0x118] sm:$0xff]  ;;  %v5480_v19 = vld [vmem:[%s8040_s3 + $0x230] sm:$0xff]  }
 0x387   : > { %v2944_v43 = vpack.c.bf16 %v2926_v23, %v2925_v4  ;;  %v3061_v4 = vld [vmem:[#allocation2 + $0x3b] sm:$0xff]  ;;  %v3063_v50 = vld [vmem:[#allocation2 + $0x4b] sm:$0xff] }
 0x388   : > { %v5483_v23 = vld [vmem:[%s8040_s3 + $0x218] sm:$0xff]  }
 0x38c   : > { %4021 = vmatmul.mubr.bf16.gmra.mxu0 %v3048_v18  ;;  %v3033_v18 = vld [vmem:[#allocation2 + $0x112] sm:$0xff] }
 0x38d   : > { %3852 = vmatmul.mubr.bf16.gmra.mxu1 %v2941_v56  ;;  %4028 = vmatprep.mubr.bf16.mxu0 %v3050_v32  ;;  %v3052_v7 = vpack.c.bf16 %v3034_v10, %v3033_v18  ;;  %v3056_v56 = vld [vmem:[#allocation2 + $0x13] sm:$0xff]  ;;  %v3170_v18 = vld [vmem:[#allocation2 + $0x3d] sm:$0xff] }
 0x38e   : > { %3859 = vmatprep.mubr.bf16.mxu1 %v2996_v28  ;;  %v3057_v28 = vld [vmem:[#allocation2 + $0x1b] sm:$0xff] }
 0x38f   : > { %v3092_v41 = vpack.c.bf16 %v3057_v28, %v3056_v56  ;;  %v3062_v28 = vld [vmem:[#allocation2 + $0x43] sm:$0xff] }
 0x394   : > { %4029 = vmatmul.mubr.bf16.gmra.mxu0 %v3049_v51  ;;  %v3053_v51 = vld [vmem:[#allocation2 + $0x122] sm:$0xff] }
 0x395   : > { %3860 = vmatmul.mubr.bf16.gmra.mxu1 %v2942_v21  ;;  %4036 = vmatprep.mubr.bf16.mxu0 %v3051_v37  ;;  %v3055_v39 = vpack.c.bf16 %v3054_v11, %v3053_v51  ;;  %v3171_v51 = vld [vmem:[#allocation2 + $0x45] sm:$0xff]  ;;  %v3172_v11 = vld [vmem:[#allocation2 + $0x4d] sm:$0xff] }
 0x396   : > { %3867 = vmatprep.mubr.bf16.mxu1 %v2997_v17  ;;  %v3058_v17 = vld [vmem:[#allocation2 + $0x23] sm:$0xff]  ;;  %v3205_v56 = vpack.c.bf16 %v3172_v11, %v3171_v51 }
 0x397   : > { %v3178_v51 = vld [vmem:[#allocation2 + $0x7d] sm:$0xff] }
 0x39c   : > { %4037 = vmatmul.mubr.bf16.gmra.mxu0 %v3050_v32  ;;  %v3167_v32 = vld [vmem:[#allocation2 + $0x25] sm:$0xff] }
 0x39d   : > { %3868 = vmatmul.mubr.bf16.gmra.mxu1 %v2943_v30  ;;  %4044 = vmatprep.mubr.bf16.mxu0 %v3052_v7  ;;  %v3203_v21 = vpack.c.bf16 %v3168_v24, %v3167_v32  ;;  %v3148_v30 = vpack.c.bf16 %v3115_v9, %v3114_v40  ;;  %v3118_v32 = vld [vmem:[#allocation2 + $0x54] sm:$0xff]  ;;  %v3119_v24 = vld [vmem:[#allocation2 + $0x5c] sm:$0xff]  ;;  %v3120_v9 = vld [vmem:[#allocation2 + $0x64] sm:$0xff] }
 0x39e   : > { %3875 = vmatprep.mubr.bf16.mxu1 %v2998_v15  ;;  %v5482_v15 = vld [vmem:[%s8040_s3 + $0x220] sm:$0xff]  }
 0x39f   : > { %v3065_v40 = vld [vmem:[#allocation2 + $0x5b] sm:$0xff] }
 0x3a4   : > { %4045 = vmatmul.mubr.bf16.gmra.mxu0 %v3051_v37  ;;  %v3059_v37 = vld [vmem:[#allocation2 + $0x2b] sm:$0xff] }
 0x3a5   : > { %3876 = vmatmul.mubr.bf16.gmra.mxu1 %v2944_v43  ;;  %4052 = vmatprep.mubr.bf16.mxu0 %v3055_v39  ;;  %v3093_v10 = vpack.c.bf16 %v3059_v37, %v3058_v17  ;;  %v5484_v39 = vld [vmem:[%s8040_s3 + $0x210] sm:$0xff]   ;;  %v5486_v17 = vld [vmem:[%s8040_s3 + $0x200] sm:$0xff]  }
 0x3a6   : > { %4093 = vmatprep.mubr.bf16.mxu1 %v3146_v27  ;;  %v3149_v27 = vpack.c.bf16 %v3117_v1, %v3116_v58  ;;  %v3123_v58 = vld [vmem:[#allocation2 + $0x7c] sm:$0xff] }
 0x3a7   : > { %v3177_v1 = vld [vmem:[#allocation2 + $0x75] sm:$0xff] }
 0x3ac   : > { %4053 = vmatmul.mubr.bf16.gmra.mxu0 %v3052_v7  ;;  %v3060_v7 = vld [vmem:[#allocation2 + $0x33] sm:$0xff] }
 0x3ad   : > { %4094 = vmatmul.mubr.bf16.vlgmr.msra.gmra.mxu1 %v3092_v41  ;;  %4270 = vmatprep.mubr.bf16.mxu0 %v3203_v21  ;;  %v3094_v43 = vpack.c.bf16 %v3061_v4, %v3060_v7  ;;  %v3173_v41 = vld [vmem:[#allocation2 + $0x55] sm:$0xff]  ;;  %v3150_v21 = vpack.c.bf16 %v3119_v24, %v3118_v32  ;;  %v3066_v7 = vld [vmem:[#allocation2 + $0x63] sm:$0xff]  ;;  %v3067_v4 = vld [vmem:[#allocation2 + $0x6b] sm:$0xff] }
 0x3ae   : > { %4101 = vmatprep.mubr.bf16.mxu1 %v3147_v53  ;;  %5279 = vmatpush3.bf16.msra.mxu1 %v7254_v61  ;;  %v3204_v61 = vpack.c.bf16 %v3170_v18, %v3169_v45  ;;  %v3121_v45 = vld [vmem:[#allocation2 + $0x6c] sm:$0xff]  ;;  %v3097_v11 = vpack.c.bf16 %v3067_v4, %v3066_v7  ;;  %v3073_v4 = vld [vmem:[#allocation2 + $0x9b] sm:$0xff] }
 0x3af   : > { %5280 = vmatprep.subr.bf16.mxu1 %v5480_v19  ;;  %v3175_v18 = vld [vmem:[#allocation2 + $0x65] sm:$0xff]  ;;  %v3180_v32 = vld [vmem:[#allocation2 + $0x8d] sm:$0xff] }
 0x3b0   : > { %v3072_v7 = vld [vmem:[#allocation2 + $0x93] sm:$0xff] }
 0x3b2   : > { %5281 = vmatpush3.bf16.msra.mxu1 %v5480_v19  ;;  %v3095_v19 = vpack.c.bf16 %v3063_v50, %v3062_v28  ;;  %v3124_v28 = vld [vmem:[#allocation2 + $0x84] sm:$0xff]  ;;  %v3125_v50 = vld [vmem:[#allocation2 + $0x8c] sm:$0xff] }
 0x3b3   : > { %5282 = vmatprep.subr.bf16.mxu1 %v5481_v52 }
 0x3b4   : > { %4271 = vmatmul.mubr.bf16.vlgmr.msra.gmra.mxu0 %v3147_v53  ;;  %v3174_v53 = vld [vmem:[#allocation2 + $0x5d] sm:$0xff] }
 0x3b5   : > { %4102 = vmatmul.mubr.bf16.gmra.mxu1 %v3093_v10  ;;  %4278 = vmatprep.mubr.bf16.mxu0 %v3204_v61  ;;  %v3206_v37 = vpack.c.bf16 %v3174_v53, %v3173_v41  ;;  %v3176_v10 = vld [vmem:[#allocation2 + $0x6d] sm:$0xff]  ;;  %v3153_v41 = vpack.c.bf16 %v3125_v50, %v3124_v28 }
 0x3b6   : > { %4109 = vmatprep.mubr.bf16.mxu1 %v3148_v30  ;;  %5283 = vmatpush3.bf16.msra.mxu1 %v5481_v52  ;;  %v3064_v52 = vld [vmem:[#allocation2 + $0x53] sm:$0xff]  ;;  %v3207_v61 = vpack.c.bf16 %v3176_v10, %v3175_v18 }
 0x3b7   : > { %5284 = vmatprep.subr.bf16.mxu1 %v5482_v15 }
 0x3ba   : > { %5285 = vmatpush3.bf16.msra.mxu1 %v5482_v15  ;;  %v3151_v15 = vpack.c.bf16 %v3121_v45, %v3120_v9 }
 0x3bb   : > { %5286 = vmatprep.subr.bf16.mxu1 %v5483_v23 }
 0x3bc   : > { %4279 = vmatmul.mubr.bf16.gmra.mxu0 %v3148_v30  ;;  %v3096_v30 = vpack.c.bf16 %v3065_v40, %v3064_v52  ;;  %v3181_v52 = vld [vmem:[#allocation2 + $0x95] sm:$0xff]  ;;  %v3182_v40 = vld [vmem:[#allocation2 + $0x9d] sm:$0xff] }
 0x3bd   : > { %4110 = vmatmul.mubr.bf16.gmra.mxu1 %v3094_v43  ;;  %4286 = vmatprep.mubr.bf16.mxu0 %v3205_v56  ;;  %v3069_v56 = vld [vmem:[#allocation2 + $0x7b] sm:$0xff]  ;;  %v3210_v10 = vpack.c.bf16 %v3182_v40, %v3181_v52 }
 0x3be   : > { %4117 = vmatprep.mubr.bf16.mxu1 %v3149_v27  ;;  %5287 = vmatpush3.bf16.msra.mxu1 %v5483_v23  ;;  %v3122_v23 = vld [vmem:[#allocation2 + $0x74] sm:$0xff]  ;;  %v3131_v52 = vld [vmem:[#allocation2 + $0xbc] sm:$0xff] }
 0x3bf   : > { %5288 = vmatprep.subr.bf16.mxu1 %v5484_v39  ;;  %v3152_v43 = vpack.c.bf16 %v3123_v58, %v3122_v23  ;;  %v3128_v58 = vld [vmem:[#allocation2 + $0xa4] sm:$0xff] }
 0x3c2   : > { %5289 = vmatpush3.bf16.msra.mxu1 %v5484_v39  ;;  %v3068_v39 = vld [vmem:[#allocation2 + $0x73] sm:$0xff] }
 0x3c3   : > { %5290 = vmatprep.subr.bf16.mxu1 %v5485_v8  ;;  %v3098_v24 = vpack.c.bf16 %v3069_v56, %v3068_v39  ;;  %v3100_v39 = vpack.c.bf16 %v3073_v4, %v3072_v7 }
 0x3c4   : > { %4287 = vmatmul.mubr.bf16.gmra.mxu0 %v3149_v27  ;;  %v3208_v27 = vpack.c.bf16 %v3178_v51, %v3177_v1  ;;  %v3129_v1 = vld [vmem:[#allocation2 + $0xac] sm:$0xff] }
 0x3c5   : > { %4118 = vmatmul.mubr.bf16.gmra.mxu1 %v3095_v19  ;;  %4294 = vmatprep.mubr.bf16.mxu0 %v3206_v37  ;;  %v3070_v19 = vld [vmem:[#allocation2 + $0x83] sm:$0xff]  ;;  %v3155_v28 = vpack.c.bf16 %v3129_v1, %v3128_v58 }
 0x3c6   : > { %4125 = vmatprep.mubr.bf16.mxu1 %v3150_v21  ;;  %5291 = vmatpush3.bf16.msra.mxu1 %v5485_v8  ;;  %v3179_v8 = vld [vmem:[#allocation2 + $0x85] sm:$0xff]  ;;  %v3127_v37 = vld [vmem:[#allocation2 + $0x9c] sm:$0xff] }
 0x3c7   : > { %5292 = vmatprep.subr.bf16.mxu1 %v5486_v17  ;;  %v3209_v53 = vpack.c.bf16 %v3180_v32, %v3179_v8 }
 0x3ca   : > { %5293 = vmatpush3.bf16.msra.mxu1 %v5486_v17  ;;  %v3126_v17 = vld [vmem:[#allocation2 + $0x94] sm:$0xff] }
 0x3cb   : > { %v3154_v45 = vpack.c.bf16 %v3127_v37, %v3126_v17  ;;  %v3130_v37 = vld [vmem:[#allocation2 + $0xb4] sm:$0xff] }
 0x3cc   : > { %4295 = vmatmul.mubr.bf16.gmra.mxu0 %v3150_v21  ;;  %v3071_v21 = vld [vmem:[#allocation2 + $0x8b] sm:$0xff] }
 0x3cd   : > { %4126 = vmatmul.mubr.bf16.gmra.mxu1 %v3096_v30  ;;  %4302 = vmatprep.mubr.bf16.mxu0 %v3207_v61  ;;  %v3099_v9 = vpack.c.bf16 %v3071_v21, %v3070_v19  ;;  %v3074_v19 = vld [vmem:[#allocation2 + $0xa3] sm:$0xff]  ;;  %v3075_v21 = vld [vmem:[#allocation2 + $0xab] sm:$0xff] }
 0x3ce   : > { %4133 = vmatprep.mubr.bf16.mxu1 %v3151_v15  ;;  %v3101_v7 = vpack.c.bf16 %v3075_v21, %v3074_v19  ;;  %v3188_v19 = vld [vmem:[#allocation2 + $0xcd] sm:$0xff] }
 0x3d4   : > { %4303 = vmatmul.mubr.bf16.gmra.mxu0 %v3151_v15 }
 0x3d5   : > { %4134 = vmatmul.mubr.bf16.gmra.mxu1 %v3097_v11  ;;  %4310 = vmatprep.mubr.bf16.mxu0 %v3208_v27  ;;  %v3183_v11 = vld [vmem:[#allocation2 + $0xa5] sm:$0xff] }
 0x3d6   : > { %4141 = vmatprep.mubr.bf16.mxu1 %v3152_v43 }
 0x3dc   : > { %4311 = vmatmul.mubr.bf16.gmra.mxu0 %v3152_v43  ;;  %v3184_v43 = vld [vmem:[#allocation2 + $0xad] sm:$0xff] }
 0x3dd   : > { %4142 = vmatmul.mubr.bf16.gmra.mxu1 %v3098_v24  ;;  %4318 = vmatprep.mubr.bf16.mxu0 %v3209_v53  ;;  %v3211_v8 = vpack.c.bf16 %v3184_v43, %v3183_v11 }
 0x3de   : > { %4149 = vmatprep.mubr.bf16.mxu1 %v3153_v41 }
 0x3e4   : > { %v7311_v30 = vpop.f32.mrf.mxu0  ;;  %4319 = vmatmul.mubr.bf16.gmra.mxu0 %v3153_v41 }
 0x3e5   : > { %v3749_v18 = vpop.f32.mrf.mxu1  ;;  %4150 = vmatmul.mubr.bf16.gmra.mxu1 %v3099_v9  ;;  %4326 = vmatprep.mubr.bf16.mxu0 %v3210_v10  ;;  %v3185_v9 = vld [vmem:[#allocation2 + $0xb5] sm:$0xff]  ;;  %v3186_v10 = vld [vmem:[#allocation2 + $0xbd] sm:$0xff] }
 0x3e6   : > { %4157 = vmatprep.mubr.bf16.mxu1 %v3154_v45  ;;  %v3920_v61 = vpop.f32.mrf.mxu0 }
 0x3e7   : > { %v3751_v15 = vpop.f32.mrf.mxu1 }
 0x3e8   : > { %v7313_v51 = vpop.f32.mrf.mxu0 }
 0x3e9   : > { %v3752_v23 = vpop.f32.mrf.mxu1 }
 0x3ea   : > { %v3923_v56 = vpop.f32.mrf.mxu0 }
 0x3eb   : > { %v3754_v27 = vpop.f32.mrf.mxu1  ;;  %v3077_v56 = vld [vmem:[#allocation2 + $0xbb] sm:$0xff] }
 0x3ec   : > { %v3926_v32 = vpop.f32.mrf.mxu0  ;;  %4327 = vmatmul.mubr.bf16.gmra.mxu0 %v3154_v45  ;;  %v3156_v45 = vpack.c.bf16 %v3131_v52, %v3130_v37 }
 0x3ed   : > { %v3757_v50 = vpop.f32.mrf.mxu1  ;;  %4158 = vmatmul.mubr.bf16.gmra.mxu1 %v3100_v39  ;;  %v7315_v24 = vadd.f32 %v3926_v32, %v3749_v18  ;;  %4334 = vmatprep.mubr.bf16.mxu0 %v3211_v8  ;;  %v3212_v18 = vpack.c.bf16 %v3186_v10, %v3185_v9  ;;  %v3076_v39 = vld [vmem:[#allocation2 + $0xb3] sm:$0xff] }
 0x3ee   : > { %4165 = vmatprep.mubr.bf16.mxu1 %v3155_v28  ;;  %v3928_v53 = vpop.f32.mrf.mxu0  ;;  %v3133_v32 = vld [vmem:[#allocation2 + $0xcc] sm:$0xff]  ;;  %v3102_v52 = vpack.c.bf16 %v3077_v56, %v3076_v39  ;;  %v3189_v39 = vld [vmem:[#allocation2 + $0xd5] sm:$0xff]  ;;  %v3190_v56 = vld [vmem:[#allocation2 + $0xdd] sm:$0xff] }
 0x3ef   : > { %v3759_v41 = vpop.f32.mrf.mxu1  ;;  %v3187_v53 = vld [vmem:[#allocation2 + $0xc5] sm:$0xff] }
 0x3f0   : > { %v3929_v40 = vpop.f32.mrf.mxu0 }
 0x3f1   : > { %v3760_v17 = vpop.f32.mrf.mxu1  ;;  %v7317_v15 = vadd.f32 %v3929_v40, %v3752_v23  ;;  %v3132_v23 = vld [vmem:[#allocation2 + $0xc4] sm:$0xff] }
 0x3f2   : > { %v3931_v4 = vpop.f32.mrf.mxu0 }
 0x3f3   : > { %v3762_v61 = vpop.f32.mrf.mxu1 }
 0x3f4   : > { %v3934_v1 = vpop.f32.mrf.mxu0  ;;  %4335 = vmatmul.mubr.bf16.gmra.mxu0 %v3155_v28  ;;  %v3157_v28 = vpack.c.bf16 %v3133_v32, %v3132_v23 }
 0x3f5   : > { %v3765_v58 = vpop.f32.mrf.mxu1  ;;  %4166 = vmatmul.mubr.bf16.gmra.mxu1 %v3101_v7  ;;  %v7319_v11 = vadd.f32 %v3934_v1, %v3757_v50  ;;  %4342 = vmatprep.mubr.bf16.mxu0 %v3212_v18  ;;  %v3213_v50 = vpack.c.bf16 %v3188_v19, %v3187_v53  ;;  %v3078_v18 = vld [vmem:[#allocation2 + $0xc3] sm:$0xff]  ;;  %v3079_v1 = vld [vmem:[#allocation2 + $0xcb] sm:$0xff] }
 0x3f6   : > { %4173 = vmatprep.mubr.bf16.mxu1 %v3156_v45  ;;  %v3936_v27 = vpop.f32.mrf.mxu0  ;;  %v3103_v53 = vpack.c.bf16 %v3079_v1, %v3078_v18  ;;  %v3191_v18 = vld [vmem:[#allocation2 + $0xe5] sm:$0xff]  ;;  %v3192_v1 = vld [vmem:[#allocation2 + $0xed] sm:$0xff] }
 0x3f7   : > { %v3767_v43 = vpop.f32.mrf.mxu1  ;;  %v3135_v27 = vld [vmem:[#allocation2 + $0xdc] sm:$0xff] }
 0x3f8   : > { %v3937_v41 = vpop.f32.mrf.mxu0 }
 0x3f9   : > { %v3768_v8 = vpop.f32.mrf.mxu1  ;;  %v7321_v21 = vadd.f32 %v3937_v41, %v3760_v17  ;;  %v3134_v17 = vld [vmem:[#allocation2 + $0xd4] sm:$0xff] }
 0x3fa   : > { %v3939_v40 = vpop.f32.mrf.mxu0 }
 0x3fb   : > { %v3770_v37 = vpop.f32.mrf.mxu1 }
 0x3fc   : > { %v3942_v10 = vpop.f32.mrf.mxu0  ;;  %4343 = vmatmul.mubr.bf16.gmra.mxu0 %v3156_v45  ;;  %v3158_v45 = vpack.c.bf16 %v3135_v27, %v3134_v17 }
 0x3fd   : > { %v3773_v9 = vpop.f32.mrf.mxu1  ;;  %4174 = vmatmul.mubr.bf16.gmra.mxu1 %v3102_v52  ;;  %v7323_v61 = vadd.f32 %v3942_v10, %v3765_v58  ;;  %4350 = vmatprep.mubr.bf16.mxu0 %v3213_v50  ;;  %v3214_v58 = vpack.c.bf16 %v3190_v56, %v3189_v39 }
 0x3fe   : > { %4181 = vmatprep.mubr.bf16.mxu1 %v3157_v28  ;;  %v3944_v4 = vpop.f32.mrf.mxu0 }
 0x3ff   : > { %v3775_v7 = vpop.f32.mrf.mxu1  ;;  %v3081_v4 = vld [vmem:[#allocation2 + $0xdb] sm:$0xff] }
 0x400   : > { %v3945_v41 = vpop.f32.mrf.mxu0  ;;  %v3080_v7 = vld [vmem:[#allocation2 + $0xd3] sm:$0xff] }
 0x401   : > { %v3776_v43 = vpop.f32.mrf.mxu1  ;;  %v7325_v23 = vadd.f32 %v3945_v41, %v3768_v8  ;;  %v3136_v8 = vld [vmem:[#allocation2 + $0xe4] sm:$0xff]  ;;  %v3137_v41 = vld [vmem:[#allocation2 + $0xec] sm:$0xff]  ;;  %v3104_v39 = vpack.c.bf16 %v3081_v4, %v3080_v7  ;;  %v3193_v7 = vld [vmem:[#allocation2 + $0xf5] sm:$0xff] }
 0x402   : > { %v3947_v19 = vpop.f32.mrf.mxu0  ;;  %v3194_v4 = vld [vmem:[#allocation2 + $0xfd] sm:$0xff] }
 0x403   : > { %v3778_v32 = vpop.f32.mrf.mxu1 }
 0x404   : > { %v3950_v52 = vpop.f32.mrf.mxu0  ;;  %4351 = vmatmul.mubr.bf16.gmra.mxu0 %v3157_v28  ;;  %v3159_v28 = vpack.c.bf16 %v3137_v41, %v3136_v8 }
 0x405   : > { %v3781_v37 = vpop.f32.mrf.mxu1  ;;  %4182 = vmatmul.mubr.bf16.gmra.mxu1 %v3103_v53  ;;  %v7327_v40 = vadd.f32 %v3950_v52, %v3773_v9  ;;  %4358 = vmatprep.mubr.bf16.mxu0 %v3214_v58  ;;  %v3215_v9 = vpack.c.bf16 %v3192_v1, %v3191_v18 }
 0x406   : > { %4189 = vmatprep.mubr.bf16.mxu1 %v3158_v45  ;;  %v3952_v10 = vpop.f32.mrf.mxu0 }
 0x407   : > { %v3783_v50 = vpop.f32.mrf.mxu1  ;;  %v3082_v10 = vld [vmem:[#allocation2 + $0xe3] sm:$0xff] }
 0x408   : > { %v3953_v32 = vpop.f32.mrf.mxu0  ;;  %v3105_v18 = vpack.c.bf16 %v3083_v44, %v3082_v10  ;;  %v3195_v44 = vld [vmem:[#allocation2 + $0x105] sm:$0xff]  ;;  %v3196_v10 = vld [vmem:[#allocation2 + $0x10d] sm:$0xff] }
 0x409   : > { %v3784_v38 = vpop.f32.mrf.mxu1  ;;  %v7329_v17 = vadd.f32 %v3953_v32, %v3776_v43  ;;  %v3138_v43 = vld [vmem:[#allocation2 + $0xf4] sm:$0xff]  ;;  %v3139_v32 = vld [vmem:[#allocation2 + $0xfc] sm:$0xff] }
 0x40a   : > { %v3955_v56 = vpop.f32.mrf.mxu0 }
 0x40b   : > { %v3786_v27 = vpop.f32.mrf.mxu1 }
 0x40c   : > { %v3958_v19 = vpop.f32.mrf.mxu0  ;;  %4359 = vmatmul.mubr.bf16.gmra.mxu0 %v3158_v45  ;;  %v3160_v45 = vpack.c.bf16 %v3139_v32, %v3138_v43 }
 0x40d   : > { %v3789_v53 = vpop.f32.mrf.mxu1  ;;  %4190 = vmatmul.mubr.bf16.gmra.mxu1 %v3104_v39  ;;  %v7331_v58 = vadd.f32 %v3958_v19, %v3781_v37  ;;  %4366 = vmatprep.mubr.bf16.mxu0 %v3215_v9  ;;  %v3216_v37 = vpack.c.bf16 %v3194_v4, %v3193_v7 }
 0x40e   : > { %4197 = vmatprep.mubr.bf16.mxu1 %v3159_v28  ;;  %v3960_v50 = vpop.f32.mrf.mxu0 }
 0x40f   : > { %v3791_v52 = vpop.f32.mrf.mxu1  ;;  %v3084_v50 = vld [vmem:[#allocation2 + $0xf3] sm:$0xff] }
 0x410   : > { %v3961_v27 = vpop.f32.mrf.mxu0  ;;  %v3106_v7 = vpack.c.bf16 %v3085_v25, %v3084_v50  ;;  %v3197_v25 = vld [vmem:[#allocation2 + $0x115] sm:$0xff]  ;;  %v3198_v50 = vld [vmem:[#allocation2 + $0x11d] sm:$0xff] }
 0x411   : > { %v3792_v47 = vpop.f32.mrf.mxu1  ;;  %v7333_v8 = vadd.f32 %v3961_v27, %v3784_v38  ;;  %v3140_v38 = vld [vmem:[#allocation2 + $0x104] sm:$0xff]  ;;  %v3141_v27 = vld [vmem:[#allocation2 + $0x10c] sm:$0xff] }
 0x412   : > { %v3963_v1 = vpop.f32.mrf.mxu0 }
 0x413   : > { %v3794_v41 = vpop.f32.mrf.mxu1 }
 0x414   : > { %v3966_v56 = vpop.f32.mrf.mxu0  ;;  %4367 = vmatmul.mubr.bf16.gmra.mxu0 %v3159_v28  ;;  %v3161_v28 = vpack.c.bf16 %v3141_v27, %v3140_v38 }
 0x415   : > { %v3797_v39 = vpop.f32.mrf.mxu1  ;;  %4198 = vmatmul.mubr.bf16.gmra.mxu1 %v3105_v18  ;;  %v7335_v9 = vadd.f32 %v3966_v56, %v3789_v53  ;;  %4374 = vmatprep.mubr.bf16.mxu0 %v3216_v37  ;;  %v3217_v53 = vpack.c.bf16 %v3196_v10, %v3195_v44 }
 0x416   : > { %4205 = vmatprep.mubr.bf16.mxu1 %v3160_v45  ;;  %v3968_v52 = vpop.f32.mrf.mxu0 }
 0x417   : > { %v3799_v19 = vpop.f32.mrf.mxu1  ;;  %v3086_v52 = vld [vmem:[#allocation2 + $0x103] sm:$0xff] }
 0x418   : > { %v3969_v41 = vpop.f32.mrf.mxu0  ;;  %v3107_v44 = vpack.c.bf16 %v3087_v22, %v3086_v52  ;;  %v3199_v22 = vld [vmem:[#allocation2 + $0x125] sm:$0xff]  ;;  %v3200_v52 = vld [vmem:[#allocation2 + $0x12d] sm:$0xff] }
 0x419   : > { %v3800_v34 = vpop.f32.mrf.mxu1  ;;  %v7337_v43 = vadd.f32 %v3969_v41, %v3792_v47  ;;  %v3142_v47 = vld [vmem:[#allocation2 + $0x114] sm:$0xff]  ;;  %v3143_v41 = vld [vmem:[#allocation2 + $0x11c] sm:$0xff] }
 0x41a   : > { %v3971_v4 = vpop.f32.mrf.mxu0 }
 0x41b   : > { %v3802_v32 = vpop.f32.mrf.mxu1 }
 0x41c   : > { %v3974_v1 = vpop.f32.mrf.mxu0  ;;  %4375 = vmatmul.mubr.bf16.gmra.mxu0 %v3160_v45  ;;  %v3162_v45 = vpack.c.bf16 %v3143_v41, %v3142_v47 }
 0x41d   : > { %v3805_v18 = vpop.f32.mrf.mxu1  ;;  %4206 = vmatmul.mubr.bf16.gmra.mxu1 %v3106_v7  ;;  %v7339_v37 = vadd.f32 %v3974_v1, %v3797_v39  ;;  %4382 = vmatprep.mubr.bf16.mxu0 %v3217_v53  ;;  %v3218_v39 = vpack.c.bf16 %v3198_v50, %v3197_v25 }
 0x41e   : > { %4213 = vmatprep.mubr.bf16.mxu1 %v3161_v28  ;;  %v3976_v19 = vpop.f32.mrf.mxu0 }
 0x41f   : > { %v3807_v56 = vpop.f32.mrf.mxu1  ;;  %v3088_v19 = vld [vmem:[#allocation2 + $0x113] sm:$0xff] }
 0x420   : > { %v3977_v32 = vpop.f32.mrf.mxu0  ;;  %v3108_v25 = vpack.c.bf16 %v3089_v42, %v3088_v19  ;;  %v3222_v42 = vld [vmem:[#allocation2 + $0x2e] sm:$0xff] }
 0x421   : > { %v3808_v16 = vpop.f32.mrf.mxu1  ;;  %v7341_v38 = vadd.f32 %v3977_v32, %v3800_v34  ;;  %v3144_v34 = vld [vmem:[#allocation2 + $0x124] sm:$0xff]  ;;  %v3145_v32 = vld [vmem:[#allocation2 + $0x12c] sm:$0xff] }
 0x422   : > { %v3979_v10 = vpop.f32.mrf.mxu0 }
 0x423   : > { %v3810_v27 = vpop.f32.mrf.mxu1 }
 0x424   : > { %v3982_v4 = vpop.f32.mrf.mxu0  ;;  %4383 = vmatmul.mubr.bf16.gmra.mxu0 %v3161_v28  ;;  %v3163_v28 = vpack.c.bf16 %v3145_v32, %v3144_v34 }
 0x425   : > { %v3813_v7 = vpop.f32.mrf.mxu1  ;;  %4214 = vmatmul.mubr.bf16.gmra.mxu1 %v3107_v44  ;;  %v7343_v53 = vadd.f32 %v3982_v4, %v3805_v18  ;;  %4390 = vmatprep.mubr.bf16.mxu0 %v3218_v39  ;;  %v3219_v18 = vpack.c.bf16 %v3200_v52, %v3199_v22 }
 0x426   : > { %4221 = vmatprep.mubr.bf16.mxu1 %v3162_v45  ;;  %v3984_v56 = vpop.f32.mrf.mxu0 }
 0x427   : > { %v3815_v1 = vpop.f32.mrf.mxu1 }
 0x428   : > { %v3985_v27 = vpop.f32.mrf.mxu0  ;;  %v3090_v1 = vld [vmem:[#allocation2 + $0x123] sm:$0xff] }
 0x429   : > { %v3816_v20 = vpop.f32.mrf.mxu1  ;;  %v7345_v47 = vadd.f32 %v3985_v27, %v3808_v16  ;;  %v3202_v16 = vld [vmem:[#allocation2 + $0x13d] sm:$0xff]  ;;  %v3109_v22 = vpack.c.bf16 %v3091_v55, %v3090_v1  ;;  %v3226_v55 = vld [vmem:[#allocation2 + $0x4e] sm:$0xff] }
 0x42a   : > { %v3987_v50 = vpop.f32.mrf.mxu0  ;;  %v3220_v52 = vpack.c.bf16 %v3202_v16, %v3201_v36 }
 0x42b   : > { %v3818_v41 = vpop.f32.mrf.mxu1 }
 0x42c   : > { %v3990_v10 = vpop.f32.mrf.mxu0  ;;  %4391 = vmatmul.mubr.bf16.gmra.mxu0 %v3162_v45  ;;  %v3221_v41 = vld [vmem:[#allocation2 + $0x26] sm:$0xff] }
 0x42d   : > { %v3821_v44 = vpop.f32.mrf.mxu1  ;;  %4222 = vmatmul.mubr.bf16.gmra.mxu1 %v3108_v25  ;;  %v7347_v39 = vadd.f32 %v3990_v10, %v3813_v7  ;;  %4398 = vmatprep.mubr.bf16.mxu0 %v3219_v18  ;;  %v3257_v25 = vpack.c.bf16 %v3222_v42, %v3221_v41 }
 0x42e   : > { %4229 = vmatprep.mubr.bf16.mxu1 %v3163_v28  ;;  %v3992_v56 = vpop.f32.mrf.mxu0 }
 0x42f   : > { %v3823_v4 = vpop.f32.mrf.mxu1  ;;  %v3165_v56 = vld [vmem:[#allocation2 + $0x13c] sm:$0xff] }
 0x430   : > { %v3993_v19 = vpop.f32.mrf.mxu0  ;;  %v3164_v4 = vld [vmem:[#allocation2 + $0x134] sm:$0xff] }
 0x431   : > { %v3824_v27 = vpop.f32.mrf.mxu1  ;;  %v7349_v34 = vadd.f32 %v3993_v19, %v3816_v20  ;;  %v3224_v20 = vld [vmem:[#allocation2 + $0x3e] sm:$0xff]  ;;  %v3166_v1 = vpack.c.bf16 %v3165_v56, %v3164_v4  ;;  %v3230_v4 = vld [vmem:[#allocation2 + $0x6e] sm:$0xff] }
 0x432   : > { %v3995_v45 = vpop.f32.mrf.mxu0  ;;  %v3258_v42 = vpack.c.bf16 %v3224_v20, %v3223_v59 }
 0x433   : > { %v3826_v32 = vpop.f32.mrf.mxu1 }
 0x434   : > { %v3998_v50 = vpop.f32.mrf.mxu0  ;;  %4399 = vmatmul.mubr.bf16.gmra.mxu0 %v3163_v28  ;;  %v3225_v32 = vld [vmem:[#allocation2 + $0x46] sm:$0xff] }
 0x435   : > { %v3829_v7 = vpop.f32.mrf.mxu1  ;;  %4230 = vmatmul.mubr.bf16.gmra.mxu1 %v3109_v22  ;;  %v7351_v18 = vadd.f32 %v3998_v50, %v3821_v44  ;;  %4406 = vmatprep.mubr.bf16.mxu0 %v3220_v52  ;;  %v3259_v22 = vpack.c.bf16 %v3226_v55, %v3225_v32  ;;  %v3227_v50 = vld [vmem:[#allocation2 + $0x56] sm:$0xff]  ;;  %v3261_v55 = vpack.c.bf16 %v3230_v4, %v3229_v3 }
 0x436   : > { %5294 = vmatprep.mubr.bf16.mxu1 %v3257_v25  ;;  %v4000_v26 = vpop.f32.mrf.mxu0 }
 0x437   : > { %v3831_v10 = vpop.f32.mrf.mxu1 }
 0x438   : > { %v4001_v36 = vpop.f32.mrf.mxu0  ;;  %v3228_v10 = vld [vmem:[#allocation2 + $0x5e] sm:$0xff] }
 0x439   : > { %v3832_v19 = vpop.f32.mrf.mxu1  ;;  %v7353_v16 = vadd.f32 %v4001_v36, %v3824_v27  ;;  %v3260_v20 = vpack.c.bf16 %v3228_v10, %v3227_v50 }
 0x43a   : > { %v4003_v28 = vpop.f32.mrf.mxu0 }
 0x43b   : > { %v3834_v41 = vpop.f32.mrf.mxu1  ;;  %v3231_v28 = vld [vmem:[#allocation2 + $0x76] sm:$0xff] }
 0x43c   : > { %v4006_v45 = vpop.f32.mrf.mxu0  ;;  %4407 = vmatmul.mubr.bf16.gmra.mxu0 %v3166_v1 }
 0x43d   : > { %v3837_v44 = vpop.f32.mrf.mxu1  ;;  %5295 = vmatmul.mubr.bf16.vlgmr.msra.gmra.mxu1 %v3258_v42  ;;  %v7355_v52 = vadd.f32 %v4006_v45, %v3829_v7 }
 0x43e   : > { %5298 = vmatprep.mubr.bf16.mxu1 %v3259_v22  ;;  %v4008_v25 = vpop.f32.mrf.mxu0  ;;  %v3232_v22 = vld [vmem:[#allocation2 + $0x7e] sm:$0xff] }
 0x43f   : > { %v3839_v26 = vpop.f32.mrf.mxu1  ;;  %v3234_v25 = vld [vmem:[#allocation2 + $0x8e] sm:$0xff]  ;;  %v3262_v50 = vpack.c.bf16 %v3232_v22, %v3231_v28 }
 0x440   : > { %v4009_v27 = vpop.f32.mrf.mxu0  ;;  %v3233_v26 = vld [vmem:[#allocation2 + $0x86] sm:$0xff] }
 0x441   : > { %v3840_v31 = vpop.f32.mrf.mxu1  ;;  %v7357_v56 = vadd.f32 %v4009_v27, %v3832_v19  ;;  %v3263_v3 = vpack.c.bf16 %v3234_v25, %v3233_v26 }
 0x442   : > { %v4011_v32 = vpop.f32.mrf.mxu0 }
 0x443   : > { %v3842_v59 = vpop.f32.mrf.mxu1 }
 0x444   : > { %v4014_v1 = vpop.f32.mrf.mxu0 }
 0x445   : > { %v3845_v36 = vpop.f32.mrf.mxu1  ;;  %5299 = vmatmul.mubr.bf16.gmra.mxu1 %v3260_v20  ;;  %v7359_v7 = vadd.f32 %v4014_v1, %v3837_v44  ;;  %v3236_v1 = vld [vmem:[#allocation2 + $0x9e] sm:$0xff] }
 0x446   : > { %5302 = vmatprep.mubr.bf16.mxu1 %v3261_v55  ;;  %v4016_v42 = vpop.f32.mrf.mxu0  ;;  %v3235_v55 = vld [vmem:[#allocation2 + $0x96] sm:$0xff] }
 0x447   : > { %v3847_v41 = vpop.f32.mrf.mxu1  ;;  %v3237_v42 = vld [vmem:[#allocation2 + $0xa6] sm:$0xff]  ;;  %v3264_v28 = vpack.c.bf16 %v3236_v1, %v3235_v55 }
 0x448   : > { %v4017_v5 = vpop.f32.mrf.mxu0  ;;  %v3265_v26 = vpack.c.bf16 %v3238_v33, %v3237_v42 }
 0x449   : > { %v3848_v45 = vpop.f32.mrf.mxu1  ;;  %v7361_v19 = vadd.f32 %v4017_v5, %v3840_v31 }
 0x44a   : > { %v4019_v10 = vpop.f32.mrf.mxu0 }
 0x44b   : > { %v3850_v27 = vpop.f32.mrf.mxu1 }
 0x44c   : > { %v4022_v59 = vpop.f32.mrf.mxu0 }
 0x44d   : > { %v3853_v4 = vpop.f32.mrf.mxu1  ;;  %5303 = vmatmul.mubr.bf16.gmra.mxu1 %v3262_v50  ;;  %v7363_v44 = vadd.f32 %v4022_v59, %v3845_v36  ;;  %v3240_v59 = vld [vmem:[#allocation2 + $0xbe] sm:$0xff] }
 0x44e   : > { %5306 = vmatprep.mubr.bf16.mxu1 %v3263_v3  ;;  %v4024_v32 = vpop.f32.mrf.mxu0  ;;  %v3239_v3 = vld [vmem:[#allocation2 + $0xb6] sm:$0xff] }
 0x44f   : > { %v3855_v20 = vpop.f32.mrf.mxu1  ;;  %v3241_v32 = vld [vmem:[#allocation2 + $0xc6] sm:$0xff]  ;;  %v3266_v55 = vpack.c.bf16 %v3240_v59, %v3239_v3 }
 0x450   : > { %v4025_v63 = vpop.f32.mrf.mxu0  ;;  %v3267_v33 = vpack.c.bf16 %v3242_v0, %v3241_v32 }
 0x451   : > { %v3856_v41 = vpop.f32.mrf.mxu1  ;;  %v7365_v31 = vadd.f32 %v4025_v63, %v3848_v45 }
 0x452   : > { %v4027_v22 = vpop.f32.mrf.mxu0 }
 0x453   : > { %v3858_v5 = vpop.f32.mrf.mxu1 }
 0x454   : > { %v4030_v27 = vpop.f32.mrf.mxu0 }
 0x455   : > { %v3861_v25 = vpop.f32.mrf.mxu1  ;;  %5307 = vmatmul.mubr.bf16.gmra.mxu1 %v3264_v28  ;;  %v7367_v36 = vadd.f32 %v4030_v27, %v3853_v4  ;;  %v3244_v27 = vld [vmem:[#allocation2 + $0xde] sm:$0xff] }
 0x456   : > { %5310 = vmatprep.mubr.bf16.mxu1 %v3265_v26  ;;  %v4032_v10 = vpop.f32.mrf.mxu0  ;;  %v3243_v26 = vld [vmem:[#allocation2 + $0xd6] sm:$0xff] }
 0x457   : > { %v3863_v50 = vpop.f32.mrf.mxu1  ;;  %v3245_v10 = vld [vmem:[#allocation2 + $0xe6] sm:$0xff]  ;;  %v3268_v3 = vpack.c.bf16 %v3244_v27, %v3243_v26 }
 0x458   : > { %v4033_v35 = vpop.f32.mrf.mxu0  ;;  %v3269_v0 = vpack.c.bf16 %v3246_v48, %v3245_v10  ;;  %v3919_v48 = vadd.f32 %v7311_v30, %v7285_v57 }
 0x459   : > { %v3864_v20 = vpop.f32.mrf.mxu1  ;;  %v7369_v63 = vadd.f32 %v4033_v35, %v3856_v41 }
 0x45a   : > { %v4035_v1 = vpop.f32.mrf.mxu0 }
 0x45b   : > { %v3866_v45 = vpop.f32.mrf.mxu1 }
 0x45c   : > { %v4038_v5 = vpop.f32.mrf.mxu0 }
 0x45d   : > { %v3869_v42 = vpop.f32.mrf.mxu1  ;;  %5311 = vmatmul.mubr.bf16.gmra.mxu1 %v3266_v55  ;;  %v7371_v4 = vadd.f32 %v4038_v5, %v3861_v25  ;;  %v3248_v5 = vld [vmem:[#allocation2 + $0xfe] sm:$0xff] }
 0x45e   : > { %5314 = vmatprep.mubr.bf16.mxu1 %v3267_v33  ;;  %v4040_v22 = vpop.f32.mrf.mxu0  ;;  %v3247_v33 = vld [vmem:[#allocation2 + $0xf6] sm:$0xff] }
 0x45f   : > { %v3871_v28 = vpop.f32.mrf.mxu1  ;;  %v3249_v22 = vld [vmem:[#allocation2 + $0x106] sm:$0xff]  ;;  %v3270_v26 = vpack.c.bf16 %v3248_v5, %v3247_v33  ;;  %v3254_v5 = vld [vmem:[#allocation2 + $0x12e] sm:$0xff] }
 0x460   : > { %v4041_v12 = vpop.f32.mrf.mxu0  ;;  %v3271_v10 = vpack.c.bf16 %v3250_v46, %v3249_v22  ;;  %v3253_v33 = vld [vmem:[#allocation2 + $0x126] sm:$0xff] }
 0x461   : > { %v3872_v50 = vpop.f32.mrf.mxu1  ;;  %v7373_v35 = vadd.f32 %v4041_v12, %v3864_v20 }
 0x462   : > { %v4043_v59 = vpop.f32.mrf.mxu0 }
 0x463   : > { %v3874_v41 = vpop.f32.mrf.mxu1 }
 0x464   : > { %v4046_v45 = vpop.f32.mrf.mxu0 }
 0x465   : > { %v3877_v32 = vpop.f32.mrf.mxu1  ;;  %5315 = vmatmul.mubr.bf16.gmra.mxu1 %v3268_v3  ;;  %v7375_v25 = vadd.f32 %v4046_v45, %v3869_v42  ;;  %v3922_v45 = vadd.f32 %v7313_v51, %v7287_v14  ;;  %v3255_v14 = vld [vmem:[#allocation2 + $0x136] sm:$0xff]  ;;  %v3256_v51 = vld [vmem:[#allocation2 + $0x13e] sm:$0xff] }
 0x466   : > { %5318 = vmatprep.mubr.bf16.mxu1 %v3269_v0  ;;  %v4048_v1 = vpop.f32.mrf.mxu0 }
 0x467   : > { %v3879_v55 = vpop.f32.mrf.mxu1 }
 0x468   : > { %v4049_v60 = vpop.f32.mrf.mxu0  ;;  %v3252_v55 = vld [vmem:[#allocation2 + $0x11e] sm:$0xff] }
 0x469   : > { %v3880_v28 = vpop.f32.mrf.mxu1  ;;  %v7377_v12 = vadd.f32 %v4049_v60, %v3872_v50  ;;  %v3251_v50 = vld [vmem:[#allocation2 + $0x116] sm:$0xff] }
 0x46a   : > { %v4051_v27 = vpop.f32.mrf.mxu0 }
 0x46b   : > { %v3882_v20 = vpop.f32.mrf.mxu1 }
 0x46c   : > { %v4054_v42 = vpop.f32.mrf.mxu0  ;;  %v3272_v20 = vpack.c.bf16 %v3252_v55, %v3251_v50 }
 0x46d   : > { %v4095_v41 = vpop.f32.mrf.mxu1  ;;  %5319 = vmatmul.mubr.bf16.gmra.mxu1 %v3270_v26  ;;  %v7381_v59 = vadd.f32 %v4054_v42, %v3877_v32 }
 0x46e   : > { %v4096_v3 = vadd.f32 %v4095_v41, %v3919_v48  ;;  %5322 = vmatprep.mubr.bf16.mxu1 %v3271_v10  ;;  %v4056_v60 = vpop.f32.mrf.mxu0  ;;  %v3273_v48 = vpack.c.bf16 %v3254_v5, %v3253_v33 }
 0x46f   : > { %v4097_v0 = vpop.f32.mrf.mxu1 }
 0x470   : > { %v4057_v57 = vpop.f32.mrf.mxu0 }
 0x471   : > { %v4098_v1 = vpop.f32.mrf.mxu1  ;;  %v7385_v46 = vadd.f32 %v4057_v57, %v3880_v28 }
 0x472   : > { %v4099_v30 = vadd.f32 %v4098_v1, %v3922_v45  ;;  %v4059_v26 = vpop.f32.mrf.mxu0  ;;  %v3274_v45 = vpack.c.bf16 %v3256_v51, %v3255_v14 }
 0x473   : > { %v4100_v22 = vpop.f32.mrf.mxu1 }
 0x474   : > { %v4272_v10 = vpop.f32.mrf.mxu0 }
 0x475   : > { %v4103_v32 = vpop.f32.mrf.mxu1  ;;  %5323 = vmatmul.mubr.bf16.gmra.mxu1 %v3272_v20  ;;  %v7388_v41 = vadd.f32 %v4272_v10, %v4096_v3 }
 0x476   : > { %v4104_v27 = vadd.f32 %v4103_v32, %v7315_v24  ;;  %5326 = vmatprep.mubr.bf16.mxu1 %v3273_v48  ;;  %v4274_v0 = vpop.f32.mrf.mxu0 }
 0x477   : > { %v4105_v42 = vpop.f32.mrf.mxu1 }
 0x478   : > { %v4275_v1 = vpop.f32.mrf.mxu0 }
 0x479   : > { %v4106_v60 = vpop.f32.mrf.mxu1  ;;  %v7391_v50 = vadd.f32 %v4275_v1, %v4099_v30 }
 0x47a   : > { %v4107_v28 = vadd.f32 %v4106_v60, %v7317_v15  ;;  %v4277_v33 = vpop.f32.mrf.mxu0 }
 0x47b   : > { %v4108_v55 = vpop.f32.mrf.mxu1 }
 0x47c   : > { %v4280_v57 = vpop.f32.mrf.mxu0 }
 0x47d   : > { %v4111_v5 = vpop.f32.mrf.mxu1  ;;  %5327 = vmatmul.mubr.bf16.gmra.mxu1 %v3274_v45  ;;  %v7394_v22 = vadd.f32 %v4280_v57, %v4104_v27 }
 0x47e   : > { %v4112_v24 = vadd.f32 %v4111_v5, %v7319_v11  ;;  %v4282_v20 = vpop.f32.mrf.mxu0 }
 0x47f   : > { %v4113_v3 = vpop.f32.mrf.mxu1 }
 0x480   : > { %v4283_v32 = vpop.f32.mrf.mxu0 }
 0x481   : > { %v4114_v26 = vpop.f32.mrf.mxu1  ;;  %v7397_v10 = vadd.f32 %v4283_v32, %v4107_v28 }
 0x482   : > { %v4115_v48 = vadd.f32 %v4114_v26, %v7321_v21  ;;  %v4285_v30 = vpop.f32.mrf.mxu0 }
 0x483   : > { %v4116_v15 = vpop.f32.mrf.mxu1 }
 0x484   : > { %v4288_v42 = vpop.f32.mrf.mxu0 }
 0x485   : > { %v4119_v14 = vpop.f32.mrf.mxu1  ;;  %v7400_v0 = vadd.f32 %v4288_v42, %v4112_v24 }
 0x486   : > { %v4120_v51 = vadd.f32 %v4119_v14, %v7323_v61  ;;  %v4290_v60 = vpop.f32.mrf.mxu0 }
 0x487   : > { %v4121_v11 = vpop.f32.mrf.mxu1 }
 0x488   : > { %v4291_v1 = vpop.f32.mrf.mxu0 }
 0x489   : > { %v4122_v27 = vpop.f32.mrf.mxu1  ;;  %v7403_v55 = vadd.f32 %v4291_v1, %v4115_v48 }
 0x48a   : > { %v4123_v45 = vadd.f32 %v4122_v27, %v7325_v23  ;;  %v4293_v33 = vpop.f32.mrf.mxu0 }
 0x48b   : > { %v4124_v21 = vpop.f32.mrf.mxu1 }
 0x48c   : > { %v4296_v57 = vpop.f32.mrf.mxu0 }
 0x48d   : > { %v4127_v28 = vpop.f32.mrf.mxu1  ;;  %v7406_v3 = vadd.f32 %v4296_v57, %v4120_v51 }
 0x48e   : > { %v4128_v5 = vadd.f32 %v4127_v28, %v7327_v40  ;;  %v4298_v20 = vpop.f32.mrf.mxu0 }
 0x48f   : > { %v4129_v61 = vpop.f32.mrf.mxu1 }
 0x490   : > { %v4299_v32 = vpop.f32.mrf.mxu0 }
 0x491   : > { %v4130_v24 = vpop.f32.mrf.mxu1  ;;  %v7409_v15 = vadd.f32 %v4299_v32, %v4123_v45 }
 0x492   : > { %v4131_v26 = vadd.f32 %v4130_v24, %v7329_v17  ;;  %v4301_v30 = vpop.f32.mrf.mxu0 }
 0x493   : > { %v4132_v23 = vpop.f32.mrf.mxu1 }
 0x494   : > { %v4304_v42 = vpop.f32.mrf.mxu0 }
 0x495   : > { %v4135_v48 = vpop.f32.mrf.mxu1  ;;  %v7412_v11 = vadd.f32 %v4304_v42, %v4128_v5 }
 0x496   : > { %v4136_v14 = vadd.f32 %v4135_v48, %v7331_v58  ;;  %v4306_v60 = vpop.f32.mrf.mxu0 }
 0x497   : > { %v4137_v40 = vpop.f32.mrf.mxu1 }
 0x498   : > { %v4307_v1 = vpop.f32.mrf.mxu0 }
 0x499   : > { %v4138_v51 = vpop.f32.mrf.mxu1  ;;  %v7415_v21 = vadd.f32 %v4307_v1, %v4131_v26 }
 0x49a   : > { %v4139_v27 = vadd.f32 %v4138_v51, %v7333_v8  ;;  %v4309_v33 = vpop.f32.mrf.mxu0 }
 0x49b   : > { %v4140_v17 = vpop.f32.mrf.mxu1 }
 0x49c   : > { %v4312_v57 = vpop.f32.mrf.mxu0 }
 0x49d   : > { %v4143_v45 = vpop.f32.mrf.mxu1  ;;  %v7418_v61 = vadd.f32 %v4312_v57, %v4136_v14 }
 0x49e   : > { %v4144_v28 = vadd.f32 %v4143_v45, %v7335_v9  ;;  %v4314_v20 = vpop.f32.mrf.mxu0 }
 0x49f   : > { %v4145_v58 = vpop.f32.mrf.mxu1 }
 0x4a0   : > { %v4315_v32 = vpop.f32.mrf.mxu0 }
 0x4a1   : > { %v4146_v5 = vpop.f32.mrf.mxu1  ;;  %v7421_v23 = vadd.f32 %v4315_v32, %v4139_v27 }
 0x4a2   : > { %v4147_v24 = vadd.f32 %v4146_v5, %v7337_v43  ;;  %v4317_v30 = vpop.f32.mrf.mxu0 }
 0x4a3   : > { %v4148_v8 = vpop.f32.mrf.mxu1 }
 0x4a4   : > { %v4320_v42 = vpop.f32.mrf.mxu0 }
 0x4a5   : > { %v4151_v26 = vpop.f32.mrf.mxu1  ;;  %v7424_v40 = vadd.f32 %v4320_v42, %v4144_v28 }
 0x4a6   : > { %v4152_v48 = vadd.f32 %v4151_v26, %v7339_v37  ;;  %v4322_v60 = vpop.f32.mrf.mxu0 }
 0x4a7   : > { %v4153_v9 = vpop.f32.mrf.mxu1 }
 0x4a8   : > { %v4323_v1 = vpop.f32.mrf.mxu0 }
 0x4a9   : > { %v4154_v14 = vpop.f32.mrf.mxu1  ;;  %v7427_v17 = vadd.f32 %v4323_v1, %v4147_v24 }
 0x4aa   : > { %v4155_v51 = vadd.f32 %v4154_v14, %v7341_v38  ;;  %v4325_v33 = vpop.f32.mrf.mxu0 }
 0x4ab   : > { %v4156_v43 = vpop.f32.mrf.mxu1 }
 0x4ac   : > { %v4328_v57 = vpop.f32.mrf.mxu0 }
 0x4ad   : > { %v4159_v27 = vpop.f32.mrf.mxu1  ;;  %v7430_v58 = vadd.f32 %v4328_v57, %v4152_v48 }
 0x4ae   : > { %v4160_v45 = vadd.f32 %v4159_v27, %v7343_v53  ;;  %v4330_v20 = vpop.f32.mrf.mxu0 }
 0x4af   : > { %v4161_v37 = vpop.f32.mrf.mxu1 }
 0x4b0   : > { %v4331_v32 = vpop.f32.mrf.mxu0 }
 0x4b1   : > { %v4162_v28 = vpop.f32.mrf.mxu1  ;;  %v7433_v8 = vadd.f32 %v4331_v32, %v4155_v51 }
 0x4b2   : > { %v4163_v5 = vadd.f32 %v4162_v28, %v7345_v47  ;;  %v4333_v30 = vpop.f32.mrf.mxu0 }
 0x4b3   : > { %v4164_v38 = vpop.f32.mrf.mxu1 }
 0x4b4   : > { %v4336_v42 = vpop.f32.mrf.mxu0 }
 0x4b5   : > { %v4167_v24 = vpop.f32.mrf.mxu1  ;;  %v7436_v9 = vadd.f32 %v4336_v42, %v4160_v45 }
 0x4b6   : > { %v4168_v26 = vadd.f32 %v4167_v24, %v7347_v39  ;;  %v4338_v60 = vpop.f32.mrf.mxu0 }
 0x4b7   : > { %v4169_v53 = vpop.f32.mrf.mxu1 }
 0x4b8   : > { %v4339_v1 = vpop.f32.mrf.mxu0 }
 0x4b9   : > { %v4170_v48 = vpop.f32.mrf.mxu1  ;;  %v7439_v43 = vadd.f32 %v4339_v1, %v4163_v5 }
 0x4ba   : > { %v4171_v14 = vadd.f32 %v4170_v48, %v7349_v34  ;;  %v4341_v33 = vpop.f32.mrf.mxu0 }
 0x4bb   : > { %v4172_v47 = vpop.f32.mrf.mxu1 }
 0x4bc   : > { %v4344_v57 = vpop.f32.mrf.mxu0 }
 0x4bd   : > { %v4175_v51 = vpop.f32.mrf.mxu1  ;;  %v7442_v37 = vadd.f32 %v4344_v57, %v4168_v26 }
 0x4be   : > { %v4176_v27 = vadd.f32 %v4175_v51, %v7351_v18  ;;  %v4346_v20 = vpop.f32.mrf.mxu0 }
 0x4bf   : > { %v4177_v39 = vpop.f32.mrf.mxu1 }
 0x4c0   : > { %v4347_v32 = vpop.f32.mrf.mxu0 }
 0x4c1   : > { %v4178_v45 = vpop.f32.mrf.mxu1  ;;  %v7445_v38 = vadd.f32 %v4347_v32, %v4171_v14 }
 0x4c2   : > { %v4179_v28 = vadd.f32 %v4178_v45, %v7353_v16  ;;  %v4349_v30 = vpop.f32.mrf.mxu0 }
 0x4c3   : > { %v4180_v34 = vpop.f32.mrf.mxu1 }
 0x4c4   : > { %v4352_v42 = vpop.f32.mrf.mxu0 }
 0x4c5   : > { %v4183_v5 = vpop.f32.mrf.mxu1  ;;  %v7448_v53 = vadd.f32 %v4352_v42, %v4176_v27 }
 0x4c6   : > { %v4184_v24 = vadd.f32 %v4183_v5, %v7355_v52  ;;  %v4354_v60 = vpop.f32.mrf.mxu0 }
 0x4c7   : > { %v4185_v18 = vpop.f32.mrf.mxu1 }
 0x4c8   : > { %v4355_v1 = vpop.f32.mrf.mxu0 }
 0x4c9   : > { %v4186_v26 = vpop.f32.mrf.mxu1  ;;  %v7451_v47 = vadd.f32 %v4355_v1, %v4179_v28 }
 0x4ca   : > { %v4187_v48 = vadd.f32 %v4186_v26, %v7357_v56  ;;  %v4357_v33 = vpop.f32.mrf.mxu0 }
 0x4cb   : > { %v4188_v16 = vpop.f32.mrf.mxu1 }
 0x4cc   : > { %v4360_v57 = vpop.f32.mrf.mxu0 }
 0x4cd   : > { %v4191_v14 = vpop.f32.mrf.mxu1  ;;  %v7454_v39 = vadd.f32 %v4360_v57, %v4184_v24 }
 0x4ce   : > { %v4192_v51 = vadd.f32 %v4191_v14, %v7359_v7  ;;  %v4362_v20 = vpop.f32.mrf.mxu0 }
 0x4cf   : > { %v4193_v52 = vpop.f32.mrf.mxu1 }
 0x4d0   : > { %v4363_v32 = vpop.f32.mrf.mxu0 }
 0x4d1   : > { %v4194_v27 = vpop.f32.mrf.mxu1  ;;  %v7457_v34 = vadd.f32 %v4363_v32, %v4187_v48 }
 0x4d2   : > { %v4195_v45 = vadd.f32 %v4194_v27, %v7361_v19  ;;  %v4365_v30 = vpop.f32.mrf.mxu0 }
 0x4d3   : > { %v4196_v56 = vpop.f32.mrf.mxu1 }
 0x4d4   : > { %v4368_v42 = vpop.f32.mrf.mxu0 }
 0x4d5   : > { %v4199_v28 = vpop.f32.mrf.mxu1  ;;  %v7460_v18 = vadd.f32 %v4368_v42, %v4192_v51 }
 0x4d6   : > { %v4200_v5 = vadd.f32 %v4199_v28, %v7363_v44  ;;  %v4370_v60 = vpop.f32.mrf.mxu0 }
 0x4d7   : > { %v4201_v7 = vpop.f32.mrf.mxu1 }
 0x4d8   : > { %v4371_v1 = vpop.f32.mrf.mxu0 }
 0x4d9   : > { %v4202_v24 = vpop.f32.mrf.mxu1  ;;  %v7463_v16 = vadd.f32 %v4371_v1, %v4195_v45 }
 0x4da   : > { %v4203_v26 = vadd.f32 %v4202_v24, %v7365_v31  ;;  %v4373_v33 = vpop.f32.mrf.mxu0 }
 0x4db   : > { %v4204_v19 = vpop.f32.mrf.mxu1 }
 0x4dc   : > { %v4376_v57 = vpop.f32.mrf.mxu0 }
 0x4dd   : > { %v4207_v48 = vpop.f32.mrf.mxu1  ;;  %v7466_v52 = vadd.f32 %v4376_v57, %v4200_v5 }
 0x4de   : > { %v4208_v14 = vadd.f32 %v4207_v48, %v7367_v36  ;;  %v4378_v20 = vpop.f32.mrf.mxu0 }
 0x4df   : > { %v4209_v44 = vpop.f32.mrf.mxu1 }
 0x4e0   : > { %v4379_v32 = vpop.f32.mrf.mxu0 }
 0x4e1   : > { %v4210_v51 = vpop.f32.mrf.mxu1  ;;  %v7469_v56 = vadd.f32 %v4379_v32, %v4203_v26 }
 0x4e2   : > { %v4211_v27 = vadd.f32 %v4210_v51, %v7369_v63  ;;  %v4381_v30 = vpop.f32.mrf.mxu0 }
 0x4e3   : > { %v4212_v31 = vpop.f32.mrf.mxu1 }
 0x4e4   : > { %v4384_v42 = vpop.f32.mrf.mxu0 }
 0x4e5   : > { %v4215_v45 = vpop.f32.mrf.mxu1  ;;  %v7472_v7 = vadd.f32 %v4384_v42, %v4208_v14 }
 0x4e6   : > { %v4216_v28 = vadd.f32 %v4215_v45, %v7371_v4  ;;  %v4386_v60 = vpop.f32.mrf.mxu0 }
 0x4e7   : > { %v4217_v36 = vpop.f32.mrf.mxu1 }
 0x4e8   : > { %v4387_v1 = vpop.f32.mrf.mxu0 }
 0x4e9   : > { %v4218_v5 = vpop.f32.mrf.mxu1  ;;  %v7475_v19 = vadd.f32 %v4387_v1, %v4211_v27 }
 0x4ea   : > { %v4219_v24 = vadd.f32 %v4218_v5, %v7373_v35  ;;  %v4389_v33 = vpop.f32.mrf.mxu0 }
 0x4eb   : > { %v4220_v63 = vpop.f32.mrf.mxu1 }
 0x4ec   : > { %v4392_v57 = vpop.f32.mrf.mxu0 }
 0x4ed   : > { %v4223_v26 = vpop.f32.mrf.mxu1  ;;  %v7478_v44 = vadd.f32 %v4392_v57, %v4216_v28 }
 0x4ee   : > { %v4224_v48 = vadd.f32 %v4223_v26, %v7375_v25  ;;  %v4394_v20 = vpop.f32.mrf.mxu0 }
 0x4ef   : > { %v4225_v4 = vpop.f32.mrf.mxu1 }
 0x4f0   : > { %v4395_v32 = vpop.f32.mrf.mxu0 }
 0x4f1   : > { %v4226_v14 = vpop.f32.mrf.mxu1  ;;  %v7481_v31 = vadd.f32 %v4395_v32, %v4219_v24 }
 0x4f2   : > { %v4227_v51 = vadd.f32 %v4226_v14, %v7377_v12  ;;  %v4397_v30 = vpop.f32.mrf.mxu0 }
 0x4f3   : > { %v4228_v35 = vpop.f32.mrf.mxu1 }
 0x4f4   : > { %v4400_v42 = vpop.f32.mrf.mxu0 }
 0x4f5   : > { %v4231_v27 = vpop.f32.mrf.mxu1  ;;  %v7484_v36 = vadd.f32 %v4400_v42, %v4224_v48 }
 0x4f6   : > { %v4232_v45 = vadd.f32 %v4231_v27, %v7381_v59  ;;  %v4402_v60 = vpop.f32.mrf.mxu0 }
 0x4f7   : > { %v4233_v25 = vpop.f32.mrf.mxu1 }
 0x4f8   : > { %v4403_v1 = vpop.f32.mrf.mxu0 }
 0x4f9   : > { %v4234_v28 = vpop.f32.mrf.mxu1  ;;  %v7487_v63 = vadd.f32 %v4403_v1, %v4227_v51 }
 0x4fa   : > { %v4235_v5 = vadd.f32 %v4234_v28, %v7385_v46  ;;  %v4405_v33 = vpop.f32.mrf.mxu0  ;;  %v8305_v28 = vld [vmem:[#allocation40_spill] sm:$0xff] }
 0x4fb   : > { %v4236_v12 = vpop.f32.mrf.mxu1 }
 0x4fc   : > { %v4408_v26 = vpop.f32.mrf.mxu0  ;;  %v8306_v12 = vld [vmem:[#allocation42_spill] sm:$0xff] }
 0x4fd   : > { %v5296_v24 = vpop.f32.mrf.mxu1  ;;  %v7489_v57 = vadd.f32 %v4408_v26, %v4232_v45  ;;  %v8304_v45 = vld [vmem:[#allocation39_spill] sm:$0xff] }
 0x4fe   : > { %v4410_v20 = vpop.f32.mrf.mxu0  ;;  %v7497_v46 = vadd.f32 %v5296_v24, %v7394_v22 }
 0x4ff   : > { %v4449_v4 = vpop.f32.mrf.mxu1 }
 0x500   : > { %v7492_v48 = vadd.f32 %v4449_v4, %v7388_v41  ;;  %v4411_v14 = vpop.f32.mrf.mxu0 }
 0x501   : > { %v5297_v59 = vpop.f32.mrf.mxu1  ;;  %v7494_v32 = vadd.f32 %v4411_v14, %v4235_v5  ;;  %v4594_v5 = vmul.f32 %v7497_v46, %v8305_v28 }
 0x502   : > { %v4413_v30 = vpop.f32.mrf.mxu0  ;;  %v4592_v42 = vmul.f32 %v7492_v48, %v8304_v45  ;;  %v7505_v25 = vadd.f32 %v5297_v59, %v7397_v10 }
 0x503   : > { %v4452_v35 = vpop.f32.mrf.mxu1  ;;  %v8307_v30 = vld [vmem:[#allocation44_spill] sm:$0xff] }
 0x504   : > { %v7500_v51 = vadd.f32 %v4452_v35, %v7391_v50  ;;  %v4595_v33 = vmul.f32 %v7505_v25, %v8306_v12 }
 0x505   : > { %v5300_v27 = vpop.f32.mrf.mxu1 }
 0x506   : > { %v4593_v41 = vmul.f32 %v7500_v51, %v8279_v54  ;;  %v7517_v10 = vadd.f32 %v5300_v27, %v7406_v3 }
 0x507   : > { %v4465_v60 = vpop.f32.mrf.mxu1 }
 0x508   : > { %v4628_v22 = vadd.f32 %v4593_v41, %v4592_v42  ;;  %v7512_v1 = vadd.f32 %v4465_v60, %v7400_v0  ;;  %v4598_v3 = vmul.f32 %v7517_v10, %v8281_v13 }
 0x509   : > { %v5301_v50 = vpop.f32.mrf.mxu1 }
 0x50a   : > { %v4629_v24 = vadd.f32 %v4628_v22, %v4594_v5  ;;  %v4596_v4 = vmul.f32 %v7512_v1, %v6334_v2  ;;  %v7525_v0 = vadd.f32 %v5301_v50, %v7409_v15 }
 0x50b   : > { %v4468_v26 = vpop.f32.mrf.mxu1 }
 0x50c   : > { %v4630_v20 = vadd.f32 %v4629_v24, %v4595_v33  ;;  %v7522_v59 = vadd.f32 %v4468_v26, %v7403_v55  ;;  %v4599_v55 = vmul.f32 %v7525_v0, %v8282_v62 }
 0x50d   : > { %v5304_v14 = vpop.f32.mrf.mxu1 }
 0x50e   : > { %v4631_v35 = vadd.f32 %v4630_v20, %v4596_v4  ;;  %v4597_v42 = vmul.f32 %v7522_v59, %v8307_v30  ;;  %v7537_v15 = vadd.f32 %v5304_v14, %v7418_v61 }
 0x50f   : > { %v4481_v41 = vpop.f32.mrf.mxu1 }
 0x510   : > { %v4632_v27 = vadd.f32 %v4631_v35, %v4597_v42  ;;  %v7532_v60 = vadd.f32 %v4481_v41, %v7412_v11  ;;  %v4602_v61 = vmul.f32 %v7537_v15, %v8258_v6 }
 0x511   : > { %v5305_v5 = vpop.f32.mrf.mxu1 }
 0x512   : > { %v4633_v22 = vadd.f32 %v4632_v27, %v4598_v3  ;;  %v4600_v50 = vmul.f32 %v7532_v60, %v8283_v29  ;;  %v7545_v11 = vadd.f32 %v5305_v5, %v7421_v23  ;;  %v8308_v27 = vld [vmem:[#allocation50_spill] sm:$0xff]  ;;  %v8310_v5 = vld [vmem:[#allocation51_spill] sm:$0xff] }
 0x513   : > { %v4484_v33 = vpop.f32.mrf.mxu1 }
 0x514   : > { %v4634_v24 = vadd.f32 %v4633_v22, %v4599_v55  ;;  %v7542_v26 = vadd.f32 %v4484_v33, %v7415_v21  ;;  %v4603_v21 = vmul.f32 %v7545_v11, %v8308_v27 }
 0x515   : > { %v5308_v4 = vpop.f32.mrf.mxu1 }
 0x516   : > { %v4635_v20 = vadd.f32 %v4634_v24, %v4600_v50  ;;  %v4601_v35 = vmul.f32 %v7542_v26, %v8284_v49  ;;  %v7557_v23 = vadd.f32 %v5308_v4, %v7430_v58 }
 0x517   : > { %v4497_v42 = vpop.f32.mrf.mxu1 }
 0x518   : > { %v4636_v14 = vadd.f32 %v4635_v20, %v4601_v35  ;;  %v7552_v41 = vadd.f32 %v4497_v42, %v7424_v40  ;;  %8309 = vst [vmem:[#allocation76_spill] sm:$0xff] %v7557_v23  ;;  %v8313_v42 = vld [vmem:[#allocation52_spill] sm:$0xff] }
 0x519   : > { %v5309_v3 = vpop.f32.mrf.mxu1 }
 0x51a   : > { %v4637_v55 = vadd.f32 %v4636_v14, %v4602_v61  ;;  %v4604_v33 = vmul.f32 %v7552_v41, %v8310_v5  ;;  %v7565_v40 = vadd.f32 %v5309_v3, %v7433_v8  ;;  %v8314_v14 = vld [vmem:[#allocation53_spill] sm:$0xff]  ;;  %v8316_v3 = vld [vmem:[#allocation55_spill] sm:$0xff] }
 0x51b   : > { %v4500_v22 = vpop.f32.mrf.mxu1  ;;  %v4606_v58 = vmul.f32 %v7557_v23, %v8314_v14  ;;  %v8326_v23 = vld [vmem:[#allocation65_spill] sm:$0xff] }
 0x51c   : > { %v4638_v50 = vadd.f32 %v4637_v55, %v4603_v21  ;;  %v7562_v24 = vadd.f32 %v4500_v22, %v7427_v17  ;;  %8312 = vst [vmem:[#allocation78_spill] sm:$0xff] %v7565_v40  ;;  %v8315_v55 = vld [vmem:[#allocation54_spill] sm:$0xff] }
 0x51d   : > { %v5312_v20 = vpop.f32.mrf.mxu1  ;;  %v4607_v17 = vmul.f32 %v7565_v40, %v8315_v55 }
 0x51e   : > { %8311 = vst [vmem:[#allocation77_spill] sm:$0xff] %v7562_v24  ;;  %v4639_v35 = vadd.f32 %v4638_v50, %v4604_v33  ;;  %v4605_v27 = vmul.f32 %v7562_v24, %v8313_v42  ;;  %v7577_v8 = vadd.f32 %v5312_v20, %v7442_v37 }
 0x51f   : > { %v4513_v61 = vpop.f32.mrf.mxu1 }
 0x520   : > { %v4640_v4 = vadd.f32 %v4639_v35, %v4605_v27  ;;  %v7572_v6 = vadd.f32 %v4513_v61, %v7436_v9  ;;  %v8317_v61 = vld [vmem:[#allocation56_spill] sm:$0xff] }
 0x521   : > { %v5313_v21 = vpop.f32.mrf.mxu1 }
 0x522   : > { %v4641_v22 = vadd.f32 %v4640_v4, %v4606_v58  ;;  %v4608_v50 = vmul.f32 %v7572_v6, %v8316_v3  ;;  %v7585_v9 = vadd.f32 %v5313_v21, %v7445_v38  ;;  %v8318_v4 = vld [vmem:[#allocation57_spill] sm:$0xff]  ;;  %v8320_v21 = vld [vmem:[#allocation59_spill] sm:$0xff] }
 0x523   : > { %v4516_v33 = vpop.f32.mrf.mxu1  ;;  %v4610_v37 = vmul.f32 %v7577_v8, %v8318_v4 }
 0x524   : > { %v4642_v42 = vadd.f32 %v4641_v22, %v4607_v17  ;;  %v7582_v5 = vadd.f32 %v4516_v33, %v7439_v43  ;;  %v8319_v22 = vld [vmem:[#allocation58_spill] sm:$0xff] }
 0x525   : > { %v5316_v27 = vpop.f32.mrf.mxu1  ;;  %v4611_v43 = vmul.f32 %v7585_v9, %v8319_v22 }
 0x526   : > { %v4643_v35 = vadd.f32 %v4642_v42, %v4608_v50  ;;  %v4609_v55 = vmul.f32 %v7582_v5, %v8317_v61  ;;  %v7597_v38 = vadd.f32 %v5316_v27, %v7454_v39 }
 0x527   : > { %v4529_v58 = vpop.f32.mrf.mxu1 }
 0x528   : > { %v4644_v20 = vadd.f32 %v4643_v35, %v4609_v55  ;;  %v7592_v14 = vadd.f32 %v4529_v58, %v7448_v53  ;;  %v8321_v58 = vld [vmem:[#allocation60_spill] sm:$0xff] }
 0x529   : > { %v5317_v17 = vpop.f32.mrf.mxu1 }
 0x52a   : > { %v4645_v33 = vadd.f32 %v4644_v20, %v4610_v37  ;;  %v4612_v50 = vmul.f32 %v7592_v14, %v8320_v21  ;;  %v7605_v53 = vadd.f32 %v5317_v17, %v7457_v34  ;;  %v8322_v20 = vld [vmem:[#allocation61_spill] sm:$0xff]  ;;  %v8324_v17 = vld [vmem:[#allocation63_spill] sm:$0xff] }
 0x52b   : > { %v4532_v42 = vpop.f32.mrf.mxu1  ;;  %v4614_v39 = vmul.f32 %v7597_v38, %v8322_v20 }
 0x52c   : > { %v4646_v61 = vadd.f32 %v4645_v33, %v4611_v43  ;;  %v7602_v3 = vadd.f32 %v4532_v42, %v7451_v47  ;;  %v8323_v33 = vld [vmem:[#allocation62_spill] sm:$0xff] }
 0x52d   : > { %v5320_v55 = vpop.f32.mrf.mxu1  ;;  %v4615_v47 = vmul.f32 %v7605_v53, %v8323_v33 }
 0x52e   : > { %v4647_v35 = vadd.f32 %v4646_v61, %v4612_v50  ;;  %v4613_v22 = vmul.f32 %v7602_v3, %v8321_v58  ;;  %v4554_v34 = vadd.f32 %v5320_v55, %v7466_v52  ;;  %v8327_v52 = vld [vmem:[#allocation66_spill] sm:$0xff] }
 0x52f   : > { %v4545_v37 = vpop.f32.mrf.mxu1 }
 0x530   : > { %v4648_v27 = vadd.f32 %v4647_v35, %v4613_v22  ;;  %v7612_v4 = vadd.f32 %v4545_v37, %v7460_v18  ;;  %v8325_v18 = vld [vmem:[#allocation64_spill] sm:$0xff]  ;;  %v4618_v49 = vmul.f32 %v4554_v34, %v8326_v23 }
 0x531   : > { %v5321_v43 = vpop.f32.mrf.mxu1  ;;  %v8329_v23 = vld [vmem:[#allocation68_spill] sm:$0xff] }
 0x532   : > { %v4649_v42 = vadd.f32 %v4648_v27, %v4614_v39  ;;  %v4616_v50 = vmul.f32 %v7612_v4, %v8324_v17  ;;  %v4557_v22 = vadd.f32 %v5321_v43, %v7469_v56 }
 0x533   : > { %v4548_v61 = vpop.f32.mrf.mxu1 }
 0x534   : > { %v4650_v58 = vadd.f32 %v4649_v42, %v4615_v47  ;;  %v4549_v21 = vadd.f32 %v4548_v61, %v7463_v16  ;;  %v4619_v55 = vmul.f32 %v4557_v22, %v8327_v52  ;;  %v8328_v16 = vld [vmem:[#allocation67_spill] sm:$0xff]  ;;  %v8331_v52 = vld [vmem:[#allocation70_spill] sm:$0xff] }
 0x535   : > { %v5324_v40 = vpop.f32.mrf.mxu1 }
 0x536   : > { %v4651_v20 = vadd.f32 %v4650_v58, %v4616_v50  ;;  %v4617_v35 = vmul.f32 %v4549_v21, %v8325_v18  ;;  %v4570_v47 = vadd.f32 %v5324_v40, %v7478_v44 }
 0x537   : > { %v4561_v37 = vpop.f32.mrf.mxu1 }
 0x538   : > { %v4652_v33 = vadd.f32 %v4651_v20, %v4617_v35  ;;  %v4562_v39 = vadd.f32 %v4561_v37, %v7472_v7  ;;  %v8330_v7 = vld [vmem:[#allocation69_spill] sm:$0xff] }
 0x539   : > { %v5325_v27 = vpop.f32.mrf.mxu1  ;;  %v4622_v37 = vmul.f32 %v4570_v47, %v8330_v7 }
 0x53a   : > { %v4653_v24 = vadd.f32 %v4652_v33, %v4618_v49  ;;  %v4620_v42 = vmul.f32 %v4562_v39, %v8328_v16  ;;  %v4573_v50 = vadd.f32 %v5325_v27, %v7481_v31 }
 0x53b   : > { %v4564_v17 = vpop.f32.mrf.mxu1 }
 0x53c   : > { %v4654_v58 = vadd.f32 %v4653_v24, %v4619_v55  ;;  %v4565_v56 = vadd.f32 %v4564_v17, %v7475_v19  ;;  %v4623_v44 = vmul.f32 %v4573_v50, %v8331_v52  ;;  %v8332_v19 = vld [vmem:[#allocation71_spill] sm:$0xff] }
 0x53d   : > { %v5328_v43 = vpop.f32.mrf.mxu1 }
 0x53e   : > { %v4655_v61 = vadd.f32 %v4654_v58, %v4620_v42  ;;  %v4621_v20 = vmul.f32 %v4565_v56, %v8329_v23  ;;  %v4586_v24 = vadd.f32 %v5328_v43, %v7489_v57  ;;  %v8333_v58 = vld [vmem:[#allocation72_spill] sm:$0xff] }
 0x53f   : > { %v4577_v35 = vpop.f32.mrf.mxu1 }
 0x540   : > { %v4656_v18 = vadd.f32 %v4655_v61, %v4621_v20  ;;  %v4578_v49 = vadd.f32 %v4577_v35, %v7484_v36  ;;  %v8334_v61 = vld [vmem:[#allocation73_spill] sm:$0xff]  ;;  %v8335_v35 = vld [vmem:[#allocation74_spill] sm:$0xff] }
 0x541   : > { %v5329_v33 = vpop.f32.mrf.mxu1  ;;  %v4626_v20 = vmul.f32 %v4586_v24, %v8334_v61 }
 0x542   : > { %v4657_v40 = vadd.f32 %v4656_v18, %v4622_v37  ;;  %v4624_v17 = vmul.f32 %v4578_v49, %v8332_v19  ;;  %v4589_v42 = vadd.f32 %v5329_v33, %v7494_v32 }
 0x543   : > { %v4580_v16 = vpop.f32.mrf.mxu1 }
 0x544   : > { %v4658_v55 = vadd.f32 %v4657_v40, %v4623_v44  ;;  %v4581_v31 = vadd.f32 %v4580_v16, %v7487_v63  ;;  %v4627_v23 = vmul.f32 %v4589_v42, %v8335_v35 }
 0x546   : > { %v4659_v27 = vadd.f32 %v4658_v55, %v4624_v17  ;;  %v4625_v7 = vmul.f32 %v4581_v31, %v8333_v58 }
 0x548   : > { %v4660_v36 = vadd.f32 %v4659_v27, %v4625_v7 }
 0x54a   : > { %v4661_v52 = vadd.f32 %v4660_v36, %v4626_v20 }
 0x54c   : > { %v4662_v18 = vadd.f32 %v4661_v52, %v4627_v23 }
 0x54e   : > { %v4663_v37 = vrot.slane %v4662_v18, 4 }
 0x550   : > { %v4664_v29 = vadd.f32 %v4663_v37, %v4662_v18 }
 0x552   : > { %v4665_v57 = vrot.slane %v4664_v29, 2 }
 0x554   : > { %v4666_v43 = vadd.f32 %v4665_v57, %v4664_v29 }
 0x556   : > { %v4667_v19 = vrot.slane %v4666_v43, 1 }
 0x558   : > { %v4668_v44 = vadd.f32 %v4667_v19, %v4666_v43 }
 0x55a   : > { %v7640_v40 = vmul.f32 0.00390625, %v4668_v44 }
 0x55c   : > { %v7644_v63 = vsub.f32 %v7572_v6, %v7640_v40  ;;  %v7648_v32 = vsub.f32 %v7582_v5, %v7640_v40  ;;  %v7652_v16 = vsub.f32 %v7577_v8, %v7640_v40  ;;  %v7656_v23 = vsub.f32 %v7585_v9, %v7640_v40 }
 0x55d   : > { %v7660_v29 = vsub.f32 %v7592_v14, %v7640_v40  ;;  %v7664_v6 = vsub.f32 %v7602_v3, %v7640_v40  ;;  %v7668_v5 = vsub.f32 %v7597_v38, %v7640_v40  ;;  %v7672_v8 = vsub.f32 %v7605_v53, %v7640_v40 }
 0x55e   : > { %v7676_v9 = vsub.f32 %v7612_v4, %v7640_v40  ;;  %v7679_v52 = vsub.f32 %v4549_v21, %v7640_v40  ;;  %v7682_v14 = vsub.f32 %v4554_v34, %v7640_v40  ;;  %v7685_v3 = vsub.f32 %v4557_v22, %v7640_v40 }
 0x55f   : > { %v7688_v38 = vsub.f32 %v4562_v39, %v7640_v40  ;;  %v7691_v7 = vsub.f32 %v4565_v56, %v7640_v40  ;;  %v7694_v53 = vsub.f32 %v4570_v47, %v7640_v40  ;;  %v7697_v4 = vsub.f32 %v4573_v50, %v7640_v40 }
 0x560   : > { %v7700_v21 = vsub.f32 %v4578_v49, %v7640_v40  ;;  %v7703_v34 = vsub.f32 %v4581_v31, %v7640_v40  ;;  %v7706_v22 = vsub.f32 %v4586_v24, %v7640_v40  ;;  %v7709_v39 = vsub.f32 %v4589_v42, %v7640_v40 }
 0x561   : > { %v7713_v56 = vsub.f32 %v7492_v48, %v7640_v40  ;;  %v7717_v47 = vsub.f32 %v7500_v51, %v7640_v40  ;;  %v7721_v50 = vsub.f32 %v7497_v46, %v7640_v40  ;;  %v7729_v24 = vsub.f32 %v7505_v25, %v7640_v40 }
 0x562   : > { %v7733_v48 = vsub.f32 %v7512_v1, %v7640_v40  ;;  %v7741_v17 = vsub.f32 %v7522_v59, %v7640_v40  ;;  %v7747_v25 = vsub.f32 %v7517_v10, %v7640_v40  ;;  %v7754_v42 = vsub.f32 %v7525_v0, %v7640_v40 }
 0x563   : > { %v4706_v49 = vmul.f32 %v7713_v56, %v7713_v56  ;;  %v4707_v33 = vmul.f32 %v7717_v47, %v7717_v47  ;;  %v4708_v51 = vmul.f32 %v7721_v50, %v7721_v50  ;;  %v4709_v55 = vmul.f32 %v7729_v24, %v7729_v24 }
 0x564   : > { %v4710_v1 = vmul.f32 %v7733_v48, %v7733_v48  ;;  %v4711_v59 = vmul.f32 %v7741_v17, %v7741_v17  ;;  %v7761_v10 = vsub.f32 %v7532_v60, %v7640_v40  ;;  %v4712_v18 = vmul.f32 %v7747_v25, %v7747_v25 }
 0x565   : > { %v4742_v46 = vmul.f32 %v4706_v49, %v8304_v45  ;;  %v4743_v19 = vmul.f32 %v4707_v33, %v8279_v54  ;;  %v4744_v31 = vmul.f32 %v4708_v51, %v8305_v28  ;;  %v4745_v20 = vmul.f32 %v4709_v55, %v8306_v12 }
 0x566   : > { %v4746_v37 = vmul.f32 %v4710_v1, %v6334_v2  ;;  %v7768_v0 = vsub.f32 %v7542_v26, %v7640_v40  ;;  %v4713_v43 = vmul.f32 %v7754_v42, %v7754_v42  ;;  %v4747_v44 = vmul.f32 %v4711_v59, %v8307_v30 }
 0x567   : > { %v4778_v27 = vadd.f32 %v4743_v19, %v4742_v46  ;;  %v7775_v60 = vsub.f32 %v7537_v15, %v7640_v40  ;;  %v4714_v33 = vmul.f32 %v7761_v10, %v7761_v10  ;;  %v4748_v51 = vmul.f32 %v4712_v18, %v8281_v13 }
 0x568   : > { %v7782_v26 = vsub.f32 %v7545_v11, %v7640_v40  ;;  %v4715_v19 = vmul.f32 %v7768_v0, %v7768_v0  ;;  %v4749_v55 = vmul.f32 %v4713_v43, %v8282_v62  ;;  %v7789_v15 = vsub.f32 %v7552_v41, %v7640_v40 }
 0x569   : > { %v4779_v36 = vadd.f32 %v4778_v27, %v4744_v31  ;;  %v4716_v31 = vmul.f32 %v7775_v60, %v7775_v60  ;;  %v8336_v27 = vld [vmem:[#allocation47_spill] sm:$0xff] }
 0x56a   : > { %v4750_v59 = vmul.f32 %v4714_v33, %v8336_v27  ;;  %v4717_v18 = vmul.f32 %v7782_v26, %v7782_v26  ;;  %v8342_v27 = vld [vmem:[#allocation50_spill] sm:$0xff] }
 0x56b   : > { %v4780_v57 = vadd.f32 %v4779_v36, %v4745_v20  ;;  %v8337_v36 = vld [vmem:[#allocation77_spill] sm:$0xff] }
 0x56c   : > { %v7796_v11 = vsub.f32 %v8337_v36, %v7640_v40 }
 0x56d   : > { %v4781_v49 = vadd.f32 %v4780_v57, %v4746_v37  ;;  %v8338_v37 = vld [vmem:[#allocation48_spill] sm:$0xff] }
 0x56e   : > { %v4751_v57 = vmul.f32 %v4715_v19, %v8338_v37  ;;  %v4719_v36 = vmul.f32 %v7796_v11, %v7796_v11  ;;  %v4753_v19 = vmul.f32 %v4717_v18, %v8342_v27  ;;  %v4723_v18 = vmul.f32 %v7648_v32, %v7648_v32 }
 0x56f   : > { %v4782_v46 = vadd.f32 %v4781_v49, %v4747_v44  ;;  %v8339_v44 = vld [vmem:[#allocation76_spill] sm:$0xff]  ;;  %v4718_v49 = vmul.f32 %v7789_v15, %v7789_v15 }
 0x570   : > { %v7803_v41 = vsub.f32 %v8339_v44, %v7640_v40  ;;  %v8343_v44 = vld [vmem:[#allocation51_spill] sm:$0xff] }
 0x571   : > { %v4783_v1 = vadd.f32 %v4782_v46, %v4748_v51  ;;  %v8340_v51 = vld [vmem:[#allocation49_spill] sm:$0xff]  ;;  %v4754_v37 = vmul.f32 %v4718_v49, %v8343_v44  ;;  %v4724_v49 = vmul.f32 %v7652_v16, %v7652_v16 }
 0x572   : > { %v4752_v33 = vmul.f32 %v4716_v31, %v8340_v51 }
 0x573   : > { %v4784_v20 = vadd.f32 %v4783_v1, %v4749_v55  ;;  %v8341_v55 = vld [vmem:[#allocation78_spill] sm:$0xff] }
 0x574   : > { %v7810_v1 = vsub.f32 %v8341_v55, %v7640_v40  ;;  %v4722_v40 = vmul.f32 %v7644_v63, %v7644_v63  ;;  %v8345_v55 = vld [vmem:[#allocation53_spill] sm:$0xff] }
 0x575   : > { %v4785_v43 = vadd.f32 %v4784_v20, %v4750_v59  ;;  %v4720_v20 = vmul.f32 %v7803_v41, %v7803_v41 }
 0x576   : > { %v4721_v31 = vmul.f32 %v7810_v1, %v7810_v1 }
 0x577   : > { %v4786_v46 = vadd.f32 %v4785_v43, %v4751_v57  ;;  %v8344_v57 = vld [vmem:[#allocation52_spill] sm:$0xff]  ;;  %v4756_v13 = vmul.f32 %v4720_v20, %v8345_v55  ;;  %v8349_v20 = vld [vmem:[#allocation57_spill] sm:$0xff] }
 0x578   : > { %v4755_v43 = vmul.f32 %v4719_v36, %v8344_v57 }
 0x579   : > { %v4787_v59 = vadd.f32 %v4786_v46, %v4752_v33  ;;  %v8346_v33 = vld [vmem:[#allocation54_spill] sm:$0xff] }
 0x57a   : > { %v4757_v46 = vmul.f32 %v4721_v31, %v8346_v33 }
 0x57b   : > { %v4788_v62 = vadd.f32 %v4787_v59, %v4753_v19  ;;  %v8347_v19 = vld [vmem:[#allocation55_spill] sm:$0xff] }
 0x57c   : > { %v4758_v59 = vmul.f32 %v4722_v40, %v8347_v19  ;;  %v8351_v40 = vld [vmem:[#allocation59_spill] sm:$0xff] }
 0x57d   : > { %v4789_v51 = vadd.f32 %v4788_v62, %v4754_v37  ;;  %v4725_v62 = vmul.f32 %v7656_v23, %v7656_v23  ;;  %v8348_v37 = vld [vmem:[#allocation56_spill] sm:$0xff] }
 0x57e   : > { %v4759_v36 = vmul.f32 %v4723_v18, %v8348_v37  ;;  %v8352_v18 = vld [vmem:[#allocation60_spill] sm:$0xff] }
 0x57f   : > { %v4790_v30 = vadd.f32 %v4789_v51, %v4755_v43  ;;  %v4726_v51 = vmul.f32 %v7660_v29, %v7660_v29  ;;  %v4760_v43 = vmul.f32 %v4724_v49, %v8349_v20  ;;  %v8353_v49 = vld [vmem:[#allocation61_spill] sm:$0xff] }
 0x581   : > { %v4791_v27 = vadd.f32 %v4790_v30, %v4756_v13  ;;  %v4727_v13 = vmul.f32 %v7664_v6, %v7664_v6  ;;  %v8350_v30 = vld [vmem:[#allocation58_spill] sm:$0xff] }
 0x582   : > { %v4761_v31 = vmul.f32 %v4725_v62, %v8350_v30  ;;  %v8354_v62 = vld [vmem:[#allocation62_spill] sm:$0xff] }
 0x583   : > { %v4792_v44 = vadd.f32 %v4791_v27, %v4757_v46  ;;  %v4728_v27 = vmul.f32 %v7668_v5, %v7668_v5  ;;  %v4762_v46 = vmul.f32 %v4726_v51, %v8351_v40  ;;  %v8355_v51 = vld [vmem:[#allocation63_spill] sm:$0xff] }
 0x585   : > { %v4793_v57 = vadd.f32 %v4792_v44, %v4758_v59  ;;  %v4729_v44 = vmul.f32 %v7672_v8, %v7672_v8  ;;  %v4763_v59 = vmul.f32 %v4727_v13, %v8352_v18  ;;  %v8356_v13 = vld [vmem:[#allocation64_spill] sm:$0xff] }
 0x587   : > { %v4794_v55 = vadd.f32 %v4793_v57, %v4759_v36  ;;  %v4730_v57 = vmul.f32 %v7676_v9, %v7676_v9  ;;  %v4764_v36 = vmul.f32 %v4728_v27, %v8353_v49  ;;  %v8357_v27 = vld [vmem:[#allocation65_spill] sm:$0xff] }
 0x589   : > { %v4795_v33 = vadd.f32 %v4794_v55, %v4760_v43  ;;  %v4731_v55 = vmul.f32 %v7679_v52, %v7679_v52  ;;  %v4765_v43 = vmul.f32 %v4729_v44, %v8354_v62  ;;  %v8358_v44 = vld [vmem:[#allocation66_spill] sm:$0xff] }
 0x58b   : > { %v4796_v19 = vadd.f32 %v4795_v33, %v4761_v31  ;;  %v4732_v33 = vmul.f32 %v7682_v14, %v7682_v14  ;;  %v4766_v31 = vmul.f32 %v4730_v57, %v8355_v51  ;;  %v8359_v57 = vld [vmem:[#allocation67_spill] sm:$0xff] }
 0x58d   : > { %v4797_v37 = vadd.f32 %v4796_v19, %v4762_v46  ;;  %v4733_v19 = vmul.f32 %v7685_v3, %v7685_v3  ;;  %v4767_v46 = vmul.f32 %v4731_v55, %v8356_v13  ;;  %v8360_v55 = vld [vmem:[#allocation68_spill] sm:$0xff] }
 0x58f   : > { %v4798_v20 = vadd.f32 %v4797_v37, %v4763_v59  ;;  %v4734_v37 = vmul.f32 %v7688_v38, %v7688_v38  ;;  %v4768_v59 = vmul.f32 %v4732_v33, %v8357_v27  ;;  %v8361_v33 = vld [vmem:[#allocation69_spill] sm:$0xff] }
 0x591   : > { %v4799_v30 = vadd.f32 %v4798_v20, %v4764_v36  ;;  %v4735_v20 = vmul.f32 %v7691_v7, %v7691_v7  ;;  %v4769_v36 = vmul.f32 %v4733_v19, %v8358_v44  ;;  %v8362_v19 = vld [vmem:[#allocation70_spill] sm:$0xff] }
 0x593   : > { %v4800_v40 = vadd.f32 %v4799_v30, %v4765_v43  ;;  %v4736_v30 = vmul.f32 %v7694_v53, %v7694_v53  ;;  %v4770_v43 = vmul.f32 %v4734_v37, %v8359_v57  ;;  %v8363_v37 = vld [vmem:[#allocation71_spill] sm:$0xff] }
 0x595   : > { %v4801_v18 = vadd.f32 %v4800_v40, %v4766_v31  ;;  %v4737_v40 = vmul.f32 %v7697_v4, %v7697_v4  ;;  %v4771_v31 = vmul.f32 %v4735_v20, %v8360_v55 }
 0x597   : > { %v4802_v49 = vadd.f32 %v4801_v18, %v4767_v46  ;;  %v4738_v18 = vmul.f32 %v7700_v21, %v7700_v21  ;;  %v4772_v46 = vmul.f32 %v4736_v30, %v8361_v33 }
 0x599   : > { %v4803_v62 = vadd.f32 %v4802_v49, %v4768_v59  ;;  %v4739_v49 = vmul.f32 %v7703_v34, %v7703_v34  ;;  %v4773_v59 = vmul.f32 %v4737_v40, %v8362_v19 }
 0x59b   : > { %v4804_v51 = vadd.f32 %v4803_v62, %v4769_v36  ;;  %v4740_v62 = vmul.f32 %v7706_v22, %v7706_v22  ;;  %v4774_v36 = vmul.f32 %v4738_v18, %v8363_v37  ;;  %v4775_v20 = vmul.f32 %v4739_v49, %v8333_v58 }
 0x59d   : > { %v4805_v13 = vadd.f32 %v4804_v51, %v4770_v43  ;;  %v4741_v51 = vmul.f32 %v7709_v39, %v7709_v39 }
 0x59f   : > { %v4806_v27 = vadd.f32 %v4805_v13, %v4771_v31  ;;  %v4776_v13 = vmul.f32 %v4740_v62, %v8334_v61  ;;  %v4777_v31 = vmul.f32 %v4741_v51, %v8335_v35 }
 0x5a1   : > { %v4807_v44 = vadd.f32 %v4806_v27, %v4772_v46 }
 0x5a3   : > { %v4808_v57 = vadd.f32 %v4807_v44, %v4773_v59 }
 0x5a5   : > { %v4809_v43 = vadd.f32 %v4808_v57, %v4774_v36 }
 0x5a7   : > { %v4810_v30 = vadd.f32 %v4809_v43, %v4775_v20  ;;  %v8364_v43 = vld [vmem:[#allocation43_spill] sm:$0xff] }
 0x5a9   : > { %v4811_v33 = vadd.f32 %v4810_v30, %v4776_v13  ;;  %v8365_v13 = vld [vmem:[#allocation44_spill] sm:$0xff]  ;;  %v8366_v30 = vld [vmem:[#allocation45_spill] sm:$0xff] }
 0x5ab   : > { %v4812_v40 = vadd.f32 %v4811_v33, %v4777_v31  ;;  %v8367_v31 = vld [vmem:[#allocation46_spill] sm:$0xff] }
 0x5ad   : > { %v4813_v27 = vrot.slane %v4812_v40, 4 }
 0x5af   : > { %v4814_v46 = vadd.f32 %v4813_v27, %v4812_v40  ;;  %v8368_v40 = vld [vmem:[#allocation47_spill] sm:$0xff]  ;;  %v8369_v27 = vld [vmem:[#allocation48_spill] sm:$0xff] }
 0x5b1   : > { %v4815_v19 = vrot.slane %v4814_v46, 2 }
 0x5b3   : > { %v4816_v55 = vadd.f32 %v4815_v19, %v4814_v46  ;;  %v8371_v46 = vld [vmem:[#allocation50_spill] sm:$0xff] }
 0x5b5   : > { %v4817_v2 = vrot.slane %v4816_v55, 1 }
 0x5b7   : > { %v4818_v18 = vadd.f32 %v4817_v2, %v4816_v55 }
 0x5b9   : > { %v4819_v44 = vmul.f32 0.00390625, %v4818_v18  ;;  %v8372_v18 = vld [vmem:[#allocation51_spill] sm:$0xff] }
 0x5bb   : > { %v4820_v59 = vadd.f32 1e-05, %v4819_v44  ;;  %v8373_v44 = vld [vmem:[#allocation52_spill] sm:$0xff] }
 0x5bd   : > { %5489 = vrsqrt.f32 %v4820_v59  ;;  %v8374_v59 = vld [vmem:[#allocation53_spill] sm:$0xff] }
 0x5ca   : > { %v5490_v37 = vpop.eup %5489 }
 0x5cb   : > { %v4822_v49 = vmul.f32 %v5490_v37, %v7713_v56  ;;  %v4823_v57 = vmul.f32 %v5490_v37, %v7717_v47  ;;  %v4824_v62 = vmul.f32 %v5490_v37, %v7721_v50  ;;  %v4825_v36 = vmul.f32 %v5490_v37, %v7729_v24 }
 0x5cc   : > { %v4826_v33 = vmul.f32 %v5490_v37, %v7733_v48  ;;  %v4827_v51 = vmul.f32 %v5490_v37, %v7741_v17  ;;  %v4828_v19 = vmul.f32 %v5490_v37, %v7747_v25  ;;  %v4829_v2 = vmul.f32 %v5490_v37, %v7754_v42 }
 0x5cd   : > { %v4830_v55 = vmul.f32 %v5490_v37, %v7761_v10  ;;  %v4831_v20 = vmul.f32 %v5490_v37, %v7768_v0  ;;  %v4832_v56 = vmul.f32 %v5490_v37, %v7775_v60  ;;  %v4833_v47 = vmul.f32 %v5490_v37, %v7782_v26 }
 0x5ce   : > { %v4834_v50 = vmul.f32 %v5490_v37, %v7789_v15  ;;  %v4835_v24 = vmul.f32 %v5490_v37, %v7796_v11  ;;  %v4836_v48 = vmul.f32 %v5490_v37, %v7803_v41  ;;  %v4837_v17 = vmul.f32 %v5490_v37, %v7810_v1 }
 0x5cf   : > { %v4838_v25 = vmul.f32 %v5490_v37, %v7644_v63  ;;  %v4839_v42 = vmul.f32 %v5490_v37, %v7648_v32  ;;  %v4840_v10 = vmul.f32 %v5490_v37, %v7652_v16  ;;  %v4841_v0 = vmul.f32 %v5490_v37, %v7656_v23 }
 0x5d0   : > { %v4842_v60 = vmul.f32 %v5490_v37, %v7660_v29  ;;  %v4843_v26 = vmul.f32 %v5490_v37, %v7664_v6  ;;  %v4844_v15 = vmul.f32 %v5490_v37, %v7668_v5  ;;  %v4845_v11 = vmul.f32 %v5490_v37, %v7672_v8 }
 0x5d1   : > { %v4846_v41 = vmul.f32 %v5490_v37, %v7676_v9  ;;  %v4847_v1 = vmul.f32 %v5490_v37, %v7679_v52  ;;  %v4848_v63 = vmul.f32 %v5490_v37, %v7682_v14  ;;  %v4849_v32 = vmul.f32 %v5490_v37, %v7685_v3 }
 0x5d2   : > { %v4850_v16 = vmul.f32 %v5490_v37, %v7688_v38  ;;  %v4851_v23 = vmul.f32 %v5490_v37, %v7691_v7  ;;  %v4852_v29 = vmul.f32 %v5490_v37, %v7694_v53  ;;  %v4853_v6 = vmul.f32 %v5490_v37, %v7697_v4 }
 0x5d3   : > { %v4854_v5 = vmul.f32 %v5490_v37, %v7700_v21  ;;  %v4855_v8 = vmul.f32 %v5490_v37, %v7703_v34  ;;  %v4856_v9 = vmul.f32 %v5490_v37, %v7706_v22  ;;  %v4857_v52 = vmul.f32 %v5490_v37, %v7709_v39  ;;  %v8370_v37 = vld [vmem:[#allocation49_spill] sm:$0xff] }
 0x5d4   : > { %v4858_v14 = vmul.f32 %v4822_v49, %v8304_v45  ;;  %v4859_v3 = vmul.f32 %v4823_v57, %v8279_v54  ;;  %v4860_v38 = vmul.f32 %v4824_v62, %v8305_v28  ;;  %v4861_v7 = vmul.f32 %v4825_v36, %v8306_v12  ;;  %v8375_v57 = vld [vmem:[#allocation54_spill] sm:$0xff]  ;;  %v8376_v36 = vld [vmem:[#allocation55_spill] sm:$0xff] }
 0x5d5   : > { %v4862_v53 = vmul.f32 %v4826_v33, %v8364_v43  ;;  %v4863_v4 = vmul.f32 %v4827_v51, %v8365_v13  ;;  %v4864_v21 = vmul.f32 %v4828_v19, %v8366_v30  ;;  %v4865_v34 = vmul.f32 %v4829_v2, %v8367_v31  ;;  %v8377_v51 = vld [vmem:[#allocation56_spill] sm:$0xff]  ;;  %v8378_v2 = vld [vmem:[#allocation57_spill] sm:$0xff] }
 0x5d6   : > { %v4866_v22 = vmul.f32 %v4830_v55, %v8368_v40  ;;  %v4867_v39 = vmul.f32 %v4831_v20, %v8369_v27  ;;  %v4868_v45 = vmul.f32 %v4832_v56, %v8370_v37  ;;  %v4869_v54 = vmul.f32 %v4833_v47, %v8371_v46  ;;  %v8379_v20 = vld [vmem:[#allocation58_spill] sm:$0xff]  ;;  %v8380_v56 = vld [vmem:[#allocation59_spill] sm:$0xff]  ;;  %v8381_v47 = vld [vmem:[#allocation60_spill] sm:$0xff] }
 0x5d7   : > { %v4870_v28 = vmul.f32 %v4834_v50, %v8372_v18  ;;  %v4871_v12 = vmul.f32 %v4835_v24, %v8373_v44  ;;  %v4872_v49 = vmul.f32 %v4836_v48, %v8374_v59  ;;  %v4873_v62 = vmul.f32 %v4837_v17, %v8375_v57  ;;  %v8382_v50 = vld [vmem:[#allocation61_spill] sm:$0xff]  ;;  %v8383_v24 = vld [vmem:[#allocation62_spill] sm:$0xff]  ;;  %v8384_v48 = vld [vmem:[#allocation63_spill] sm:$0xff] }
 0x5d8   : > { %v4874_v33 = vmul.f32 %v4838_v25, %v8376_v36  ;;  %v4875_v19 = vmul.f32 %v4839_v42, %v8377_v51  ;;  %v4876_v55 = vmul.f32 %v4840_v10, %v8378_v2  ;;  %v4877_v43 = vmul.f32 %v4841_v0, %v8379_v20  ;;  %v8385_v17 = vld [vmem:[#allocation64_spill] sm:$0xff]  ;;  %v8386_v25 = vld [vmem:[#allocation65_spill] sm:$0xff]  ;;  %v8387_v18 = vld [vmem:[#allocation66_spill] sm:$0xff] }
 0x5d9   : > { %v4878_v13 = vmul.f32 %v4842_v60, %v8380_v56  ;;  %v4879_v30 = vmul.f32 %v4843_v26, %v8381_v47  ;;  %v4880_v31 = vmul.f32 %v4844_v15, %v8382_v50  ;;  %v4881_v40 = vmul.f32 %v4845_v11, %v8383_v24  ;;  %v8388_v44 = vld [vmem:[#allocation67_spill] sm:$0xff]  ;;  %v8389_v59 = vld [vmem:[#allocation68_spill] sm:$0xff]  ;;  %v8390_v57 = vld [vmem:[#allocation69_spill] sm:$0xff] }
 0x5da   : > { %v4882_v27 = vmul.f32 %v4846_v41, %v8384_v48  ;;  %v4883_v37 = vmul.f32 %v4847_v1, %v8385_v17  ;;  %v4884_v46 = vmul.f32 %v4848_v63, %v8386_v25  ;;  %v4885_v42 = vmul.f32 %v4849_v32, %v8387_v18  ;;  %v8391_v36 = vld [vmem:[#allocation70_spill] sm:$0xff]  ;;  %v8392_v15 = vld [vmem:[#allocation71_spill] sm:$0xff]  ;;  %v8398_v47 = vld [vmem:[#allocation8_spill] sm:$0xff] }
 0x5db   : > { %v4886_v10 = vmul.f32 %v4850_v16, %v8388_v44  ;;  %v4887_v0 = vmul.f32 %v4851_v23, %v8389_v59  ;;  %v4888_v60 = vmul.f32 %v4852_v29, %v8390_v57  ;;  %v4889_v26 = vmul.f32 %v4853_v6, %v8391_v36  ;;  %v8393_v32 = vld [vmem:[#allocation3_spill] sm:$0xff]  ;;  %v8394_v23 = vld [vmem:[#allocation4_spill] sm:$0xff]  ;;  %v8395_v6 = vld [vmem:[#allocation5_spill] sm:$0xff] }
 0x5dc   : > { %v4890_v11 = vmul.f32 %v4854_v5, %v8392_v15  ;;  %v4891_v41 = vmul.f32 %v4855_v8, %v8333_v58  ;;  %v4892_v1 = vmul.f32 %v4856_v9, %v8334_v61  ;;  %v4893_v63 = vmul.f32 %v4857_v52, %v8335_v35  ;;  %v8396_v2 = vld [vmem:[#allocation6_spill] sm:$0xff]  ;;  %v8397_v56 = vld [vmem:[#allocation7_spill] sm:$0xff]  ;;  %v8399_v8 = vld [vmem:[#allocation9_spill] sm:$0xff] }
 0x5dd   : > { %v4894_v16 = vadd.f32 %v8393_v32, %v4858_v14  ;;  %v4895_v29 = vadd.f32 %v8394_v23, %v4859_v3  ;;  %v4896_v51 = vadd.f32 %v8395_v6, %v4860_v38  ;;  %v4897_v20 = vadd.f32 %v8396_v2, %v4861_v7  ;;  %v8400_v9 = vld [vmem:[#allocation10_spill] sm:$0xff]  ;;  %v8401_v52 = vld [vmem:[#allocation11_spill] sm:$0xff]  ;;  %v8402_v50 = vld [vmem:[#allocation12_spill] sm:$0xff] }
 0x5de   : > { %v4898_v5 = vadd.f32 %v8397_v56, %v4862_v53  ;;  %v4899_v58 = vadd.f32 %v8398_v47, %v4863_v4  ;;  %v4900_v61 = vadd.f32 %v8399_v8, %v4864_v21  ;;  %v4901_v35 = vadd.f32 %v8400_v9, %v4865_v34  ;;  %v8403_v24 = vld [vmem:[#allocation13_spill] sm:$0xff]  ;;  %v8404_v48 = vld [vmem:[#allocation14_spill] sm:$0xff]  ;;  %v8405_v53 = vld [vmem:[#allocation15_spill] sm:$0xff] }
 0x5df   : > { %v4902_v14 = vadd.f32 %v8401_v52, %v4866_v22  ;;  %v4903_v3 = vadd.f32 %v8402_v50, %v4867_v39  ;;  %v4904_v38 = vadd.f32 %v8403_v24, %v4868_v45  ;;  %v4905_v7 = vadd.f32 %v8404_v48, %v4869_v54  ;;  %4930 = vst [vmem:[%s7956_s13] sm:$0xff] %v4894_v16  ;;  %v8406_v21 = vld [vmem:[#allocation16_spill] sm:$0xff]  ;;  %v8407_v17 = vld [vmem:[#allocation17_spill] sm:$0xff]  ;;  %v8408_v25 = vld [vmem:[#allocation18_spill] sm:$0xff] }
 0x5e0   : > { %4931 = vst [vmem:[%s7956_s13 + $0x8] sm:$0xff] %v4895_v29  ;;  %4932 = vst [vmem:[%s7956_s13 + $0x10] sm:$0xff] %v4896_v51  ;;  %v4906_v4 = vadd.f32 %v8405_v53, %v4870_v28  ;;  %v4907_v34 = vadd.f32 %v8406_v21, %v4871_v12  ;;  %v4908_v22 = vadd.f32 %v8407_v17, %v4872_v49  ;;  %v8409_v45 = vld [vmem:[#allocation19_spill] sm:$0xff]  ;;  %v8410_v18 = vld [vmem:[#allocation20_spill] sm:$0xff] }
 0x5e1   : > { %4933 = vst [vmem:[%s7956_s13 + $0x18] sm:$0xff] %v4897_v20  ;;  %v4909_v39 = vadd.f32 %v8408_v25, %v4873_v62  ;;  %4934 = vst [vmem:[%s7956_s13 + $0x20] sm:$0xff] %v4898_v5  ;;  %v4910_v54 = vadd.f32 %v8409_v45, %v4874_v33  ;;  %v4911_v44 = vadd.f32 %v8410_v18, %v4875_v19  ;;  %v8411_v59 = vld [vmem:[#allocation21_spill] sm:$0xff]  ;;  %v8412_v57 = vld [vmem:[#allocation22_spill] sm:$0xff] }
 0x5e2   : > { %4935 = vst [vmem:[%s7956_s13 + $0x28] sm:$0xff] %v4899_v58  ;;  %4936 = vst [vmem:[%s7956_s13 + $0x30] sm:$0xff] %v4900_v61  ;;  %v4912_v28 = vadd.f32 %v8411_v59, %v4876_v55  ;;  %v4913_v12 = vadd.f32 %v8412_v57, %v4877_v43  ;;  %v8413_v49 = vld [vmem:[#allocation23_spill] sm:$0xff]  ;;  %v8414_v36 = vld [vmem:[#allocation24_spill] sm:$0xff] }
 0x5e3   : > { %4937 = vst [vmem:[%s7956_s13 + $0x38] sm:$0xff] %v4901_v35  ;;  %4938 = vst [vmem:[%s7956_s13 + $0x40] sm:$0xff] %v4902_v14  ;;  %v4914_v62 = vadd.f32 %v8413_v49, %v4878_v13  ;;  %v4915_v15 = vadd.f32 %v8414_v36, %v4879_v30  ;;  %v8415_v32 = vld [vmem:[#allocation25_spill] sm:$0xff]  ;;  %v8416_v16 = vld [vmem:[#allocation26_spill] sm:$0xff] }
 0x5e4   : > { %4939 = vst [vmem:[%s7956_s13 + $0x48] sm:$0xff] %v4903_v3  ;;  %4940 = vst [vmem:[%s7956_s13 + $0x50] sm:$0xff] %v4904_v38  ;;  %v4916_v33 = vadd.f32 %v8415_v32, %v4880_v31  ;;  %v4917_v19 = vadd.f32 %v8416_v16, %v4881_v40  ;;  %v8417_v55 = vld [vmem:[#allocation27_spill] sm:$0xff]  ;;  %v8418_v23 = vld [vmem:[#allocation28_spill] sm:$0xff] }
 0x5e5   : > { %4941 = vst [vmem:[%s7956_s13 + $0x58] sm:$0xff] %v4905_v7  ;;  %4942 = vst [vmem:[%s7956_s13 + $0x60] sm:$0xff] %v4906_v4  ;;  %v4918_v43 = vadd.f32 %v8417_v55, %v4882_v27  ;;  %v4919_v29 = vadd.f32 %v8418_v23, %v4883_v37  ;;  %v8419_v6 = vld [vmem:[#allocation29_spill] sm:$0xff]  ;;  %v8420_v51 = vld [vmem:[#allocation30_spill] sm:$0xff] }
 0x5e6   : > { %4943 = vst [vmem:[%s7956_s13 + $0x68] sm:$0xff] %v4907_v34  ;;  %4944 = vst [vmem:[%s7956_s13 + $0x70] sm:$0xff] %v4908_v22  ;;  %v4920_v13 = vadd.f32 %v8419_v6, %v4884_v46  ;;  %v4921_v30 = vadd.f32 %v8420_v51, %v4885_v42  ;;  %v8421_v31 = vld [vmem:[#allocation31_spill] sm:$0xff]  ;;  %v8422_v2 = vld [vmem:[#allocation32_spill] sm:$0xff] }
 0x5e7   : > { %4945 = vst [vmem:[%s7956_s13 + $0x78] sm:$0xff] %v4909_v39  ;;  %4946 = vst [vmem:[%s7956_s13 + $0x80] sm:$0xff] %v4910_v54  ;;  %v4922_v40 = vadd.f32 %v8421_v31, %v4886_v10  ;;  %v4923_v20 = vadd.f32 %v8422_v2, %v4887_v0  ;;  %v8423_v27 = vld [vmem:[#allocation33_spill] sm:$0xff]  ;;  %v8424_v56 = vld [vmem:[#allocation34_spill] sm:$0xff] }
 0x5e8   : > { %4947 = vst [vmem:[%s7956_s13 + $0x88] sm:$0xff] %v4911_v44  ;;  %4948 = vst [vmem:[%s7956_s13 + $0x90] sm:$0xff] %v4912_v28  ;;  %v4924_v37 = vadd.f32 %v8423_v27, %v4888_v60  ;;  %v4925_v46 = vadd.f32 %v8424_v56, %v4889_v26  ;;  %v8425_v42 = vld [vmem:[#allocation35_spill] sm:$0xff]  ;;  %v8426_v5 = vld [vmem:[#allocation36_spill] sm:$0xff] }
 0x5e9   : > { %4949 = vst [vmem:[%s7956_s13 + $0x98] sm:$0xff] %v4913_v12  ;;  %4950 = vst [vmem:[%s7956_s13 + $0xa0] sm:$0xff] %v4914_v62  ;;  %v4926_v10 = vadd.f32 %v8425_v42, %v4890_v11  ;;  %v4927_v47 = vadd.f32 %v8426_v5, %v4891_v41  ;;  %v8427_v0 = vld [vmem:[#allocation37_spill] sm:$0xff]  ;;  %v8428_v8 = vld [vmem:[#allocation38_spill] sm:$0xff] }
 0x5ea   : > { %4951 = vst [vmem:[%s7956_s13 + $0xa8] sm:$0xff] %v4915_v15  ;;  %4952 = vst [vmem:[%s7956_s13 + $0xb0] sm:$0xff] %v4916_v33  ;;  %v4928_v58 = vadd.f32 %v8427_v0, %v4892_v1  ;;  %v4929_v60 = vadd.f32 %v8428_v8, %v4893_v63 }
 0x5eb   : > { %4953 = vst [vmem:[%s7956_s13 + $0xb8] sm:$0xff] %v4917_v19  ;;  %4954 = vst [vmem:[%s7956_s13 + $0xc0] sm:$0xff] %v4918_v43 }
 0x5ec   : > { %4955 = vst [vmem:[%s7956_s13 + $0xc8] sm:$0xff] %v4919_v29  ;;  %4956 = vst [vmem:[%s7956_s13 + $0xd0] sm:$0xff] %v4920_v13 }
 0x5ed   : > { %4957 = vst [vmem:[%s7956_s13 + $0xd8] sm:$0xff] %v4921_v30  ;;  %4958 = vst [vmem:[%s7956_s13 + $0xe0] sm:$0xff] %v4922_v40 }
 0x5ee   : > { %4959 = vst [vmem:[%s7956_s13 + $0xe8] sm:$0xff] %v4923_v20  ;;  %4960 = vst [vmem:[%s7956_s13 + $0xf0] sm:$0xff] %v4924_v37 }
 0x5ef   : > { %4961 = vst [vmem:[%s7956_s13 + $0xf8] sm:$0xff] %v4925_v46  ;;  %4962 = vst [vmem:[%s7956_s13 + $0x100] sm:$0xff] %v4926_v10 }
 0x5f0   : > { %4963 = vst [vmem:[%s7956_s13 + $0x108] sm:$0xff] %v4927_v47  ;;  %4964 = vst [vmem:[%s7956_s13 + $0x110] sm:$0xff] %v4928_v58 }
 0x5f1   : > { %4965 = vst [vmem:[%s7956_s13 + $0x118] sm:$0xff] %v4929_v60 }
 0x5f2 PF: > { %s14_s15 = sadd.s32 1, %s5534_s15  }
 0x5f3   : > { %p11_p4 = scmp.ge.s32.totalorder %s14_s15, 4  }
 0x5f5   :  { %13 = sbr.rel (!%p11_p4) target bundleno = 1 (0x1), region = 66 }

</bundles_post_ra>
